<compile_context>
chip_gen: v7x
topology: tpu7x:2x2x1
jax: 0.10.0
libtpu: 0.0.40
codegen_flags: <defaults>
</compile_context>

<pallas_src>
import jax
import jax.numpy as jnp
from jax.experimental import pallas as pl
from jax.experimental.pallas import tpu as pltpu

LANE = 128


# ----------------------------------------------------------------------------
# Pallas kernel: full forward pass for one batch tile of TB examples
# ----------------------------------------------------------------------------
def tagger_kernel(ab_ref, mm_ref, mab_ref, mba_ref,
                  proj_w_ref, proj_b_ref,
                  f_w1_ref, f_b1_ref, f_w2_ref, f_b2_ref,
                  g_w1a_ref, g_w1b_ref, g_b1_ref, g_w2_ref, g_b2_ref,
                  h_w1a_ref, h_w1b_ref, h_b1_ref, h_w2_ref, h_b2_ref,
                  lin_w_ref, lin_b_ref,
                  out_ref, al_ref):
    f32 = jnp.float32
    bf16 = jnp.bfloat16

    Rp, Rh = mab_ref.shape             # fused premise / hypothesis row counts
    TB = out_ref.shape[0]

    def mxu(x_bf, w_bf):
        # bf16 MXU operands, f32 accumulation
        return jnp.dot(x_bf, w_bf, preferred_element_type=f32)

    def mxu_nt(x_bf, y_bf):
        # x @ y.T via rhs-transposed contraction (no explicit transpose / XLU)
        return jax.lax.dot_general(x_bf, y_bf, (((1,), (1,)), ((), ())),
                                   preferred_element_type=f32)

    def masked_softmax(logits, add_mask):
        # Row softmax restricted to per-example blocks via precomputed additive mask.
        x = logits + add_mask
        p = jnp.exp(x - jnp.max(x, axis=-1, keepdims=True))
        return p * pl.reciprocal(jnp.sum(p, axis=-1, keepdims=True), approx=True)

    # ---- shared projection & F network over stacked [premise; hypothesis] rows
    ab = ab_ref[0]                                                  # (R, E) bf16
    ab_p = mxu(ab, proj_w_ref[...]) + proj_b_ref[...]               # (R, P) f32
    ab_p_bf = ab_p.astype(bf16)                                     # hoisted cast (used 4x)

    f_h = jnp.maximum(mxu(ab_p_bf, f_w1_ref[...]) + f_b1_ref[...], 0.0)
    f_o = jnp.maximum(mxu(f_h.astype(bf16), f_w2_ref[...]) + f_b2_ref[...], 0.0)
    f_o_bf = f_o.astype(bf16)                                       # hoisted cast (used 2x)
    fa_bf, fb_bf = f_o_bf[:Rp], f_o_bf[Rp:]
    a_p_bf, b_p_bf = ab_p_bf[:Rp], ab_p_bf[Rp:]

    # ---- attention: both directions as plain matmuls + masked row softmaxes
    e_ab = mxu_nt(fa_bf, fb_bf)                                     # (Rp, Rh)
    e_ba = mxu_nt(fb_bf, fa_bf)                                     # (Rh, Rp)
    beta = mxu(masked_softmax(e_ab, mab_ref[...]).astype(bf16), b_p_bf)    # (Rp, P)
    alpha = mxu(masked_softmax(e_ba, mba_ref[...]).astype(bf16), a_p_bf)   # (Rh, P)

    # ---- G network: aligned halves written into a VMEM scratch (no concat copy)
    al_ref[pl.ds(0, Rp), :] = beta.astype(bf16)
    al_ref[pl.ds(Rp, Rh), :] = alpha.astype(bf16)
    g_h = jnp.maximum(mxu(ab_p_bf, g_w1a_ref[...])
                      + mxu(al_ref[...], g_w1b_ref[...]) + g_b1_ref[...], 0.0)
    g_o = jnp.maximum(mxu(g_h.astype(bf16), g_w2_ref[...]) + g_b2_ref[...], 0.0)  # (R, V)

    # ---- masked sum over sequence: one matmul with block-diag mask matrix
    v12 = mxu(mm_ref[0], g_o.astype(bf16))                          # (2*TB, V) f32
    v12_bf = v12.astype(bf16)
    v1_bf, v2_bf = v12_bf[:TB], v12_bf[TB:]

    # ---- H network + output linear
    h_h = jnp.maximum(mxu(v1_bf, h_w1a_ref[...]) + mxu(v2_bf, h_w1b_ref[...])
                      + h_b1_ref[...], 0.0)
    h_o = jnp.maximum(mxu(h_h.astype(bf16), h_w2_ref[...]) + h_b2_ref[...], 0.0)  # (TB, V)
    out_ref[...] = mxu(h_o.astype(bf16), lin_w_ref[...]) + lin_b_ref[...]         # (TB, Tpad)


# ----------------------------------------------------------------------------
# Host-side helpers: padding, pre-splitting, block-diagonal mask matrices
# ----------------------------------------------------------------------------
def _pad_to(x, axis, mult):
    pad = (-x.shape[axis]) % mult
    if pad == 0:
        return x
    widths = [(0, 0)] * x.ndim
    widths[axis] = (0, pad)
    return jnp.pad(x, widths)


def _build_mask_mats(pmask, hmask, tb):
    """(nT, 2*TB, TB*(Lp+Lh)) block-diagonal mask matrices so that
    [v1; v2] = M @ G_out (mask multiply + per-example sequence sum as one matmul)."""
    B, Lp = pmask.shape
    Lh = hmask.shape[1]
    nT = B // tb
    eye = jnp.eye(tb, dtype=pmask.dtype)
    pm = (eye[None, :, :, None] * pmask.reshape(nT, 1, tb, Lp)).reshape(nT, tb, tb * Lp)
    hm = (eye[None, :, :, None] * hmask.reshape(nT, 1, tb, Lh)).reshape(nT, tb, tb * Lh)
    top = jnp.concatenate([pm, jnp.zeros((nT, tb, tb * Lh), pm.dtype)], axis=-1)
    bot = jnp.concatenate([jnp.zeros((nT, tb, tb * Lp), hm.dtype), hm], axis=-1)
    return jnp.concatenate([top, bot], axis=1)


def _build_attn_masks(tb, lp, lh, neg=-1e9):
    """Additive block-diagonal validity masks for the fused attention logits:
    0 inside each example's own block, -1e9 elsewhere (grid-invariant constants)."""
    rg = jnp.arange(tb * lp, dtype=jnp.int32) // lp
    cg = jnp.arange(tb * lh, dtype=jnp.int32) // lh
    same = rg[:, None] == cg[None, :]
    m_ab = jnp.where(same, 0.0, neg).astype(jnp.float32)   # (Rp, Rh)
    return m_ab, m_ab.T                                     # (Rh, Rp)


def tagger_pallas(prem_emb, hyp_emb, pmask, hmask, params, tile_b=16):
    B, Lp, _ = prem_emb.shape
    Lh = hyp_emb.shape[1]
    pdim = params['proj_w'].shape[1]
    vdim = params['g_w2'].shape[1]
    tags = params['lin_w'].shape[1]
    bf16 = jnp.bfloat16

    Rp, Rh = tile_b * Lp, tile_b * Lh
    R = Rp + Rh
    assert Rp % 8 == 0 and Rh % 8 == 0, "TB*Lp and TB*Lh must be multiples of 8"

    def pad2(w):        # zero-pad both dims of a 2-D weight to lane multiples
        return _pad_to(_pad_to(w, 0, LANE), 1, LANE)

    # pre-split the concat-input weights on the host (no in-kernel ref slicing)
    g_w1a, g_w1b = params['g_w1'][:pdim], params['g_w1'][pdim:]
    h_w1a, h_w1b = params['h_w1'][:vdim], params['h_w1'][vdim:]

    W = {k: pad2(v).astype(bf16) for k, v in {
        'proj_w': params['proj_w'], 'f_w1': params['f_w1'], 'f_w2': params['f_w2'],
        'g_w1a': g_w1a, 'g_w1b': g_w1b, 'g_w2': params['g_w2'],
        'h_w1a': h_w1a, 'h_w1b': h_w1b, 'h_w2': params['h_w2'],
        'lin_w': params['lin_w']}.items()}
    Bs = {k: _pad_to(v, 1, LANE).astype(jnp.float32) for k, v in {
        'proj_b': params['proj_b'], 'f_b1': params['f_b1'], 'f_b2': params['f_b2'],
        'g_b1': params['g_b1'], 'g_b2': params['g_b2'],
        'h_b1': params['h_b1'], 'h_b2': params['h_b2'],
        'lin_b': params['lin_b']}.items()}

    # pad batch to a multiple of tile_b, embedding dim to a lane multiple, cast bf16
    prem = _pad_to(_pad_to(prem_emb, 0, tile_b), 2, LANE).astype(bf16)
    hyp = _pad_to(_pad_to(hyp_emb, 0, tile_b), 2, LANE).astype(bf16)
    pm = _pad_to(pmask, 0, tile_b)
    hm = _pad_to(hmask, 0, tile_b)
    mm = _build_mask_mats(pm, hm, tile_b).astype(bf16)

    Bp, Ep = prem.shape[0], prem.shape[2]
    nT = Bp // tile_b
    Tpad = W['lin_w'].shape[1]
    Ppad = W['proj_w'].shape[1]
    Fpad = W['f_w2'].shape[1]
    Vpad = W['g_w2'].shape[1]

    # host-side stacking of premise+hypothesis rows per tile (removes the
    # in-kernel concatenate copy before the shared projection / F network)
    stacked = jnp.concatenate([prem.reshape(nT, Rp, Ep),
                               hyp.reshape(nT, Rh, Ep)], axis=1)     # (nT, R, Ep)

    mask_ab, mask_ba = _build_attn_masks(tile_b, Lp, Lh)

    wb = [W['proj_w'], Bs['proj_b'],
          W['f_w1'], Bs['f_b1'], W['f_w2'], Bs['f_b2'],
          W['g_w1a'], W['g_w1b'], Bs['g_b1'], W['g_w2'], Bs['g_b2'],
          W['h_w1a'], W['h_w1b'], Bs['h_b1'], W['h_w2'], Bs['h_b2'],
          W['lin_w'], Bs['lin_b']]

    in_specs = [
        pl.BlockSpec((1, R, Ep), lambda t: (t, 0, 0)),          # stacked embeddings
        pl.BlockSpec((1, 2 * tile_b, R), lambda t: (t, 0, 0)),  # block-diag sum mask
        pl.BlockSpec((Rp, Rh), lambda t: (0, 0)),               # attention mask a->b
        pl.BlockSpec((Rh, Rp), lambda t: (0, 0)),               # attention mask b->a
    ] + [pl.BlockSpec(x.shape, lambda t: (0, 0)) for x in wb]

    # advisory cost estimate so XLA schedules surrounding ops sensibly
    def mmf(M, K, N):
        return 2 * M * K * N
    flops_tile = (mmf(R, Ep, Ppad)
                  + mmf(R, Ppad, Fpad) + mmf(R, Fpad, Fpad)
                  + mmf(Rp, Fpad, Rh) + mmf(Rh, Fpad, Rp)
                  + mmf(Rp, Rh, Ppad) + mmf(Rh, Rp, Ppad)
                  + 2 * mmf(R, Ppad, Vpad) + mmf(R, Vpad, Vpad)
                  + mmf(2 * tile_b, R, Vpad)
                  + 3 * mmf(tile_b, Vpad, Vpad)
                  + mmf(tile_b, Vpad, Tpad))
    nbytes = lambda x: int(x.size) * x.dtype.itemsize
    bytes_accessed = (sum(nbytes(x) for x in wb)
                      + nbytes(mask_ab) + nbytes(mask_ba)
                      + nbytes(stacked) + nbytes(mm) + Bp * Tpad * 4)
    cost = pl.CostEstimate(flops=int(nT * flops_tile),
                           transcendentals=int(nT * 2 * Rp * Rh),
                           bytes_accessed=int(bytes_accessed))

    out = pl.pallas_call(
        tagger_kernel,
        out_shape=jax.ShapeDtypeStruct((Bp, Tpad), jnp.float32),
        grid=(nT,),
        in_specs=in_specs,
        out_specs=pl.BlockSpec((tile_b, Tpad), lambda t: (t, 0)),
        scratch_shapes=[pltpu.VMEM((R, Ppad), bf16)],   # [beta; alpha] aligned block
        compiler_params=pltpu.CompilerParams(dimension_semantics=("parallel",)),
        cost_estimate=cost,
    )(stacked, mm, mask_ab, mask_ba, *wb)

    return out[:B, :tags]


# ----------------------------------------------------------------------------
# Glue: embedding-table construction, token preprocessing, parameter init
# (mirrors Tagger.__init__ / forward preprocessing)
# ----------------------------------------------------------------------------
def build_embedding_table(key, vocab, edim):
    k_vecs, k_pad = jax.random.split(key)
    vecs = jax.random.normal(k_vecs, (vocab, edim), jnp.float32)
    vecs = vecs / jnp.linalg.norm(vecs, axis=1, keepdims=True)          # normalize rows
    pads = jax.random.normal(k_pad, (100, edim), jnp.float32)           # 100 randn <unk> rows
    vecs = jnp.concatenate([vecs, pads, jnp.zeros((1, edim), jnp.float32)], 0)
    vecs = vecs.at[0].set(0.0).at[1].set(0.0)                           # zero rows 0, 1
    return vecs


def preprocess(tokens, unknown_idx, key):
    # replace token id 0 with a random unknown index in [unknown_idx, unknown_idx+99)
    rand_idx = jax.random.randint(key, tokens.shape, unknown_idx, unknown_idx + 99)
    tokens = jnp.where(tokens == 0, rand_idx, tokens)
    # padding mask: 0 where token id == 1, else 1
    mask = jnp.where(tokens == 1, 0.0, 1.0).astype(jnp.float32)         # (B, L) lane-dense
    return tokens, mask


def init_linear(key, in_dim, out_dim, scale=0.05):
    kw, kb = jax.random.split(key)
    w = scale * jax.random.normal(kw, (in_dim, out_dim), jnp.float32)
    b = scale * jax.random.normal(kb, (1, out_dim), jnp.float32)
    return w, b


def init_params(key, edim, pdim, fdim, vdim, tags):
    ks = jax.random.split(key, 8)
    p = {}
    p['proj_w'], p['proj_b'] = init_linear(ks[0], edim, pdim)
    p['f_w1'], p['f_b1'] = init_linear(ks[1], pdim, fdim)
    p['f_w2'], p['f_b2'] = init_linear(ks[2], fdim, fdim)
    p['g_w1'], p['g_b1'] = init_linear(ks[3], 2 * fdim, vdim)
    p['g_w2'], p['g_b2'] = init_linear(ks[4], vdim, vdim)
    p['h_w1'], p['h_b1'] = init_linear(ks[5], 2 * vdim, vdim)
    p['h_w2'], p['h_b2'] = init_linear(ks[6], vdim, vdim)
    p['lin_w'], p['lin_b'] = init_linear(ks[7], vdim, tags)
    return p


# Pure-JAX f32 reference (same math, full batch) for a correctness check.
def tagger_reference(prem_emb, hyp_emb, pmask, hmask, p):
    def ff(x, w1, b1, w2, b2):
        h = jnp.maximum(x @ w1 + b1, 0.0)
        return jnp.maximum(h @ w2 + b2, 0.0)

    a = prem_emb @ p['proj_w'] + p['proj_b']
    b = hyp_emb @ p['proj_w'] + p['proj_b']
    fa = ff(a, p['f_w1'], p['f_b1'], p['f_w2'], p['f_b2'])
    fb = ff(b, p['f_w1'], p['f_b1'], p['f_w2'], p['f_b2'])
    e = jnp.einsum('bik,bjk->bij', fa, fb)
    beta = jnp.einsum('bij,bjp->bip', jax.nn.softmax(e, axis=-1), b)
    alpha = jnp.einsum('bji,bip->bjp',
                       jax.nn.softmax(jnp.swapaxes(e, 1, 2), axis=-1), a)
    wa = jnp.concatenate([a, beta], axis=-1)
    wb = jnp.concatenate([b, alpha], axis=-1)
    v1 = (ff(wa, p['g_w1'], p['g_b1'], p['g_w2'], p['g_b2']) * pmask[..., None]).sum(1)
    v2 = (ff(wb, p['g_w1'], p['g_b1'], p['g_w2'], p['g_b2']) * hmask[..., None]).sum(1)
    h_in = jnp.concatenate([v1, v2], axis=-1)
    y = ff(h_in, p['h_w1'], p['h_b1'], p['h_w2'], p['h_b2'])
    return y @ p['lin_w'] + p['lin_b']


if __name__ == "__main__":
    # Small shapes consistent with the forward pass.  The module hard-codes the
    # mask width to 200 and feeds cat(prem, beta) into G(f_dim*2, ...), which
    # forces projected_dim == f_dim == v_dim == 200.
    B, L = 32, 8               # batch sized so the TB=16 batch-tiled grid has >= 2 steps
    VOCAB, EDIM = 50, 64
    PDIM = FDIM = VDIM = 200
    TAGS = 3
    TILE_B = 16                # R = TB*(Lp+Lh) = 256 rows per MXU push, (128,128) logits
    UNKNOWN_IDX = VOCAB        # vectors.shape[0]

    key = jax.random.PRNGKey(0)
    k_emb, k_par, k_pt, k_ht, k_pr, k_hr = jax.random.split(key, 6)

    emb_table = build_embedding_table(k_emb, VOCAB, EDIM)        # (VOCAB+101, EDIM)
    params = init_params(k_par, EDIM, PDIM, FDIM, VDIM, TAGS)

    premise_data = jax.random.randint(k_pt, (B, L), 0, VOCAB)
    hyp_data = jax.random.randint(k_ht, (B, L), 0, VOCAB)

    prem_tok, pmask = preprocess(premise_data, UNKNOWN_IDX, k_pr)
    hyp_tok, hmask = preprocess(hyp_data, UNKNOWN_IDX, k_hr)

    prem_emb = jnp.take(emb_table, prem_tok, axis=0)             # (B, L, EDIM)
    hyp_emb = jnp.take(emb_table, hyp_tok, axis=0)               # (B, L, EDIM)

    out = tagger_pallas(prem_emb, hyp_emb, pmask, hmask, params, tile_b=TILE_B)
    out = jax.block_until_ready(out)

    ref = tagger_reference(prem_emb, hyp_emb, pmask, hmask, params)
    assert out.shape == (B, TAGS)
    assert jnp.allclose(out, ref, atol=5e-2, rtol=5e-2), (out, ref)

    print("KERNEL_OK")
</pallas_src>

<mosaic_0001>
module attributes {stable_mosaic.version = 11 : i64} {
  func.func @tagger_kernel(%arg0: i32, %arg1: memref<1x256x128xbf16, #tpu.memory_space<vmem>>, %arg2: memref<1x32x256xbf16, #tpu.memory_space<vmem>>, %arg3: memref<128x128xf32, #tpu.memory_space<vmem>>, %arg4: memref<128x128xf32, #tpu.memory_space<vmem>>, %arg5: memref<128x256xbf16, #tpu.memory_space<vmem>>, %arg6: memref<1x256xf32, #tpu.memory_space<vmem>>, %arg7: memref<256x256xbf16, #tpu.memory_space<vmem>>, %arg8: memref<1x256xf32, #tpu.memory_space<vmem>>, %arg9: memref<256x256xbf16, #tpu.memory_space<vmem>>, %arg10: memref<1x256xf32, #tpu.memory_space<vmem>>, %arg11: memref<256x256xbf16, #tpu.memory_space<vmem>>, %arg12: memref<256x256xbf16, #tpu.memory_space<vmem>>, %arg13: memref<1x256xf32, #tpu.memory_space<vmem>>, %arg14: memref<256x256xbf16, #tpu.memory_space<vmem>>, %arg15: memref<1x256xf32, #tpu.memory_space<vmem>>, %arg16: memref<256x256xbf16, #tpu.memory_space<vmem>>, %arg17: memref<256x256xbf16, #tpu.memory_space<vmem>>, %arg18: memref<1x256xf32, #tpu.memory_space<vmem>>, %arg19: memref<256x256xbf16, #tpu.memory_space<vmem>>, %arg20: memref<1x256xf32, #tpu.memory_space<vmem>>, %arg21: memref<256x128xbf16, #tpu.memory_space<vmem>>, %arg22: memref<1x128xf32, #tpu.memory_space<vmem>>, %arg23: memref<16x128xf32, #tpu.memory_space<vmem>>, %arg24: memref<256x256xbf16, #tpu.memory_space<vmem>>) attributes {dimension_semantics = [#tpu.dimension_semantics<parallel>], iteration_bounds = array<i64: 2>, scalar_prefetch = 0 : i64, scratch_operands = 1 : i64, tpu.core_type = #tpu.core_type<tc>, window_params = [{transform_indices = @transform_0, window_bounds = array<i64: 1, 256, 128>}, {transform_indices = @transform_1, window_bounds = array<i64: 1, 32, 256>}, {pipeline_mode = #tpu.pipeline_mode<synchronous>, transform_indices = @transform_2, window_bounds = array<i64: 128, 128>}, {pipeline_mode = #tpu.pipeline_mode<synchronous>, transform_indices = @transform_3, window_bounds = array<i64: 128, 128>}, {pipeline_mode = #tpu.pipeline_mode<synchronous>, transform_indices = @transform_4, window_bounds = array<i64: 128, 256>}, {pipeline_mode = #tpu.pipeline_mode<synchronous>, transform_indices = @transform_5, window_bounds = array<i64: 1, 256>}, {pipeline_mode = #tpu.pipeline_mode<synchronous>, transform_indices = @transform_6, window_bounds = array<i64: 256, 256>}, {pipeline_mode = #tpu.pipeline_mode<synchronous>, transform_indices = @transform_7, window_bounds = array<i64: 1, 256>}, {pipeline_mode = #tpu.pipeline_mode<synchronous>, transform_indices = @transform_8, window_bounds = array<i64: 256, 256>}, {pipeline_mode = #tpu.pipeline_mode<synchronous>, transform_indices = @transform_9, window_bounds = array<i64: 1, 256>}, {pipeline_mode = #tpu.pipeline_mode<synchronous>, transform_indices = @transform_10, window_bounds = array<i64: 256, 256>}, {pipeline_mode = #tpu.pipeline_mode<synchronous>, transform_indices = @transform_11, window_bounds = array<i64: 256, 256>}, {pipeline_mode = #tpu.pipeline_mode<synchronous>, transform_indices = @transform_12, window_bounds = array<i64: 1, 256>}, {pipeline_mode = #tpu.pipeline_mode<synchronous>, transform_indices = @transform_13, window_bounds = array<i64: 256, 256>}, {pipeline_mode = #tpu.pipeline_mode<synchronous>, transform_indices = @transform_14, window_bounds = array<i64: 1, 256>}, {pipeline_mode = #tpu.pipeline_mode<synchronous>, transform_indices = @transform_15, window_bounds = array<i64: 256, 256>}, {pipeline_mode = #tpu.pipeline_mode<synchronous>, transform_indices = @transform_16, window_bounds = array<i64: 256, 256>}, {pipeline_mode = #tpu.pipeline_mode<synchronous>, transform_indices = @transform_17, window_bounds = array<i64: 1, 256>}, {pipeline_mode = #tpu.pipeline_mode<synchronous>, transform_indices = @transform_18, window_bounds = array<i64: 256, 256>}, {pipeline_mode = #tpu.pipeline_mode<synchronous>, transform_indices = @transform_19, window_bounds = array<i64: 1, 256>}, {pipeline_mode = #tpu.pipeline_mode<synchronous>, transform_indices = @transform_20, window_bounds = array<i64: 256, 128>}, {pipeline_mode = #tpu.pipeline_mode<synchronous>, transform_indices = @transform_21, window_bounds = array<i64: 1, 128>}, {transform_indices = @transform_22, window_bounds = array<i64: 16, 128>}]} {
    %c0 = arith.constant 0 : index
    %c0_0 = arith.constant 0 : index
    %c0_1 = arith.constant 0 : index
    %0 = vector.load %arg1[%c0, %c0_0, %c0_1] : memref<1x256x128xbf16, #tpu.memory_space<vmem>>, vector<1x256x128xbf16>
    %1 = vector.shape_cast %0 : vector<1x256x128xbf16> to vector<256x128xbf16>
    %c0_2 = arith.constant 0 : index
    %c0_3 = arith.constant 0 : index
    %2 = vector.load %arg5[%c0_2, %c0_3] : memref<128x256xbf16, #tpu.memory_space<vmem>>, vector<128x256xbf16>
    %cst = arith.constant dense<0.000000e+00> : vector<256x256xf32>
    %3 = tpu.matmul %1, %2, %cst {dimension_numbers = #tpu.dot_dimension_numbers<[1], [0], [0], [1], [0, 0, 1, 1], [], []>} : vector<256x128xbf16>, vector<128x256xbf16>, vector<256x256xf32> -> vector<256x256xf32>
    %c0_4 = arith.constant 0 : index
    %c0_5 = arith.constant 0 : index
    %4 = vector.load %arg6[%c0_4, %c0_5] : memref<1x256xf32, #tpu.memory_space<vmem>>, vector<1x256xf32>
    %5 = vector.broadcast %4 : vector<1x256xf32> to vector<256x256xf32>
    %6 = arith.addf %3, %5 : vector<256x256xf32>
    %7 = arith.truncf %6 : vector<256x256xf32> to vector<256x256xbf16>
    %c0_6 = arith.constant 0 : index
    %c0_7 = arith.constant 0 : index
    %8 = vector.load %arg7[%c0_6, %c0_7] : memref<256x256xbf16, #tpu.memory_space<vmem>>, vector<256x256xbf16>
    %cst_8 = arith.constant dense<0.000000e+00> : vector<256x256xf32>
    %9 = tpu.matmul %7, %8, %cst_8 {dimension_numbers = #tpu.dot_dimension_numbers<[1], [0], [0], [1], [0, 0, 1, 1], [], []>} : vector<256x256xbf16>, vector<256x256xbf16>, vector<256x256xf32> -> vector<256x256xf32>
    %c0_9 = arith.constant 0 : index
    %c0_10 = arith.constant 0 : index
    %10 = vector.load %arg8[%c0_9, %c0_10] : memref<1x256xf32, #tpu.memory_space<vmem>>, vector<1x256xf32>
    %11 = vector.broadcast %10 : vector<1x256xf32> to vector<256x256xf32>
    %12 = arith.addf %9, %11 : vector<256x256xf32>
    %cst_11 = arith.constant 0.000000e+00 : f32
    %13 = vector.broadcast %cst_11 : f32 to vector<256x256xf32>
    %14 = arith.maximumf %12, %13 : vector<256x256xf32>
    %15 = arith.truncf %14 : vector<256x256xf32> to vector<256x256xbf16>
    %c0_12 = arith.constant 0 : index
    %c0_13 = arith.constant 0 : index
    %16 = vector.load %arg9[%c0_12, %c0_13] : memref<256x256xbf16, #tpu.memory_space<vmem>>, vector<256x256xbf16>
    %cst_14 = arith.constant dense<0.000000e+00> : vector<256x256xf32>
    %17 = tpu.matmul %15, %16, %cst_14 {dimension_numbers = #tpu.dot_dimension_numbers<[1], [0], [0], [1], [0, 0, 1, 1], [], []>} : vector<256x256xbf16>, vector<256x256xbf16>, vector<256x256xf32> -> vector<256x256xf32>
    %c0_15 = arith.constant 0 : index
    %c0_16 = arith.constant 0 : index
    %18 = vector.load %arg10[%c0_15, %c0_16] : memref<1x256xf32, #tpu.memory_space<vmem>>, vector<1x256xf32>
    %19 = vector.broadcast %18 : vector<1x256xf32> to vector<256x256xf32>
    %20 = arith.addf %17, %19 : vector<256x256xf32>
    %cst_17 = arith.constant 0.000000e+00 : f32
    %21 = vector.broadcast %cst_17 : f32 to vector<256x256xf32>
    %22 = arith.maximumf %20, %21 : vector<256x256xf32>
    %23 = arith.truncf %22 : vector<256x256xf32> to vector<256x256xbf16>
    %24 = vector.extract_strided_slice %23 {offsets = [0, 0], sizes = [128, 256], strides = [1, 1]} : vector<256x256xbf16> to vector<128x256xbf16>
    %25 = vector.extract_strided_slice %23 {offsets = [128, 0], sizes = [128, 256], strides = [1, 1]} : vector<256x256xbf16> to vector<128x256xbf16>
    %26 = vector.extract_strided_slice %7 {offsets = [0, 0], sizes = [128, 256], strides = [1, 1]} : vector<256x256xbf16> to vector<128x256xbf16>
    %27 = vector.extract_strided_slice %7 {offsets = [128, 0], sizes = [128, 256], strides = [1, 1]} : vector<256x256xbf16> to vector<128x256xbf16>
    %cst_18 = arith.constant dense<0.000000e+00> : vector<128x128xf32>
    %28 = tpu.matmul %24, %25, %cst_18 {dimension_numbers = #tpu.dot_dimension_numbers<[1], [1], [0], [0], [0, 0, 1, 0], [], []>} : vector<128x256xbf16>, vector<128x256xbf16>, vector<128x128xf32> -> vector<128x128xf32>
    %cst_19 = arith.constant dense<0.000000e+00> : vector<128x128xf32>
    %29 = tpu.matmul %25, %24, %cst_19 {dimension_numbers = #tpu.dot_dimension_numbers<[1], [1], [0], [0], [0, 0, 1, 0], [], []>} : vector<128x256xbf16>, vector<128x256xbf16>, vector<128x128xf32> -> vector<128x128xf32>
    %c0_20 = arith.constant 0 : index
    %c0_21 = arith.constant 0 : index
    %30 = vector.load %arg3[%c0_20, %c0_21] : memref<128x128xf32, #tpu.memory_space<vmem>>, vector<128x128xf32>
    %31 = arith.addf %28, %30 : vector<128x128xf32>
    %cst_22 = arith.constant dense<0xFF800000> : vector<128xf32>
    %32 = vector.multi_reduction <maximumf>, %31, %cst_22 [1] : vector<128x128xf32> to vector<128xf32>
    %33 = vector.shape_cast %32 : vector<128xf32> to vector<128x1xf32>
    %34 = vector.broadcast %33 : vector<128x1xf32> to vector<128x128xf32>
    %35 = arith.subf %31, %34 : vector<128x128xf32>
    %36 = math.exp %35 : vector<128x128xf32>
    %cst_23 = arith.constant dense<0.000000e+00> : vector<128xf32>
    %37 = vector.multi_reduction <add>, %36, %cst_23 [1] : vector<128x128xf32> to vector<128xf32>
    %38 = vector.shape_cast %37 : vector<128xf32> to vector<128x1xf32>
    %39 = tpu.reciprocal %38 {approx = true} : vector<128x1xf32> -> vector<128x1xf32>
    %40 = vector.broadcast %39 : vector<128x1xf32> to vector<128x128xf32>
    %41 = arith.mulf %36, %40 : vector<128x128xf32>
    %42 = arith.truncf %41 : vector<128x128xf32> to vector<128x128xbf16>
    %cst_24 = arith.constant dense<0.000000e+00> : vector<128x256xf32>
    %43 = tpu.matmul %42, %27, %cst_24 {dimension_numbers = #tpu.dot_dimension_numbers<[1], [0], [0], [1], [0, 0, 1, 1], [], []>} : vector<128x128xbf16>, vector<128x256xbf16>, vector<128x256xf32> -> vector<128x256xf32>
    %c0_25 = arith.constant 0 : index
    %c0_26 = arith.constant 0 : index
    %44 = vector.load %arg4[%c0_25, %c0_26] : memref<128x128xf32, #tpu.memory_space<vmem>>, vector<128x128xf32>
    %45 = arith.addf %29, %44 : vector<128x128xf32>
    %cst_27 = arith.constant dense<0xFF800000> : vector<128xf32>
    %46 = vector.multi_reduction <maximumf>, %45, %cst_27 [1] : vector<128x128xf32> to vector<128xf32>
    %47 = vector.shape_cast %46 : vector<128xf32> to vector<128x1xf32>
    %48 = vector.broadcast %47 : vector<128x1xf32> to vector<128x128xf32>
    %49 = arith.subf %45, %48 : vector<128x128xf32>
    %50 = math.exp %49 : vector<128x128xf32>
    %cst_28 = arith.constant dense<0.000000e+00> : vector<128xf32>
    %51 = vector.multi_reduction <add>, %50, %cst_28 [1] : vector<128x128xf32> to vector<128xf32>
    %52 = vector.shape_cast %51 : vector<128xf32> to vector<128x1xf32>
    %53 = tpu.reciprocal %52 {approx = true} : vector<128x1xf32> -> vector<128x1xf32>
    %54 = vector.broadcast %53 : vector<128x1xf32> to vector<128x128xf32>
    %55 = arith.mulf %50, %54 : vector<128x128xf32>
    %56 = arith.truncf %55 : vector<128x128xf32> to vector<128x128xbf16>
    %cst_29 = arith.constant dense<0.000000e+00> : vector<128x256xf32>
    %57 = tpu.matmul %56, %26, %cst_29 {dimension_numbers = #tpu.dot_dimension_numbers<[1], [0], [0], [1], [0, 0, 1, 1], [], []>} : vector<128x128xbf16>, vector<128x256xbf16>, vector<128x256xf32> -> vector<128x256xf32>
    %58 = arith.truncf %43 : vector<128x256xf32> to vector<128x256xbf16>
    %c0_30 = arith.constant 0 : index
    %c0_31 = arith.constant 0 : index
    %59 = vector.load %arg24[%c0_30, %c0_31] : memref<256x256xbf16, #tpu.memory_space<vmem>>, vector<128x256xbf16>
    tpu.vector_store %arg24[%c0_30, %c0_31], %58 {strides = array<i32>} : memref<256x256xbf16, #tpu.memory_space<vmem>>, vector<128x256xbf16>,
    %60 = arith.truncf %57 : vector<128x256xf32> to vector<128x256xbf16>
    %c128 = arith.constant 128 : index
    %c0_32 = arith.constant 0 : index
    %61 = vector.load %arg24[%c128, %c0_32] : memref<256x256xbf16, #tpu.memory_space<vmem>>, vector<128x256xbf16>
    tpu.vector_store %arg24[%c128, %c0_32], %60 {strides = array<i32>} : memref<256x256xbf16, #tpu.memory_space<vmem>>, vector<128x256xbf16>,
    %c0_33 = arith.constant 0 : index
    %c0_34 = arith.constant 0 : index
    %62 = vector.load %arg11[%c0_33, %c0_34] : memref<256x256xbf16, #tpu.memory_space<vmem>>, vector<256x256xbf16>
    %cst_35 = arith.constant dense<0.000000e+00> : vector<256x256xf32>
    %63 = tpu.matmul %7, %62, %cst_35 {dimension_numbers = #tpu.dot_dimension_numbers<[1], [0], [0], [1], [0, 0, 1, 1], [], []>} : vector<256x256xbf16>, vector<256x256xbf16>, vector<256x256xf32> -> vector<256x256xf32>
    %c0_36 = arith.constant 0 : index
    %c0_37 = arith.constant 0 : index
    %64 = vector.load %arg24[%c0_36, %c0_37] : memref<256x256xbf16, #tpu.memory_space<vmem>>, vector<256x256xbf16>
    %c0_38 = arith.constant 0 : index
    %c0_39 = arith.constant 0 : index
    %65 = vector.load %arg12[%c0_38, %c0_39] : memref<256x256xbf16, #tpu.memory_space<vmem>>, vector<256x256xbf16>
    %cst_40 = arith.constant dense<0.000000e+00> : vector<256x256xf32>
    %66 = tpu.matmul %64, %65, %cst_40 {dimension_numbers = #tpu.dot_dimension_numbers<[1], [0], [0], [1], [0, 0, 1, 1], [], []>} : vector<256x256xbf16>, vector<256x256xbf16>, vector<256x256xf32> -> vector<256x256xf32>
    %67 = arith.addf %63, %66 : vector<256x256xf32>
    %c0_41 = arith.constant 0 : index
    %c0_42 = arith.constant 0 : index
    %68 = vector.load %arg13[%c0_41, %c0_42] : memref<1x256xf32, #tpu.memory_space<vmem>>, vector<1x256xf32>
    %69 = vector.broadcast %68 : vector<1x256xf32> to vector<256x256xf32>
    %70 = arith.addf %67, %69 : vector<256x256xf32>
    %cst_43 = arith.constant 0.000000e+00 : f32
    %71 = vector.broadcast %cst_43 : f32 to vector<256x256xf32>
    %72 = arith.maximumf %70, %71 : vector<256x256xf32>
    %73 = arith.truncf %72 : vector<256x256xf32> to vector<256x256xbf16>
    %c0_44 = arith.constant 0 : index
    %c0_45 = arith.constant 0 : index
    %74 = vector.load %arg14[%c0_44, %c0_45] : memref<256x256xbf16, #tpu.memory_space<vmem>>, vector<256x256xbf16>
    %cst_46 = arith.constant dense<0.000000e+00> : vector<256x256xf32>
    %75 = tpu.matmul %73, %74, %cst_46 {dimension_numbers = #tpu.dot_dimension_numbers<[1], [0], [0], [1], [0, 0, 1, 1], [], []>} : vector<256x256xbf16>, vector<256x256xbf16>, vector<256x256xf32> -> vector<256x256xf32>
    %c0_47 = arith.constant 0 : index
    %c0_48 = arith.constant 0 : index
    %76 = vector.load %arg15[%c0_47, %c0_48] : memref<1x256xf32, #tpu.memory_space<vmem>>, vector<1x256xf32>
    %77 = vector.broadcast %76 : vector<1x256xf32> to vector<256x256xf32>
    %78 = arith.addf %75, %77 : vector<256x256xf32>
    %cst_49 = arith.constant 0.000000e+00 : f32
    %79 = vector.broadcast %cst_49 : f32 to vector<256x256xf32>
    %80 = arith.maximumf %78, %79 : vector<256x256xf32>
    %c0_50 = arith.constant 0 : index
    %c0_51 = arith.constant 0 : index
    %c0_52 = arith.constant 0 : index
    %81 = vector.load %arg2[%c0_50, %c0_51, %c0_52] : memref<1x32x256xbf16, #tpu.memory_space<vmem>>, vector<1x32x256xbf16>
    %82 = vector.shape_cast %81 : vector<1x32x256xbf16> to vector<32x256xbf16>
    %83 = arith.truncf %80 : vector<256x256xf32> to vector<256x256xbf16>
    %cst_53 = arith.constant dense<0.000000e+00> : vector<32x256xf32>
    %84 = tpu.matmul %82, %83, %cst_53 {dimension_numbers = #tpu.dot_dimension_numbers<[1], [0], [0], [1], [0, 0, 1, 1], [], []>} : vector<32x256xbf16>, vector<256x256xbf16>, vector<32x256xf32> -> vector<32x256xf32>
    %85 = arith.truncf %84 : vector<32x256xf32> to vector<32x256xbf16>
    %86 = vector.extract_strided_slice %85 {offsets = [0, 0], sizes = [16, 256], strides = [1, 1]} : vector<32x256xbf16> to vector<16x256xbf16>
    %87 = vector.extract_strided_slice %85 {offsets = [16, 0], sizes = [16, 256], strides = [1, 1]} : vector<32x256xbf16> to vector<16x256xbf16>
    %c0_54 = arith.constant 0 : index
    %c0_55 = arith.constant 0 : index
    %88 = vector.load %arg16[%c0_54, %c0_55] : memref<256x256xbf16, #tpu.memory_space<vmem>>, vector<256x256xbf16>
    %cst_56 = arith.constant dense<0.000000e+00> : vector<16x256xf32>
    %89 = tpu.matmul %86, %88, %cst_56 {dimension_numbers = #tpu.dot_dimension_numbers<[1], [0], [0], [1], [0, 0, 1, 1], [], []>} : vector<16x256xbf16>, vector<256x256xbf16>, vector<16x256xf32> -> vector<16x256xf32>
    %c0_57 = arith.constant 0 : index
    %c0_58 = arith.constant 0 : index
    %90 = vector.load %arg17[%c0_57, %c0_58] : memref<256x256xbf16, #tpu.memory_space<vmem>>, vector<256x256xbf16>
    %cst_59 = arith.constant dense<0.000000e+00> : vector<16x256xf32>
    %91 = tpu.matmul %87, %90, %cst_59 {dimension_numbers = #tpu.dot_dimension_numbers<[1], [0], [0], [1], [0, 0, 1, 1], [], []>} : vector<16x256xbf16>, vector<256x256xbf16>, vector<16x256xf32> -> vector<16x256xf32>
    %92 = arith.addf %89, %91 : vector<16x256xf32>
    %c0_60 = arith.constant 0 : index
    %c0_61 = arith.constant 0 : index
    %93 = vector.load %arg18[%c0_60, %c0_61] : memref<1x256xf32, #tpu.memory_space<vmem>>, vector<1x256xf32>
    %94 = vector.broadcast %93 : vector<1x256xf32> to vector<16x256xf32>
    %95 = arith.addf %92, %94 : vector<16x256xf32>
    %cst_62 = arith.constant 0.000000e+00 : f32
    %96 = vector.broadcast %cst_62 : f32 to vector<16x256xf32>
    %97 = arith.maximumf %95, %96 : vector<16x256xf32>
    %98 = arith.truncf %97 : vector<16x256xf32> to vector<16x256xbf16>
    %c0_63 = arith.constant 0 : index
    %c0_64 = arith.constant 0 : index
    %99 = vector.load %arg19[%c0_63, %c0_64] : memref<256x256xbf16, #tpu.memory_space<vmem>>, vector<256x256xbf16>
    %cst_65 = arith.constant dense<0.000000e+00> : vector<16x256xf32>
    %100 = tpu.matmul %98, %99, %cst_65 {dimension_numbers = #tpu.dot_dimension_numbers<[1], [0], [0], [1], [0, 0, 1, 1], [], []>} : vector<16x256xbf16>, vector<256x256xbf16>, vector<16x256xf32> -> vector<16x256xf32>
    %c0_66 = arith.constant 0 : index
    %c0_67 = arith.constant 0 : index
    %101 = vector.load %arg20[%c0_66, %c0_67] : memref<1x256xf32, #tpu.memory_space<vmem>>, vector<1x256xf32>
    %102 = vector.broadcast %101 : vector<1x256xf32> to vector<16x256xf32>
    %103 = arith.addf %100, %102 : vector<16x256xf32>
    %cst_68 = arith.constant 0.000000e+00 : f32
    %104 = vector.broadcast %cst_68 : f32 to vector<16x256xf32>
    %105 = arith.maximumf %103, %104 : vector<16x256xf32>
    %106 = arith.truncf %105 : vector<16x256xf32> to vector<16x256xbf16>
    %c0_69 = arith.constant 0 : index
    %c0_70 = arith.constant 0 : index
    %107 = vector.load %arg21[%c0_69, %c0_70] : memref<256x128xbf16, #tpu.memory_space<vmem>>, vector<256x128xbf16>
    %cst_71 = arith.constant dense<0.000000e+00> : vector<16x128xf32>
    %108 = tpu.matmul %106, %107, %cst_71 {dimension_numbers = #tpu.dot_dimension_numbers<[1], [0], [0], [1], [0, 0, 1, 1], [], []>} : vector<16x256xbf16>, vector<256x128xbf16>, vector<16x128xf32> -> vector<16x128xf32>
    %c0_72 = arith.constant 0 : index
    %c0_73 = arith.constant 0 : index
    %109 = vector.load %arg22[%c0_72, %c0_73] : memref<1x128xf32, #tpu.memory_space<vmem>>, vector<1x128xf32>
    %110 = vector.broadcast %109 : vector<1x128xf32> to vector<16x128xf32>
    %111 = arith.addf %108, %110 : vector<16x128xf32>
    %c0_74 = arith.constant 0 : index
    %c0_75 = arith.constant 0 : index
    %112 = vector.load %arg23[%c0_74, %c0_75] : memref<16x128xf32, #tpu.memory_space<vmem>>, vector<16x128xf32>
    tpu.vector_store %arg23[%c0_74, %c0_75], %111 {strides = array<i32>} : memref<16x128xf32, #tpu.memory_space<vmem>>, vector<16x128xf32>,
    return
  }
  func.func @transform_0(%arg0: i32) -> (i32, i32, i32) {
    %c0_i32 = arith.constant 0 : i32
    %c0_i32_0 = arith.constant 0 : i32
    %c0_i32_1 = arith.constant 0 : i32
    return %arg0, %c0_i32, %c0_i32_0 : i32, i32, i32
  }
  func.func @transform_1(%arg0: i32) -> (i32, i32, i32) {
    %c0_i32 = arith.constant 0 : i32
    %c0_i32_0 = arith.constant 0 : i32
    %c0_i32_1 = arith.constant 0 : i32
    return %arg0, %c0_i32, %c0_i32_0 : i32, i32, i32
  }
  func.func @transform_2(%arg0: i32) -> (i32, i32) {
    %c0_i32 = arith.constant 0 : i32
    %c0_i32_0 = arith.constant 0 : i32
    %c0_i32_1 = arith.constant 0 : i32
    return %c0_i32, %c0_i32_0 : i32, i32
  }
  func.func @transform_3(%arg0: i32) -> (i32, i32) {
    %c0_i32 = arith.constant 0 : i32
    %c0_i32_0 = arith.constant 0 : i32
    %c0_i32_1 = arith.constant 0 : i32
    return %c0_i32, %c0_i32_0 : i32, i32
  }
  func.func @transform_4(%arg0: i32) -> (i32, i32) {
    %c0_i32 = arith.constant 0 : i32
    %c0_i32_0 = arith.constant 0 : i32
    %c0_i32_1 = arith.constant 0 : i32
    return %c0_i32, %c0_i32_0 : i32, i32
  }
  func.func @transform_5(%arg0: i32) -> (i32, i32) {
    %c0_i32 = arith.constant 0 : i32
    %c0_i32_0 = arith.constant 0 : i32
    %c0_i32_1 = arith.constant 0 : i32
    return %c0_i32, %c0_i32_0 : i32, i32
  }
  func.func @transform_6(%arg0: i32) -> (i32, i32) {
    %c0_i32 = arith.constant 0 : i32
    %c0_i32_0 = arith.constant 0 : i32
    %c0_i32_1 = arith.constant 0 : i32
    return %c0_i32, %c0_i32_0 : i32, i32
  }
  func.func @transform_7(%arg0: i32) -> (i32, i32) {
    %c0_i32 = arith.constant 0 : i32
    %c0_i32_0 = arith.constant 0 : i32
    %c0_i32_1 = arith.constant 0 : i32
    return %c0_i32, %c0_i32_0 : i32, i32
  }
  func.func @transform_8(%arg0: i32) -> (i32, i32) {
    %c0_i32 = arith.constant 0 : i32
    %c0_i32_0 = arith.constant 0 : i32
    %c0_i32_1 = arith.constant 0 : i32
    return %c0_i32, %c0_i32_0 : i32, i32
  }
  func.func @transform_9(%arg0: i32) -> (i32, i32) {
    %c0_i32 = arith.constant 0 : i32
    %c0_i32_0 = arith.constant 0 : i32
    %c0_i32_1 = arith.constant 0 : i32
    return %c0_i32, %c0_i32_0 : i32, i32
  }
  func.func @transform_10(%arg0: i32) -> (i32, i32) {
    %c0_i32 = arith.constant 0 : i32
    %c0_i32_0 = arith.constant 0 : i32
    %c0_i32_1 = arith.constant 0 : i32
    return %c0_i32, %c0_i32_0 : i32, i32
  }
  func.func @transform_11(%arg0: i32) -> (i32, i32) {
    %c0_i32 = arith.constant 0 : i32
    %c0_i32_0 = arith.constant 0 : i32
    %c0_i32_1 = arith.constant 0 : i32
    return %c0_i32, %c0_i32_0 : i32, i32
  }
  func.func @transform_12(%arg0: i32) -> (i32, i32) {
    %c0_i32 = arith.constant 0 : i32
    %c0_i32_0 = arith.constant 0 : i32
    %c0_i32_1 = arith.constant 0 : i32
    return %c0_i32, %c0_i32_0 : i32, i32
  }
  func.func @transform_13(%arg0: i32) -> (i32, i32) {
    %c0_i32 = arith.constant 0 : i32
    %c0_i32_0 = arith.constant 0 : i32
    %c0_i32_1 = arith.constant 0 : i32
    return %c0_i32, %c0_i32_0 : i32, i32
  }
  func.func @transform_14(%arg0: i32) -> (i32, i32) {
    %c0_i32 = arith.constant 0 : i32
    %c0_i32_0 = arith.constant 0 : i32
    %c0_i32_1 = arith.constant 0 : i32
    return %c0_i32, %c0_i32_0 : i32, i32
  }
  func.func @transform_15(%arg0: i32) -> (i32, i32) {
    %c0_i32 = arith.constant 0 : i32
    %c0_i32_0 = arith.constant 0 : i32
    %c0_i32_1 = arith.constant 0 : i32
    return %c0_i32, %c0_i32_0 : i32, i32
  }
  func.func @transform_16(%arg0: i32) -> (i32, i32) {
    %c0_i32 = arith.constant 0 : i32
    %c0_i32_0 = arith.constant 0 : i32
    %c0_i32_1 = arith.constant 0 : i32
    return %c0_i32, %c0_i32_0 : i32, i32
  }
  func.func @transform_17(%arg0: i32) -> (i32, i32) {
    %c0_i32 = arith.constant 0 : i32
    %c0_i32_0 = arith.constant 0 : i32
    %c0_i32_1 = arith.constant 0 : i32
    return %c0_i32, %c0_i32_0 : i32, i32
  }
  func.func @transform_18(%arg0: i32) -> (i32, i32) {
    %c0_i32 = arith.constant 0 : i32
    %c0_i32_0 = arith.constant 0 : i32
    %c0_i32_1 = arith.constant 0 : i32
    return %c0_i32, %c0_i32_0 : i32, i32
  }
  func.func @transform_19(%arg0: i32) -> (i32, i32) {
    %c0_i32 = arith.constant 0 : i32
    %c0_i32_0 = arith.constant 0 : i32
    %c0_i32_1 = arith.constant 0 : i32
    return %c0_i32, %c0_i32_0 : i32, i32
  }
  func.func @transform_20(%arg0: i32) -> (i32, i32) {
    %c0_i32 = arith.constant 0 : i32
    %c0_i32_0 = arith.constant 0 : i32
    %c0_i32_1 = arith.constant 0 : i32
    return %c0_i32, %c0_i32_0 : i32, i32
  }
  func.func @transform_21(%arg0: i32) -> (i32, i32) {
    %c0_i32 = arith.constant 0 : i32
    %c0_i32_0 = arith.constant 0 : i32
    %c0_i32_1 = arith.constant 0 : i32
    return %c0_i32, %c0_i32_0 : i32, i32
  }
  func.func @transform_22(%arg0: i32) -> (i32, i32) {
    %c0_i32 = arith.constant 0 : i32
    %c0_i32_0 = arith.constant 0 : i32
    return %arg0, %c0_i32 : i32, i32
  }
}

</mosaic_0001>

<bundles_post_ra>
// kernel: tpu_custom_call.1
= control target key start
LH: loop header
LB: loop body
LE: loop exit
PB: predicated region body
PF: predicated region fallthrough
CT: control target
= control target key end

     0   :  { %s9222_s0 = inlined_call_operand.hbm [shape: bf16[2,256,128], index: 0, kind: input, shape index: {}]   ;;  %s9223_s1 = inlined_call_operand.hbm [shape: bf16[2,32,256], index: 1, kind: input, shape index: {}]   ;;  %s9224_s2 = inlined_call_operand.hbm [shape: f32[128,128], index: 2, kind: input, shape index: {}]   ;;  %s9225_s3 = inlined_call_operand.hbm [shape: f32[128,128], index: 3, kind: input, shape index: {}]   ;;  %s9226_s4 = inlined_call_operand.hbm [shape: bf16[128,256], index: 4, kind: input, shape index: {}]   ;;  %s9227_s5 = inlined_call_operand.vmem [shape: f32[1,256], index: 5, kind: input, shape index: {}]   ;;  %s9228_s6 = inlined_call_operand.hbm [shape: bf16[256,256], index: 6, kind: input, shape index: {}]   ;;  %s9229_s7 = inlined_call_operand.vmem [shape: f32[1,256], index: 7, kind: input, shape index: {}]   ;;  %s9230_s8 = inlined_call_operand.hbm [shape: bf16[256,256], index: 8, kind: input, shape index: {}]   ;;  %s9231_s9 = inlined_call_operand.vmem [shape: f32[1,256], index: 9, kind: input, shape index: {}]   ;;  %s9232_s10 = inlined_call_operand.hbm [shape: bf16[256,256], index: 10, kind: input, shape index: {}]   ;;  %s9233_s11 = inlined_call_operand.hbm [shape: bf16[256,256], index: 11, kind: input, shape index: {}]   ;;  %s9234_s12 = inlined_call_operand.vmem [shape: f32[1,256], index: 12, kind: input, shape index: {}]   ;;  %s9235_s13 = inlined_call_operand.hbm [shape: bf16[256,256], index: 13, kind: input, shape index: {}]   ;;  %s9236_s14 = inlined_call_operand.vmem [shape: f32[1,256], index: 14, kind: input, shape index: {}]   ;;  %s9237_s15 = inlined_call_operand.hbm [shape: bf16[256,256], index: 15, kind: input, shape index: {}]   ;;  %s9238_s16 = inlined_call_operand.hbm [shape: bf16[256,256], index: 16, kind: input, shape index: {}]   ;;  %s9239_s17 = inlined_call_operand.vmem [shape: f32[1,256], index: 17, kind: input, shape index: {}]   ;;  %s9240_s18 = inlined_call_operand.hbm [shape: bf16[256,256], index: 18, kind: input, shape index: {}]   ;;  %s9241_s19 = inlined_call_operand.vmem [shape: f32[1,256], index: 19, kind: input, shape index: {}]   ;;  %s9242_s20 = inlined_call_operand.hbm [shape: bf16[256,128], index: 20, kind: input, shape index: {}]   ;;  %s9243_s21 = inlined_call_operand.vmem [shape: f32[1,128], index: 21, kind: input, shape index: {}]   ;;  %s9244_s22 = inlined_call_operand.hbm [shape: f32[32,128], index: 22, kind: output, shape index: {}]  }
   0x1   :  { %9286 = sst [smem:[#allocation55_spill]] %s9222_s0 }
   0x2   :  { %9287 = sst [smem:[#allocation56_spill]] %s9223_s1 }
   0x3   :  { %9288 = sst [smem:[#allocation57_spill]] %s9224_s2 }
   0x4   :  { %9289 = sst [smem:[#allocation58_spill]] %s9225_s3 }
   0x5   :  { %9290 = sst [smem:[#allocation59_spill]] %s9226_s4 }
   0x6   :  { %9291 = sst [smem:[#allocation60_spill]] %s9227_s5 }
   0x7   :  { %9292 = sst [smem:[#allocation61_spill]] %s9228_s6 }
   0x8   :  { %9293 = sst [smem:[#allocation62_spill]] %s9229_s7 }
   0x9   :  { %9294 = sst [smem:[#allocation63_spill]] %s9230_s8 }
   0xa   :  { %9295 = sst [smem:[#allocation64_spill]] %s9231_s9 }
   0xb   :  { %9296 = sst [smem:[#allocation65_spill]] %s9232_s10 }
   0xc   :  { %9297 = sst [smem:[#allocation66_spill]] %s9233_s11 }
   0xd   :  { %9298 = sst [smem:[#allocation67_spill]] %s9234_s12 }
   0xe   :  { %9299 = sst [smem:[#allocation68_spill]] %s9235_s13 }
   0xf   :  { %9300 = sst [smem:[#allocation69_spill]] %s9236_s14 }
  0x10   :  { %9301 = sst [smem:[#allocation70_spill]] %s9237_s15 }
  0x11   :  { %9302 = sst [smem:[#allocation71_spill]] %s9238_s16 }
  0x12   :  { %9303 = sst [smem:[#allocation72_spill]] %s9239_s17 }
  0x13   :  { %9304 = sst [smem:[#allocation73_spill]] %s9240_s18 }
  0x14   :  { %9305 = sst [smem:[#allocation74_spill]] %s9241_s19 }
  0x15   :  { %9306 = sst [smem:[#allocation75_spill]] %s9242_s20 }
  0x16   :  { %9307 = sst [smem:[#allocation76_spill]] %s9243_s21 }
  0x17   :  { %9308 = sst [smem:[#allocation77_spill]] %s9244_s22 }
  0x18   :  { %27 = vsyncpa [#allocation4], 0 }
  0x19   :  { %29 = vsyncpa [#allocation4 + $0x1], 0 }
  0x1a   :  { %30 = vsyncpa [#allocation7], 0 }
  0x1b   :  { %32 = vsyncpa [#allocation7 + $0x1], 0 }
  0x1c   :  { %33 = vsyncpa [#allocation10], 0 }
  0x1d   :  { %34 = vsyncpa [#allocation13], 0 }
  0x1e   :  { %35 = vsyncpa [#allocation16], 0 }
  0x1f   :  { %36 = vsyncpa [#allocation19], 0 }
  0x20   :  { %37 = vsyncpa [#allocation22], 0 }
  0x21   :  { %38 = vsyncpa [#allocation25], 0 }
  0x22   :  { %39 = vsyncpa [#allocation5], 0 }
  0x23   :  { %41 = vsyncpa [#allocation5 + $0x1], 0  ;;  %s7710_s3 = smov 0   ;;  %s7712_s28 = smov 0  }
  0x24   :  { %s7714_s29 = smov 0   ;;  %s7716_s30 = smov 0  }
  0x25 LB: > { %s7573_s4 = smov [#allocation8]   ;;  %s7731_s23 = sadd.s32 4294967295, %s7571_s30   ;;  %s7571_s30 = sphi %s7716_s30, %s9404_s30   ;;  %s7567_s29 = sphi %s7714_s29, %s9403_s29   ;;  %s7563_s28 = sphi %s7712_s28, %s9402_s28   ;;  %s7559_s3 = sphi %s7710_s3, %s9401_s3  }
  0x26   : > { %s562_s0 = sshll.u32 %s7573_s4, 4  ;;  %p5881_p0 = scmp.ge.s32.totalorder %s7571_s30, 1  ;;  %s7736_s0 = int_to_ptr.vmem [resolvable:$true] %s562_s0 }
  0x27   : > { %p9255_p1 = scmp.eq.s32.totalorder %s7731_s23, 0  ;;  %p550_p2 = scmp.lt.s32.totalorder %s7571_s30, 3 }
  0x28   : > { %s7574_s5 = smov [#allocation9]   ;;  %s7575_s25 = smov [#allocation12]  }
  0x29   : > { %p7738_p3 = pnand %p5881_p0, %p550_p2  ;;  %s575_s24 = sshll.u32 %s7574_s5, 4  ;;  %s7751_s24 = int_to_ptr.vmem [resolvable:$true] %s575_s24 }
  0x2a   : > { %s604_s26 = sshll.u32 %s7575_s25, 4  ;;  %s9312_s4 = sld [smem:[#allocation57_spill]]  ;;  %s7753_s26 = int_to_ptr.vmem [resolvable:$true] %s604_s26 }
  0x2b   : > { %s9309_s1 = scalar_select %p7738_p3, 1, 0 }
  0x2c   : > { %p6378_p5 = pneg %p7738_p3 }
  0x2d   : > { %9310 = sst [smem:[#allocation37_spill]] %s9309_s1 }
  0x2e   : > { %p7747_p6 = pnand %p6378_p5, %p9255_p1 }
  0x30   : > { %s7077_s22 = scalar_lea.hbm %s9312_s4, 2048  ;;  %p7763_p8 = pneg %p7747_p6 }
  0x31   : > { %p7078_p7 = scmp.ne.s32.totalorder %s9312_s4, %s7077_s22  ;;  %p7084_p11 = scmp.lt.u32.totalorder %s7077_s22, %s9312_s4 }
  0x33   : > { %p7080_p9 = pnand %p7763_p8, %p7078_p7 }
  0x35   : > { %p7081_p10 = pneg %p7080_p9 }
  0x37   : > { %p7086_p12 = pnand %p7084_p11, %p7081_p10 }
  0x39   : > { %7089 = shalt.err (!%p7086_p12)
}
  0x3a   : > { %s7090_s19 = scalar_lea.vmem %s7736_s0, 2048  ;;  %p7098_p5 = scmp.lt.s32.totalorder %s7736_s0, %s7736_s0 }
  0x3b   : > { %p7091_p13 = scmp.ne.s32.totalorder %s7736_s0, %s7090_s19  ;;  %p7099_p4 = scmp.lt.s32.totalorder %s7090_s19, %s7090_s19 }
  0x3d   : > { %p7093_p0 = pnand %p7091_p13, %p7763_p8  ;;  %p7100_p7 = por %p7099_p4, %p7098_p5 }
  0x3f   : > { %p7094_p2 = pneg %p7093_p0 }
  0x41   : > { %p7101_p9 = pnand %p7100_p7, %p7094_p2 }
  0x43   : > { %7104 = shalt.err (!%p7101_p9)
}
  0x44   : > { %s9257_s21 = smov 128   ;;  %s9258_s17 = smov 8  }
  0x45   : > { %6381 = dma.hbm_to_vmem [thread:$0]  (!%p7747_p6), %s9312_s4, 2048, %s7736_s0, [#allocation7], %s9257_s21, %s9257_s21, %s9258_s17  }
  0x46   : > { %s9314_s14 = sld [smem:[#allocation58_spill]] }
  0x4c   : > { %s7105_s19 = scalar_lea.hbm %s9314_s14, 2048 }
  0x4d   : > { %p7106_p4 = scmp.ne.s32.totalorder %s9314_s14, %s7105_s19  ;;  %p7112_p12 = scmp.lt.u32.totalorder %s7105_s19, %s9314_s14 }
  0x4f   : > { %p7108_p10 = pnand %p7106_p4, %p7763_p8 }
  0x51   : > { %p7109_p11 = pneg %p7108_p10 }
  0x53   : > { %p7114_p13 = pnand %p7112_p12, %p7109_p11 }
  0x55   : > { %7117 = shalt.err (!%p7114_p13)
}
  0x56   : > { %s7118_s0 = scalar_lea.vmem %s7751_s24, 2048  ;;  %p7126_p7 = scmp.lt.s32.totalorder %s7751_s24, %s7751_s24 }
  0x57   : > { %p7119_p0 = scmp.ne.s32.totalorder %s7751_s24, %s7118_s0  ;;  %p7127_p9 = scmp.lt.s32.totalorder %s7118_s0, %s7118_s0 }
  0x59   : > { %p7121_p2 = pnand %p7119_p0, %p7763_p8  ;;  %p7128_p4 = por %p7127_p9, %p7126_p7 }
  0x5b   : > { %p7122_p5 = pneg %p7121_p2 }
  0x5d   : > { %p7129_p10 = pnand %p7128_p4, %p7122_p5 }
  0x5f   : > { %7132 = shalt.err (!%p7129_p10)
}
  0x60   : > { %6384 = dma.hbm_to_vmem [thread:$0]  (!%p7747_p6), %s9314_s14, 2048, %s7751_s24, [#allocation10], %s9257_s21, %s9257_s21, %s9258_s17  }
  0x61   : > { %s9315_s22 = sld [smem:[#allocation61_spill]] }
  0x67   : > { %s7133_s2 = scalar_lea.hbm %s9315_s22, 4096 }
  0x68   : > { %p7134_p11 = scmp.ne.s32.totalorder %s9315_s22, %s7133_s2  ;;  %p7140_p0 = scmp.lt.u32.totalorder %s7133_s2, %s9315_s22 }
  0x6a   : > { %p7136_p12 = pnand %p7134_p11, %p7763_p8 }
  0x6c   : > { %p7137_p13 = pneg %p7136_p12 }
  0x6e   : > { %p7142_p2 = pnand %p7140_p0, %p7137_p13 }
  0x70   : > { %7145 = shalt.err (!%p7142_p2)
}
  0x71   : > { %s7146_s24 = scalar_lea.vmem %s7753_s26, 4096  ;;  %p7154_p4 = scmp.lt.s32.totalorder %s7753_s26, %s7753_s26 }
  0x72   : > { %p7147_p5 = scmp.ne.s32.totalorder %s7753_s26, %s7146_s24  ;;  %p7155_p10 = scmp.lt.s32.totalorder %s7146_s24, %s7146_s24 }
  0x74   : > { %p7149_p7 = pnand %p7147_p5, %p7763_p8  ;;  %p7156_p11 = por %p7155_p10, %p7154_p4 }
  0x76   : > { %p7150_p9 = pneg %p7149_p7 }
  0x78   : > { %p7157_p12 = pnand %p7156_p11, %p7150_p9 }
  0x7a   : > { %7160 = shalt.err (!%p7157_p12)
}
  0x7b   : > { %6390 = dma.hbm_to_vmem [thread:$0]  (!%p7747_p6), %s9315_s22, 4096, %s7753_s26, [#allocation13], %s9257_s21, %s9257_s21, %s9258_s17  }
  0x7c   : > { %s7578_s12 = smov [#allocation15]   ;;  %s7579_s2 = smov [#allocation18]  }
  0x7d   : > { %s636_s1 = sshll.u32 %s7578_s12, 4  ;;  %s665_s27 = sshll.u32 %s7579_s2, 4  ;;  %s637_s1 = int_to_ptr.vmem [resolvable:$true] %s636_s1  ;;  %s666_s27 = int_to_ptr.vmem [resolvable:$true] %s665_s27 }
  0x7e   : > { %s9316_s10 = sld [smem:[#allocation65_spill]] }
  0x84   : > { %s7161_s0 = scalar_lea.hbm %s9316_s10, 4096 }
  0x85   : > { %p7162_p13 = scmp.ne.s32.totalorder %s9316_s10, %s7161_s0  ;;  %p7168_p5 = scmp.lt.u32.totalorder %s7161_s0, %s9316_s10 }
  0x87   : > { %p7164_p0 = pnand %p7162_p13, %p7763_p8 }
  0x89   : > { %p7165_p2 = pneg %p7164_p0 }
  0x8b   : > { %p7170_p7 = pnand %p7168_p5, %p7165_p2 }
  0x8d   : > { %7173 = shalt.err (!%p7170_p7)
}
  0x8e   : > { %s7174_s26 = scalar_lea.vmem %s637_s1, 4096  ;;  %p7182_p11 = scmp.lt.s32.totalorder %s637_s1, %s637_s1 }
  0x8f   : > { %p7175_p9 = scmp.ne.s32.totalorder %s637_s1, %s7174_s26  ;;  %p7183_p12 = scmp.lt.s32.totalorder %s7174_s26, %s7174_s26 }
  0x91   : > { %p7177_p4 = pnand %p7175_p9, %p7763_p8  ;;  %p7184_p1 = por %p7183_p12, %p7182_p11 }
  0x93   : > { %p7178_p10 = pneg %p7177_p4 }
  0x95   : > { %p7185_p3 = pnand %p7184_p1, %p7178_p10 }
  0x97   : > { %7188 = shalt.err (!%p7185_p3)
}
  0x98   : > { %6396 = dma.hbm_to_vmem [thread:$0]  (!%p7747_p6), %s9316_s10, 4096, %s637_s1, [#allocation16], %s9257_s21, %s9257_s21, %s9258_s17  }
  0x99   : > { %s9317_s13 = sld [smem:[#allocation68_spill]] }
  0x9f   : > { %s7189_s2 = scalar_lea.hbm %s9317_s13, 4096 }
  0xa0   : > { %p7190_p1 = scmp.ne.s32.totalorder %s9317_s13, %s7189_s2  ;;  %p7196_p0 = scmp.lt.u32.totalorder %s7189_s2, %s9317_s13 }
  0xa2   : > { %p7192_p3 = pnand %p7190_p1, %p7763_p8 }
  0xa4   : > { %p7193_p13 = pneg %p7192_p3 }
  0xa6   : > { %p7198_p2 = pnand %p7196_p0, %p7193_p13 }
  0xa8   : > { %7201 = shalt.err (!%p7198_p2)
}
  0xa9   : > { %s7202_s7 = scalar_lea.vmem %s666_s27, 4096  ;;  %p7210_p4 = scmp.lt.s32.totalorder %s666_s27, %s666_s27 }
  0xaa   : > { %p7203_p5 = scmp.ne.s32.totalorder %s666_s27, %s7202_s7  ;;  %p7211_p10 = scmp.lt.s32.totalorder %s7202_s7, %s7202_s7 }
  0xac   : > { %p7205_p7 = pnand %p7203_p5, %p7763_p8  ;;  %p7212_p11 = por %p7211_p10, %p7210_p4 }
  0xae   : > { %p7206_p9 = pneg %p7205_p7 }
  0xb0   : > { %p7213_p12 = pnand %p7212_p11, %p7206_p9 }
  0xb2   : > { %7216 = shalt.err (!%p7213_p12)
}
  0xb3   : > { %6402 = dma.hbm_to_vmem [thread:$0]  (!%p7747_p6), %s9317_s13, 4096, %s666_s27, [#allocation19], %s9257_s21, %s9257_s21, %s9258_s17  }
  0xb4   : > { %s7580_s14 = smov [#allocation21]   ;;  %s7581_s9 = smov [#allocation11]  }
  0xb5   : > { %s694_s4 = sshll.u32 %s7580_s14, 4  ;;  %s588_s12 = sshll.u32 %s7581_s9, 4  ;;  %s695_s4 = int_to_ptr.vmem [resolvable:$true] %s694_s4  ;;  %s589_s12 = int_to_ptr.vmem [resolvable:$true] %s588_s12 }
  0xb6   : > { %s9318_s16 = sld [smem:[#allocation71_spill]] }
  0xbc   : > { %s7217_s19 = scalar_lea.hbm %s9318_s16, 4096 }
  0xbd   : > { %p7218_p1 = scmp.ne.s32.totalorder %s9318_s16, %s7217_s19  ;;  %p7224_p0 = scmp.lt.u32.totalorder %s7217_s19, %s9318_s16 }
  0xbf   : > { %p7220_p3 = pnand %p7218_p1, %p7763_p8 }
  0xc1   : > { %p7221_p13 = pneg %p7220_p3 }
  0xc3   : > { %p7226_p2 = pnand %p7224_p0, %p7221_p13 }
  0xc5   : > { %7229 = shalt.err (!%p7226_p2)
}
  0xc6   : > { %s7230_s27 = scalar_lea.vmem %s695_s4, 4096  ;;  %p7238_p4 = scmp.lt.s32.totalorder %s695_s4, %s695_s4 }
  0xc7   : > { %p7231_p5 = scmp.ne.s32.totalorder %s695_s4, %s7230_s27  ;;  %p7239_p10 = scmp.lt.s32.totalorder %s7230_s27, %s7230_s27 }
  0xc9   : > { %p7233_p7 = pnand %p7231_p5, %p7763_p8  ;;  %p7240_p11 = por %p7239_p10, %p7238_p4 }
  0xcb   : > { %p7234_p9 = pneg %p7233_p7 }
  0xcd   : > { %p7241_p12 = pnand %p7240_p11, %p7234_p9 }
  0xcf   : > { %7244 = shalt.err (!%p7241_p12)
}
  0xd0   : > { %6408 = dma.hbm_to_vmem [thread:$0]  (!%p7747_p6), %s9318_s16, 4096, %s695_s4, [#allocation22], %s9257_s21, %s9257_s21, %s9258_s17  }
  0xd1   : > { %s9319_s25 = sld [smem:[#allocation59_spill]] }
  0xd7   : > { %s7245_s19 = scalar_lea.hbm %s9319_s25, 2048 }
  0xd8   : > { %p7246_p1 = scmp.ne.s32.totalorder %s9319_s25, %s7245_s19  ;;  %p7252_p0 = scmp.lt.u32.totalorder %s7245_s19, %s9319_s25 }
  0xda   : > { %p7248_p3 = pnand %p7246_p1, %p7763_p8 }
  0xdc   : > { %p7249_p13 = pneg %p7248_p3 }
  0xde   : > { %p7254_p2 = pnand %p7252_p0, %p7249_p13 }
  0xe0   : > { %7257 = shalt.err (!%p7254_p2)
}
  0xe1   : > { %s7258_s27 = scalar_lea.vmem %s589_s12, 2048  ;;  %p7266_p4 = scmp.lt.s32.totalorder %s589_s12, %s589_s12 }
  0xe2   : > { %p7259_p5 = scmp.ne.s32.totalorder %s589_s12, %s7258_s27  ;;  %p7267_p10 = scmp.lt.s32.totalorder %s7258_s27, %s7258_s27 }
  0xe4   : > { %p7261_p7 = pnand %p7259_p5, %p7763_p8  ;;  %p7268_p11 = por %p7267_p10, %p7266_p4 }
  0xe6   : > { %p7262_p9 = pneg %p7261_p7 }
  0xe8   : > { %p7269_p12 = pnand %p7268_p11, %p7262_p9 }
  0xea   : > { %7272 = shalt.err (!%p7269_p12)
}
  0xeb   : > { %6387 = dma.hbm_to_vmem [thread:$0]  (!%p7747_p6), %s9319_s25, 2048, %s589_s12, [#allocation10], %s9257_s21, %s9257_s21, %s9258_s17  }
  0xec   : > { %s7582_s14 = smov [#allocation14]   ;;  %s7583_s2 = smov [#allocation17]  }
  0xed   : > { %s620_s9 = sshll.u32 %s7582_s14, 4  ;;  %s649_s19 = sshll.u32 %s7583_s2, 4  ;;  %s621_s9 = int_to_ptr.vmem [resolvable:$true] %s620_s9  ;;  %s650_s19 = int_to_ptr.vmem [resolvable:$true] %s649_s19 }
  0xee   : > { %s9320_s8 = sld [smem:[#allocation63_spill]] }
  0xf4   : > { %s7273_s7 = scalar_lea.hbm %s9320_s8, 4096 }
  0xf5   : > { %p7274_p1 = scmp.ne.s32.totalorder %s9320_s8, %s7273_s7  ;;  %p7280_p0 = scmp.lt.u32.totalorder %s7273_s7, %s9320_s8 }
  0xf7   : > { %p7276_p3 = pnand %p7274_p1, %p7763_p8 }
  0xf9   : > { %p7277_p13 = pneg %p7276_p3 }
  0xfb   : > { %p7282_p2 = pnand %p7280_p0, %p7277_p13 }
  0xfd   : > { %7285 = shalt.err (!%p7282_p2)
}
  0xfe   : > { %s7286_s12 = scalar_lea.vmem %s621_s9, 4096  ;;  %p7294_p4 = scmp.lt.s32.totalorder %s621_s9, %s621_s9 }
  0xff   : > { %p7287_p5 = scmp.ne.s32.totalorder %s621_s9, %s7286_s12  ;;  %p7295_p10 = scmp.lt.s32.totalorder %s7286_s12, %s7286_s12 }
 0x101   : > { %p7289_p7 = pnand %p7287_p5, %p7763_p8  ;;  %p7296_p11 = por %p7295_p10, %p7294_p4 }
 0x103   : > { %p7290_p9 = pneg %p7289_p7 }
 0x105   : > { %p7297_p12 = pnand %p7296_p11, %p7290_p9 }
 0x107   : > { %7300 = shalt.err (!%p7297_p12)
}
 0x108   : > { %6393 = dma.hbm_to_vmem [thread:$0]  (!%p7747_p6), %s9320_s8, 4096, %s621_s9, [#allocation13], %s9257_s21, %s9257_s21, %s9258_s17  }
 0x109   : > { %s9321_s11 = sld [smem:[#allocation66_spill]] }
 0x10f   : > { %s7301_s0 = scalar_lea.hbm %s9321_s11, 4096 }
 0x110   : > { %p7302_p1 = scmp.ne.s32.totalorder %s9321_s11, %s7301_s0  ;;  %p7308_p0 = scmp.lt.u32.totalorder %s7301_s0, %s9321_s11 }
 0x112   : > { %p7304_p3 = pnand %p7302_p1, %p7763_p8 }
 0x114   : > { %p7305_p13 = pneg %p7304_p3 }
 0x116   : > { %p7310_p2 = pnand %p7308_p0, %p7305_p13 }
 0x118   : > { %7313 = shalt.err (!%p7310_p2)
}
 0x119   : > { %s7314_s4 = scalar_lea.vmem %s650_s19, 4096  ;;  %p7322_p4 = scmp.lt.s32.totalorder %s650_s19, %s650_s19 }
 0x11a   : > { %p7315_p5 = scmp.ne.s32.totalorder %s650_s19, %s7314_s4  ;;  %p7323_p10 = scmp.lt.s32.totalorder %s7314_s4, %s7314_s4 }
 0x11c   : > { %p7317_p7 = pnand %p7315_p5, %p7763_p8  ;;  %p7324_p11 = por %p7323_p10, %p7322_p4 }
 0x11e   : > { %p7318_p9 = pneg %p7317_p7 }
 0x120   : > { %p7325_p12 = pnand %p7324_p11, %p7318_p9 }
 0x122   : > { %7328 = shalt.err (!%p7325_p12)
}
 0x123   : > { %6399 = dma.hbm_to_vmem [thread:$0]  (!%p7747_p6), %s9321_s11, 4096, %s650_s19, [#allocation16], %s9257_s21, %s9257_s21, %s9258_s17  }
 0x124   : > { %s7584_s10 = smov [#allocation20]   ;;  %s7585_s14 = smov [#allocation23]  }
 0x125   : > { %s681_s26 = sshll.u32 %s7584_s10, 4  ;;  %s710_s2 = sshll.u32 %s7585_s14, 4  ;;  %s682_s26 = int_to_ptr.vmem [resolvable:$true] %s681_s26  ;;  %s711_s2 = int_to_ptr.vmem [resolvable:$true] %s710_s2 }
 0x126   : > { %s9322_s15 = sld [smem:[#allocation70_spill]] }
 0x12c   : > { %s7329_s7 = scalar_lea.hbm %s9322_s15, 4096 }
 0x12d   : > { %p7330_p1 = scmp.ne.s32.totalorder %s9322_s15, %s7329_s7  ;;  %p7336_p0 = scmp.lt.u32.totalorder %s7329_s7, %s9322_s15 }
 0x12f   : > { %p7332_p3 = pnand %p7330_p1, %p7763_p8 }
 0x131   : > { %p7333_p13 = pneg %p7332_p3 }
 0x133   : > { %p7338_p2 = pnand %p7336_p0, %p7333_p13 }
 0x135   : > { %7341 = shalt.err (!%p7338_p2)
}
 0x136   : > { %s7342_s19 = scalar_lea.vmem %s682_s26, 4096  ;;  %p7350_p4 = scmp.lt.s32.totalorder %s682_s26, %s682_s26 }
 0x137   : > { %p7343_p5 = scmp.ne.s32.totalorder %s682_s26, %s7342_s19  ;;  %p7351_p10 = scmp.lt.s32.totalorder %s7342_s19, %s7342_s19 }
 0x139   : > { %p7345_p7 = pnand %p7343_p5, %p7763_p8  ;;  %p7352_p11 = por %p7351_p10, %p7350_p4 }
 0x13b   : > { %p7346_p9 = pneg %p7345_p7 }
 0x13d   : > { %p7353_p12 = pnand %p7352_p11, %p7346_p9 }
 0x13f   : > { %7356 = shalt.err (!%p7353_p12)
}
 0x140   : > { %6405 = dma.hbm_to_vmem [thread:$0]  (!%p7747_p6), %s9322_s15, 4096, %s682_s26, [#allocation19], %s9257_s21, %s9257_s21, %s9258_s17  }
 0x141   : > { %s9323_s18 = sld [smem:[#allocation73_spill]] }
 0x147   : > { %s7357_s24 = scalar_lea.hbm %s9323_s18, 4096 }
 0x148   : > { %p7358_p1 = scmp.ne.s32.totalorder %s9323_s18, %s7357_s24  ;;  %p7364_p0 = scmp.lt.u32.totalorder %s7357_s24, %s9323_s18 }
 0x14a   : > { %p7360_p3 = pnand %p7358_p1, %p7763_p8 }
 0x14c   : > { %p7361_p13 = pneg %p7360_p3 }
 0x14e   : > { %p7366_p2 = pnand %p7364_p0, %p7361_p13 }
 0x150   : > { %7369 = shalt.err (!%p7366_p2)
}
 0x151   : > { %s7370_s9 = scalar_lea.vmem %s711_s2, 4096  ;;  %p7378_p4 = scmp.lt.s32.totalorder %s711_s2, %s711_s2 }
 0x152   : > { %p7371_p5 = scmp.ne.s32.totalorder %s711_s2, %s7370_s9  ;;  %p7379_p10 = scmp.lt.s32.totalorder %s7370_s9, %s7370_s9 }
 0x154   : > { %p7373_p7 = pnand %p7371_p5, %p7763_p8  ;;  %p7380_p11 = por %p7379_p10, %p7378_p4 }
 0x156   : > { %p7374_p9 = pneg %p7373_p7 }
 0x158   : > { %p7381_p12 = pnand %p7380_p11, %p7374_p9 }
 0x15a   : > { %7384 = shalt.err (!%p7381_p12)
}
 0x15b   : > { %6411 = dma.hbm_to_vmem [thread:$0]  (!%p7747_p6), %s9323_s18, 4096, %s711_s2, [#allocation22], %s9257_s21, %s9257_s21, %s9258_s17  }
 0x15c   : > { %s7586_s12 = smov [#allocation24]   ;;  %s9324_s20 = sld [smem:[#allocation75_spill]] }
 0x15d   : > { %s726_s10 = sshll.u32 %s7586_s12, 4  ;;  %s727_s10 = int_to_ptr.vmem [resolvable:$true] %s726_s10 }
 0x162   : > { %s7385_s24 = scalar_lea.hbm %s9324_s20, 2048 }
 0x163   : > { %p7386_p1 = scmp.ne.s32.totalorder %s9324_s20, %s7385_s24  ;;  %p7392_p0 = scmp.lt.u32.totalorder %s7385_s24, %s9324_s20 }
 0x165   : > { %p7388_p3 = pnand %p7386_p1, %p7763_p8 }
 0x167   : > { %p7389_p13 = pneg %p7388_p3 }
 0x169   : > { %p7394_p2 = pnand %p7392_p0, %p7389_p13 }
 0x16b   : > { %7397 = shalt.err (!%p7394_p2)
}
 0x16c   : > { %s7398_s2 = scalar_lea.vmem %s727_s10, 2048  ;;  %p7406_p4 = scmp.lt.s32.totalorder %s727_s10, %s727_s10 }
 0x16d   : > { %p7399_p5 = scmp.ne.s32.totalorder %s727_s10, %s7398_s2  ;;  %p7407_p10 = scmp.lt.s32.totalorder %s7398_s2, %s7398_s2 }
 0x16f   : > { %p7401_p7 = pnand %p7399_p5, %p7763_p8  ;;  %p7408_p11 = por %p7407_p10, %p7406_p4 }
 0x171   : > { %p7402_p9 = pneg %p7401_p7 }
 0x173   : > { %p7409_p12 = pnand %p7408_p11, %p7402_p9 }
 0x175   : > { %7412 = shalt.err (!%p7409_p12)
}
 0x176   : > { %s9259_s9 = smov 64   ;;  %s9260_s5 = smov 4  }
 0x177   : > { %6414 = dma.hbm_to_vmem [thread:$0]  (!%p7747_p6), %s9324_s20, 2048, %s727_s10, [#allocation25], %s9259_s9, %s9259_s9, %s9260_s5  }
 0x178   : > { %s5880_s12 = sadd.s32 4294967294, %s7571_s30   ;;  %s8030_s14 = sadd.s32 1, %s7571_s30  }
 0x179   : > { %s51_s0 = ssub.s32 %s7571_s30, %s8030_s14  ;;  %s54_s24 = sadd.s32 1, %s7567_s29 }
 0x17a   : > { %p52_p8 = scmp.eq.s32.totalorder %s51_s0, 0  ;;  %p61_p1 = scmp.ne.s32.totalorder %s7567_s29, %s7563_s28 }
 0x17b   : > { %p62_p3 = scmp.eq.s32.totalorder %s7571_s30, 0  ;;  %p67_p13 = scmp.ne.s32.totalorder %s7563_s28, %s7559_s3 }
 0x17c   : > { %s8041_s6 = scalar_select %p52_p8, %s7567_s29, %s54_s24  }
 0x17d   : > { %p8043_p0 = por %p62_p3, %p61_p1  ;;  %p9326_p2 = scmp.eq.s32.totalorder %s7731_s23, 0 }
 0x17e   : > { %p537_p5 = scmp.eq.s32.totalorder %s7731_s23, 1  ;;  %p543_p7 = scmp.eq.s32.totalorder %s5880_s12, 1 }
 0x17f   : > { %p8049_p6 = por %p9326_p2, %p67_p13  ;;  %p6438_p9 = scmp.lt.s32.totalorder %s7571_s30, 2 }
 0x180   : > { %s8056_s1 = sand.u32 1, %s7567_s29   ;;  %p8058_p4 = por %p537_p5, %p61_p1 }
 0x181   : > { %p8062_p10 = por %p543_p7, %p67_p13  ;;  %s5895_s2 = sshll.u32 %s8056_s1, 7 }
 0x182   : > { %s9328_s27 = scalar_select %p8058_p4, 1, 0 }
 0x183   : > { %s9329_s4 = scalar_select %p8062_p10, 1, 0 }
 0x184   : > { %s6231_s26 = sshll.u32 %s7571_s30, 11  ;;  %s9330_s24 = sld [smem:[#allocation55_spill]] }
 0x185   : > { %s747_s21 = scalar_lea.vmem [#allocation3], %s5895_s2  ;;  %p8077_p11 = pnand %p6438_p9, %p8043_p0 }
 0x186   : > { %s754_s17 = sshll.u32 %s747_s21, 4  ;;  %s5898_s8 = sshll.u32 %s8056_s1, 5  ;;  %s8073_s17 = int_to_ptr.vmem [resolvable:$true] %s754_s17 }
 0x187   : > { %s744_s19 = scalar_lea.sflag [#allocation4], %s8056_s1  ;;  %p7415_p8 = pneg %p8077_p11 }
 0x18a   : > { %s8071_s12 = scalar_lea.hbm %s9330_s24, %s6231_s26  ;;  %s7418_s7 = scalar_lea.hbm %s9330_s24, 4096 }
 0x18b   : > { %s7413_s26 = scalar_lea.hbm %s8071_s12, 2048  ;;  %p7419_p13 = scmp.lt.u32.totalorder %s8071_s12, %s9330_s24 }
 0x18c   : > { %p7414_p12 = scmp.ne.s32.totalorder %s8071_s12, %s7413_s26  ;;  %p7420_p0 = scmp.lt.u32.totalorder %s7418_s7, %s7413_s26 }
 0x18d   : > { %p7422_p5 = scmp.lt.u32.totalorder %s7413_s26, %s8071_s12 }
 0x18e   : > { %p7416_p1 = pnand %p7415_p8, %p7414_p12  ;;  %p7421_p2 = por %p7420_p0, %p7419_p13 }
 0x190   : > { %p7417_p3 = pneg %p7416_p1  ;;  %p7423_p7 = por %p7422_p5, %p7421_p2 }
 0x192   : > { %p7424_p9 = pnand %p7423_p7, %p7417_p3 }
 0x194   : > { %7427 = shalt.err (!%p7424_p9)
}
 0x195   : > { %s7428_s5 = scalar_lea.vmem %s8073_s17, 2048  ;;  %s7589_s21 = smov [#allocation3]  }
 0x196   : > { %p7429_p12 = scmp.ne.s32.totalorder %s8073_s17, %s7428_s5  ;;  %s7433_s2 = sshll.u32 %s7589_s21, 4  ;;  %s7434_s2 = int_to_ptr.vmem [resolvable:$false] %s7433_s2 }
 0x197   : > { %s7435_s11 = scalar_lea.vmem %s7434_s2, 4096  ;;  %p7436_p4 = scmp.lt.s32.totalorder %s8073_s17, %s7434_s2 }
 0x198   : > { %p7431_p1 = pnand %p7429_p12, %p7415_p8  ;;  %p7437_p13 = scmp.lt.s32.totalorder %s7435_s11, %s7428_s5 }
 0x19a   : > { %p7432_p10 = pneg %p7431_p1  ;;  %p7438_p0 = por %p7437_p13, %p7436_p4 }
 0x19c   : > { %p7439_p2 = pnand %p7438_p0, %p7432_p10 }
 0x19e   : > { %7442 = shalt.err (!%p7439_p2)
}
 0x19f   : > { %s9332_s26 = smov 4   ;;  %s9333_s7 = smov 64  }
 0x1a0   : > { %6418 = dma.hbm_to_vmem [thread:$0]  (!%p8077_p11), %s8071_s12, 2048, %s8073_s17, %s744_s19, %s9333_s7, %s9333_s7, %s9332_s26  }
 0x1a1   : > { %s6232_s0 = sshll.u32 %s7571_s30, 9  ;;  %s9334_s2 = sld [smem:[#allocation56_spill]] }
 0x1a2   : > { %s768_s13 = scalar_lea.vmem [#allocation6], %s5898_s8  ;;  %s9335_s16 = sand.u32 1, %s7571_s30  }
 0x1a3   : > { %s775_s15 = sshll.u32 %s768_s13, 4  ;;  %s8126_s18 = scalar_lea.sflag [#allocation7], %s9335_s16  ;;  %s8122_s15 = int_to_ptr.vmem [resolvable:$true] %s775_s15 }
 0x1a7   : > { %s8118_s11 = scalar_lea.hbm %s9334_s2, %s6232_s0  ;;  %s7448_s1 = scalar_lea.hbm %s9334_s2, 1024 }
 0x1a8   : > { %s7443_s20 = scalar_lea.hbm %s8118_s11, 512  ;;  %p7449_p5 = scmp.lt.u32.totalorder %s8118_s11, %s9334_s2 }
 0x1a9   : > { %p7444_p4 = scmp.ne.s32.totalorder %s8118_s11, %s7443_s20  ;;  %p7450_p7 = scmp.lt.u32.totalorder %s7448_s1, %s7443_s20 }
 0x1aa   : > { %p7452_p12 = scmp.lt.u32.totalorder %s7443_s20, %s8118_s11 }
 0x1ab   : > { %p7446_p10 = pnand %p7444_p4, %p7415_p8  ;;  %p7451_p9 = por %p7450_p7, %p7449_p5 }
 0x1ad   : > { %p7447_p3 = pneg %p7446_p10  ;;  %p7453_p1 = por %p7452_p12, %p7451_p9 }
 0x1af   : > { %p7454_p13 = pnand %p7453_p1, %p7447_p3 }
 0x1b1   : > { %7457 = shalt.err (!%p7454_p13)
}
 0x1b2   : > { %s7458_s8 = scalar_lea.vmem %s8122_s15, 512  ;;  %s7590_s13 = smov [#allocation6]  }
 0x1b3   : > { %p7459_p0 = scmp.ne.s32.totalorder %s8122_s15, %s7458_s8  ;;  %s7463_s16 = sshll.u32 %s7590_s13, 4  ;;  %s7464_s16 = int_to_ptr.vmem [resolvable:$false] %s7463_s16 }
 0x1b4   : > { %s7465_s7 = scalar_lea.vmem %s7464_s16, 1024  ;;  %p7466_p10 = scmp.lt.s32.totalorder %s8122_s15, %s7464_s16 }
 0x1b5   : > { %p7461_p2 = pnand %p7459_p0, %p7415_p8  ;;  %p7467_p5 = scmp.lt.s32.totalorder %s7465_s7, %s7458_s8 }
 0x1b7   : > { %p7462_p4 = pneg %p7461_p2  ;;  %p7468_p7 = por %p7467_p5, %p7466_p10 }
 0x1b9   : > { %p7469_p9 = pnand %p7468_p7, %p7462_p4 }
 0x1bb   : > { %7472 = shalt.err (!%p7469_p9)
}
 0x1bc   : > { %s9336_s20 = smov 8   ;;  %s9337_s0 = smov 128  }
 0x1bd   : > { %6421 = dma.hbm_to_vmem [thread:$0]  (!%p8077_p11), %s8118_s11, 512, %s8122_s15, %s8126_s18, %s9337_s0, %s9337_s0, %s9336_s20  }
 0x1be   : > { %s9338_s21 = sld [smem:[#allocation37_spill]] }
 0x1c4   : > { %p9339_p8 = scmp.ne.s32.totalorder %s9338_s21, 0 }
 0x1c6   : > { %787 = sbr.rel (%p9339_p8) target bundleno = 3800 (0xed8), region = 108 }
 0x1cd   : > { %s8158_s5 = sand.u32 1, %s7563_s28  }
 0x1ce   : > { %s5902_s17 = sshll.u32 %s8158_s5, 7  ;;  %s790_s12 = scalar_lea.sflag [#allocation4], %s8158_s5 }
 0x1cf   : > { %s8162_s1 = scalar_lea.vmem [#allocation3], %s5902_s17 }
 0x1d0   : > { %7518 = dma.done.wait (%p8049_p6), %s790_s12, 2048  }
 0x1d1   : > { %7520 = vsyncadd (%p8049_p6), %s790_s12, 4294965248  ;;  %s798_s15 = sand.u32 1, %s7731_s23   ;;  %s5903_s18 = sshll.u32 %s8158_s5, 5 }
 0x1d2   : > { %s799_s9 = scalar_lea.sflag [#allocation7], %s798_s15  ;;  %s8170_s11 = scalar_lea.vmem [#allocation6], %s5903_s18 }
 0x1d3   : > { %7522 = dma.done.wait (%p8049_p6), %s799_s9, 512  }
 0x1d4   : > { %7524 = vsyncadd (%p8049_p6), %s799_s9, 4294966784  ;;  %p9340_p11 = scmp.eq.s32.totalorder %s7731_s23, 0 }
 0x1d6   : > { %7526 = dma.done.wait (%p9340_p11), [#allocation7], 2048   ;;  %p9341_p3 = pmov %p9340_p11 }
 0x1d8   : > { %7528 = vsyncadd (%p9341_p3), [#allocation7], 4294965248  ;;  %p9342_p12 = pmov %p9341_p3 }
 0x1d9   : > { %p9343_p1 = pmov %p9341_p3 }
 0x1da   : > { %7530 = dma.done.wait (%p9342_p12), [#allocation10], 4096  }
 0x1db   : > { %7532 = vsyncadd (%p9343_p1), [#allocation10], 4294963200  ;;  %p9344_p13 = pmov %p9343_p1 }
 0x1dc   : > { %p9345_p0 = pmov %p9343_p1 }
 0x1dd   : > { %7534 = dma.done.wait (%p9344_p13), [#allocation13], 8192  }
 0x1de   : > { %7536 = vsyncadd (%p9345_p0), [#allocation13], 4294959104  ;;  %p9346_p6 = pmov %p9345_p0 }
 0x1df   : > { %p9347_p2 = pmov %p9345_p0 }
 0x1e0   : > { %7538 = dma.done.wait (%p9346_p6), [#allocation16], 8192  }
 0x1e1   : > { %7540 = vsyncadd (%p9347_p2), [#allocation16], 4294959104  ;;  %p9348_p4 = pmov %p9345_p0 }
 0x1e2   : > { %p9349_p10 = pmov %p9345_p0 }
 0x1e3   : > { %7542 = dma.done.wait (%p9348_p4), [#allocation19], 8192  }
 0x1e4   : > { %7544 = vsyncadd (%p9349_p10), [#allocation19], 4294959104  ;;  %p9350_p5 = pmov %p9345_p0 }
 0x1e5   : > { %p9351_p7 = pmov %p9345_p0 }
 0x1e6   : > { %7546 = dma.done.wait (%p9350_p5), [#allocation22], 8192  }
 0x1e7   : > { %7548 = vsyncadd (%p9351_p7), [#allocation22], 4294959104  ;;  %p9352_p9 = pmov %p9345_p0 }
 0x1e8   : > { %p9353_p8 = pmov %p9345_p0 }
 0x1e9   : > { %7550 = dma.done.wait (%p9352_p9), [#allocation25], 2048  }
 0x1ea   : > { %7552 = vsyncadd (%p9353_p8), [#allocation25], 4294965248  ;;  %v9262_v0 = vmov 0   ;;  %v6503_v1 = vld [vmem:[#allocation11 + $0x4] ss:$8 sps:$4 sm:$0xff]   ;;  %v6529_v30 = vld [vmem:[%s8162_s1 + $0x10] sm:$0xff]  }
 0x1eb   : > { %1186 = vmatprep.mubr.bf16.mxu0 %v9262_v0  ;;  %v6505_v2 = vld [vmem:[#allocation11] ss:$8 sps:$4 sm:$0xff]   ;;  %1154 = vmatprep.subr.bf16.mxu0 %v6503_v1  ;;  %v6506_v3 = vld [vmem:[#allocation11 + $0x14] ss:$8 sps:$4 sm:$0xff]   ;;  %v6508_v4 = vld [vmem:[#allocation11 + $0x10] ss:$8 sps:$4 sm:$0xff]  }
 0x1ec   : > { %1155 = vmatpush1.bf16.msra.mxu0 %v6505_v2  ;;  %v6509_v5 = vld [vmem:[#allocation11 + $0x24] ss:$8 sps:$4 sm:$0xff]   ;;  %v6511_v6 = vld [vmem:[#allocation11 + $0x20] ss:$8 sps:$4 sm:$0xff]   ;;  %v6512_v7 = vld [vmem:[#allocation11 + $0x34] ss:$8 sps:$4 sm:$0xff]   ;;  %v968_v2 = vlaneseq }
 0x1ed   : > { %1156 = vmatprep.subr.bf16.mxu0 %v6506_v3  ;;  %v6514_v8 = vld [vmem:[#allocation11 + $0x30] ss:$8 sps:$4 sm:$0xff]   ;;  %v6515_v9 = vld [vmem:[#allocation11 + $0x44] ss:$8 sps:$4 sm:$0xff]   ;;  %v6517_v10 = vld [vmem:[#allocation11 + $0x40] ss:$8 sps:$4 sm:$0xff]  }
 0x1ee   : > { %v6518_v11 = vld [vmem:[#allocation11 + $0x54] ss:$8 sps:$4 sm:$0xff]   ;;  %v6520_v12 = vld [vmem:[#allocation11 + $0x50] ss:$8 sps:$4 sm:$0xff]   ;;  %v6521_v13 = vld [vmem:[#allocation11 + $0x64] ss:$8 sps:$4 sm:$0xff]  }
 0x1ef   : > { %v6523_v14 = vld [vmem:[#allocation11 + $0x60] ss:$8 sps:$4 sm:$0xff]   ;;  %v6524_v15 = vld [vmem:[#allocation11 + $0x74] ss:$8 sps:$4 sm:$0xff]   ;;  %v6526_v16 = vld [vmem:[#allocation11 + $0x70] ss:$8 sps:$4 sm:$0xff]  }
 0x1f0   : > { %1157 = vmatpush1.bf16.msra.mxu0 %v6508_v4  ;;  %v6543_v17 = vld [vmem:[#allocation12 + $0x4] ss:$8 sps:$4 sm:$0xff]   ;;  %v6545_v18 = vld [vmem:[#allocation12] ss:$8 sps:$4 sm:$0xff]   ;;  %v6546_v19 = vld [vmem:[#allocation12 + $0x14] ss:$8 sps:$4 sm:$0xff]  }
 0x1f1   : > { %1158 = vmatprep.subr.bf16.mxu0 %v6509_v5  ;;  %1583 = vmatprep.subr.bf16.mxu1 %v6543_v17  ;;  %v6527_v20 = vld [vmem:[%s8162_s1] sm:$0xff]   ;;  %v6548_v21 = vld [vmem:[#allocation12 + $0x10] ss:$8 sps:$4 sm:$0xff]   ;;  %v6552_v24 = vld [vmem:[#allocation12 + $0x34] ss:$8 sps:$4 sm:$0xff]   ;;  %v969_v3 = vshrl.u32 %v968_v2, 7 }
 0x1f2   : > { %1584 = vmatpush1.bf16.msra.mxu1 %v6545_v18  ;;  %v6549_v22 = vld [vmem:[#allocation12 + $0x24] ss:$8 sps:$4 sm:$0xff]   ;;  %v6551_v23 = vld [vmem:[#allocation12 + $0x20] ss:$8 sps:$4 sm:$0xff]   ;;  %v6554_v26 = vld [vmem:[#allocation12 + $0x30] ss:$8 sps:$4 sm:$0xff]  }
 0x1f3   : > { %1585 = vmatprep.subr.bf16.mxu1 %v6546_v19  ;;  %v6528_v25 = vld [vmem:[%s8162_s1 + $0x8] sm:$0xff]   ;;  %v6558_v29 = vld [vmem:[#allocation12 + $0x54] ss:$8 sps:$4 sm:$0xff]   ;;  %v6560_v31 = vld [vmem:[#allocation12 + $0x50] ss:$8 sps:$4 sm:$0xff]   ;;  %v8236_v4 = vsub.s32 0, %v969_v3 }
 0x1f4   : > { %1159 = vmatpush1.bf16.msra.mxu0 %v6511_v6  ;;  %v6555_v27 = vld [vmem:[#allocation12 + $0x44] ss:$8 sps:$4 sm:$0xff]   ;;  %v6557_v28 = vld [vmem:[#allocation12 + $0x40] ss:$8 sps:$4 sm:$0xff]   ;;  %v6564_v34 = vld [vmem:[#allocation12 + $0x74] ss:$8 sps:$4 sm:$0xff]  }
 0x1f5   : > { %1160 = vmatprep.subr.bf16.mxu0 %v6512_v7  ;;  %v6561_v32 = vld [vmem:[#allocation12 + $0x64] ss:$8 sps:$4 sm:$0xff]   ;;  %v6563_v33 = vld [vmem:[#allocation12 + $0x60] ss:$8 sps:$4 sm:$0xff]   ;;  %v6530_v35 = vld [vmem:[%s8162_s1 + $0x18] sm:$0xff]   ;;  %9354 = vst [vmem:[#allocation38_spill] sm:$0xff] %v8236_v4 }
 0x1f6   : > { %1586 = vmatpush1.bf16.msra.mxu1 %v6548_v21  ;;  %v6566_v36 = vld [vmem:[#allocation12 + $0x70] ss:$8 sps:$4 sm:$0xff]   ;;  %v6567_v37 = vld [vmem:[#allocation12 + $0x84] ss:$8 sps:$4 sm:$0xff]   ;;  %v6569_v38 = vld [vmem:[#allocation12 + $0x80] ss:$8 sps:$4 sm:$0xff]  }
 0x1f7   : > { %1587 = vmatprep.subr.bf16.mxu1 %v6549_v22  ;;  %v6570_v39 = vld [vmem:[#allocation12 + $0x94] ss:$8 sps:$4 sm:$0xff]   ;;  %v6531_v40 = vld [vmem:[%s8162_s1 + $0x20] sm:$0xff]   ;;  %v6572_v41 = vld [vmem:[#allocation12 + $0x90] ss:$8 sps:$4 sm:$0xff]   ;;  %s9355_s26 = sld [smem:[#allocation60_spill]] }
 0x1f8   : > { %1161 = vmatpush1.bf16.msra.mxu0 %v6514_v8  ;;  %v6573_v42 = vld [vmem:[#allocation12 + $0xa4] ss:$8 sps:$4 sm:$0xff]   ;;  %v6575_v43 = vld [vmem:[#allocation12 + $0xa0] ss:$8 sps:$4 sm:$0xff]   ;;  %v6576_v44 = vld [vmem:[#allocation12 + $0xb4] ss:$8 sps:$4 sm:$0xff]  }
 0x1f9   : > { %1162 = vmatprep.subr.bf16.mxu0 %v6515_v9  ;;  %v6532_v45 = vld [vmem:[%s8162_s1 + $0x28] sm:$0xff]   ;;  %v6578_v46 = vld [vmem:[#allocation12 + $0xb0] ss:$8 sps:$4 sm:$0xff]   ;;  %v6582_v49 = vld [vmem:[#allocation12 + $0xd4] ss:$8 sps:$4 sm:$0xff]   ;;  %v8241_v6 = vsub.s32 1, %v969_v3 }
 0x1fa   : > { %1588 = vmatpush1.bf16.msra.mxu1 %v6551_v23  ;;  %v6579_v47 = vld [vmem:[#allocation12 + $0xc4] ss:$8 sps:$4 sm:$0xff]   ;;  %v6581_v48 = vld [vmem:[#allocation12 + $0xc0] ss:$8 sps:$4 sm:$0xff]   ;;  %v6533_v50 = vld [vmem:[%s8162_s1 + $0x30] sm:$0xff]   ;;  %s9372_s16 = sld [smem:[#allocation62_spill]] }
 0x1fb   : > { %1589 = vmatprep.subr.bf16.mxu1 %v6552_v24  ;;  %v6584_v51 = vld [vmem:[#allocation12 + $0xd0] ss:$8 sps:$4 sm:$0xff]   ;;  %v6535_v53 = vld [vmem:[%s8162_s1 + $0x40] sm:$0xff]   ;;  %v6536_v54 = vld [vmem:[%s8162_s1 + $0x48] sm:$0xff]   ;;  %9356 = vst [vmem:[#allocation39_spill] sm:$0xff] %v8241_v6  ;;  %s9373_s0 = sld [smem:[#allocation64_spill]] }
 0x1fc   : > { %1163 = vmatpush1.bf16.msra.mxu0 %v6517_v10  ;;  %v6534_v52 = vld [vmem:[%s8162_s1 + $0x38] sm:$0xff]   ;;  %v6537_v55 = vld [vmem:[%s8162_s1 + $0x50] sm:$0xff]   ;;  %v6585_v57 = vld [vmem:[#allocation12 + $0xe4] ss:$8 sps:$4 sm:$0xff]   ;;  %s9390_s12 = sld [smem:[#allocation67_spill]]  ;;  %s9393_s18 = sld [smem:[#allocation69_spill]] }
 0x1fd   : > { %1164 = vmatprep.subr.bf16.mxu0 %v6518_v11  ;;  %v6538_v56 = vld [vmem:[%s8162_s1 + $0x58] sm:$0xff]   ;;  %v6587_v58 = vld [vmem:[#allocation12 + $0xe0] ss:$8 sps:$4 sm:$0xff]   ;;  %v6541_v63 = vld [vmem:[%s8162_s1 + $0x70] sm:$0xff]   ;;  %s9394_s10 = sld [smem:[#allocation72_spill]]  ;;  %s9395_s8 = sld [smem:[#allocation74_spill]] }
 0x1fe   : > { %1590 = vmatpush1.bf16.msra.mxu1 %v6554_v26  ;;  %v6588_v59 = vld [vmem:[#allocation12 + $0xf4] ss:$8 sps:$4 sm:$0xff]   ;;  %v6590_v60 = vld [vmem:[#allocation12 + $0xf0] ss:$8 sps:$4 sm:$0xff]   ;;  %v6539_v61 = vld [vmem:[%s8162_s1 + $0x60] sm:$0xff]   ;;  %s5916_s13 = sshll.u32 %s8158_s5, 4 }
 0x1ff   : > { %1591 = vmatprep.subr.bf16.mxu1 %v6555_v27  ;;  %v6540_v62 = vld [vmem:[%s8162_s1 + $0x68] sm:$0xff]   ;;  %v6542_v1 = vld [vmem:[%s8162_s1 + $0x78] sm:$0xff]   ;;  %v966_v5 = vld [vmem:[%s9355_s26] sm:$0x3]  ;;  %s9396_s20 = sld [smem:[#allocation76_spill]]  ;;  %s6233_s17 = sshll.u32 %s7731_s23, 8 }
 0x200   : > { %1165 = vmatpush1.bf16.msra.mxu0 %v6520_v12  ;;  %v8244_v7 = vrot.slane %v966_v5, %v8236_v4  ;;  %v8247_v9 = vrot.slane %v966_v5, %v8241_v6  ;;  %v6591_v11 = vld [vmem:[#allocation14] ss:$8 sps:$4 sm:$0xff]   ;;  %v6593_v12 = vld [vmem:[#allocation14 + $0x4] ss:$8 sps:$4 sm:$0xff]   ;;  %v6602_v27 = vld [vmem:[#allocation14 + $0x34] ss:$8 sps:$4 sm:$0xff]  }
 0x201   : > { %1166 = vmatprep.subr.bf16.mxu0 %v6521_v13  ;;  %v6599_v22 = vld [vmem:[#allocation14 + $0x24] ss:$8 sps:$4 sm:$0xff]   ;;  %v6615_v5 = vld [vmem:[#allocation14 + $0x80] ss:$8 sps:$4 sm:$0xff]   ;;  %s9397_s15 = sld [smem:[#allocation77_spill]]  ;;  %s5657_s9 = scalar_lea.sflag [#allocation5], %s8158_s5 }
 0x202   : > { %1592 = vmatpush1.bf16.msra.mxu1 %v6557_v28  ;;  %p9398_p3 = scmp.ne.s32.totalorder %s9328_s27, 0  ;;  %s7592_s23 = smov [#allocation26]  }
 0x203   : > { %1593 = vmatprep.subr.bf16.mxu1 %v6558_v29 }
 0x204   : > { %1167 = vmatpush1.bf16.msra.mxu0 %v6523_v14  ;;  %v6596_v14 = vld [vmem:[#allocation14 + $0x14] ss:$8 sps:$4 sm:$0xff]  }
 0x205   : > { %1168 = vmatprep.subr.bf16.mxu0 %v6524_v15 }
 0x206   : > { %1594 = vmatpush1.bf16.msra.mxu1 %v6560_v31 }
 0x207   : > { %1595 = vmatprep.subr.bf16.mxu1 %v6561_v32 }
 0x208   : > { %1169 = vmatpush1.bf16.msra.mxu0 %v6526_v16 }
 0x209   : > { %2076 = vmatprep.subr.bf16.mxu0 %v6593_v12 }
 0x20a   : > { %1596 = vmatpush1.bf16.msra.mxu1 %v6563_v33 }
 0x20b   : > { %1187 = vmatmul.mubr.bf16.vlgmr.msra.gmra.mrb[0].mxu0 %v6527_v20  ;;  %1597 = vmatprep.subr.bf16.mxu1 %v6564_v34  ;;  %v6594_v20 = vld [vmem:[#allocation14 + $0x10] ss:$8 sps:$4 sm:$0xff]  }
 0x20c   : > { %1196 = vmatprep.mubr.bf16.mxu0 %v9262_v0  ;;  %2077 = vmatpush1.bf16.msra.mxu0 %v6591_v11  ;;  %v6600_v34 = vld [vmem:[#allocation14 + $0x30] ss:$8 sps:$4 sm:$0xff]  }
 0x20d   : > { %2078 = vmatprep.subr.bf16.mxu0 %v6596_v14 }
 0x20e   : > { %1598 = vmatpush1.bf16.msra.mxu1 %v6566_v36  ;;  %v6605_v36 = vld [vmem:[#allocation14 + $0x44] ss:$8 sps:$4 sm:$0xff]  }
 0x20f   : > { %1599 = vmatprep.subr.bf16.mxu1 %v6567_v37 }
 0x210   : > { %2079 = vmatpush1.bf16.msra.mxu0 %v6594_v20 }
 0x211   : > { %2080 = vmatprep.subr.bf16.mxu0 %v6599_v22 }
 0x212   : > { %1600 = vmatpush1.bf16.msra.mxu1 %v6569_v38 }
 0x213   : > { %1197 = vmatmul.mubr.bf16.gmra.mrb[4].mxu0 %v6528_v25  ;;  %1601 = vmatprep.subr.bf16.mxu1 %v6570_v39  ;;  %v6597_v25 = vld [vmem:[#allocation14 + $0x20] ss:$8 sps:$4 sm:$0xff]  }
 0x214   : > { %1206 = vmatprep.mubr.bf16.mxu0 %v9262_v0  ;;  %2081 = vmatpush1.bf16.msra.mxu0 %v6597_v25  ;;  %v6603_v39 = vld [vmem:[#allocation14 + $0x40] ss:$8 sps:$4 sm:$0xff]  }
 0x215   : > { %2082 = vmatprep.subr.bf16.mxu0 %v6602_v27 }
 0x216   : > { %1602 = vmatpush1.bf16.msra.mxu1 %v6572_v41  ;;  %v6608_v41 = vld [vmem:[#allocation14 + $0x54] ss:$8 sps:$4 sm:$0xff]  }
 0x217   : > { %1603 = vmatprep.subr.bf16.mxu1 %v6573_v42 }
 0x218   : > { %2083 = vmatpush1.bf16.msra.mxu0 %v6600_v34 }
 0x219   : > { %2084 = vmatprep.subr.bf16.mxu0 %v6605_v36  ;;  %v6629_v36 = vld [vmem:[#allocation14 + $0xc4] ss:$8 sps:$4 sm:$0xff]  }
 0x21a   : > { %1604 = vmatpush1.bf16.msra.mxu1 %v6575_v43 }
 0x21b   : > { %1207 = vmatmul.mubr.bf16.gmra.mrb[8].mxu0 %v6529_v30  ;;  %1605 = vmatprep.subr.bf16.mxu1 %v6576_v44 }
 0x21c   : > { %1216 = vmatprep.mubr.bf16.mxu0 %v9262_v0  ;;  %2085 = vmatpush1.bf16.msra.mxu0 %v6603_v39 }
 0x21d   : > { %2086 = vmatprep.subr.bf16.mxu0 %v6608_v41 }
 0x21e   : > { %1606 = vmatpush1.bf16.msra.mxu1 %v6578_v46 }
 0x21f   : > { %1607 = vmatprep.subr.bf16.mxu1 %v6579_v47 }
 0x222   : > { %1608 = vmatpush1.bf16.msra.mxu1 %v6581_v48  ;;  %v6606_v48 = vld [vmem:[#allocation14 + $0x50] ss:$8 sps:$4 sm:$0xff]  }
 0x223   : > { %1217 = vmatmul.mubr.bf16.gmra.mrb[12].mxu0 %v6530_v35  ;;  %1609 = vmatprep.subr.bf16.mxu1 %v6582_v49 }
 0x224   : > { %1226 = vmatprep.mubr.bf16.mxu0 %v9262_v0  ;;  %2087 = vmatpush1.bf16.msra.mxu0 %v6606_v48 }
 0x226   : > { %1610 = vmatpush1.bf16.msra.mxu1 %v6584_v51 }
 0x227   : > { %1611 = vmatprep.subr.bf16.mxu1 %v6585_v57 }
 0x22a   : > { %1612 = vmatpush1.bf16.msra.mxu1 %v6587_v58 }
 0x22b   : > { %1227 = vmatmul.mubr.bf16.gmra.mrb[16].mxu0 %v6531_v40  ;;  %1613 = vmatprep.subr.bf16.mxu1 %v6588_v59 }
 0x22c   : > { %1236 = vmatprep.mubr.bf16.mxu0 %v9262_v0 }
 0x22e   : > { %1614 = vmatpush1.bf16.msra.mxu1 %v6590_v60 }
 0x233   : > { %1237 = vmatmul.mubr.bf16.gmra.mrb[20].mxu0 %v6532_v45 }
 0x234   : > { %1246 = vmatprep.mubr.bf16.mxu0 %v9262_v0 }
 0x23b   : > { %1247 = vmatmul.mubr.bf16.gmra.mrb[24].mxu0 %v6533_v50  ;;  %v6611_v50 = vld [vmem:[#allocation14 + $0x64] ss:$8 sps:$4 sm:$0xff]  }
 0x23c   : > { %1256 = vmatprep.mubr.bf16.mxu0 %v9262_v0  ;;  %2088 = vmatprep.subr.bf16.mxu0 %v6611_v50  ;;  %v6630_v50 = vld [vmem:[#allocation14 + $0xd0] ss:$8 sps:$4 sm:$0xff]  }
 0x243   : > { %1257 = vmatmul.mubr.bf16.gmra.mrb[28].mxu0 %v6534_v52 }
 0x244   : > { %1266 = vmatprep.mubr.bf16.mxu0 %v9262_v0 }
 0x24b   : > { %1267 = vmatmul.mubr.bf16.gmra.mrb[32].mxu0 %v6535_v53  ;;  %v6609_v53 = vld [vmem:[#allocation14 + $0x60] ss:$8 sps:$4 sm:$0xff]  }
 0x24c   : > { %1276 = vmatprep.mubr.bf16.mxu0 %v9262_v0  ;;  %2089 = vmatpush1.bf16.msra.mxu0 %v6609_v53 }
 0x253   : > { %1277 = vmatmul.mubr.bf16.gmra.mrb[36].mxu0 %v6536_v54 }
 0x254   : > { %1286 = vmatprep.mubr.bf16.mxu0 %v9262_v0 }
 0x25b   : > { %1287 = vmatmul.mubr.bf16.gmra.mrb[40].mxu0 %v6537_v55  ;;  %v6614_v55 = vld [vmem:[#allocation14 + $0x74] ss:$8 sps:$4 sm:$0xff]  }
 0x25c   : > { %1296 = vmatprep.mubr.bf16.mxu0 %v9262_v0  ;;  %2090 = vmatprep.subr.bf16.mxu0 %v6614_v55 }
 0x263   : > { %1297 = vmatmul.mubr.bf16.gmra.mrb[44].mxu0 %v6538_v56 }
 0x264   : > { %1306 = vmatprep.mubr.bf16.mxu0 %v9262_v0 }
 0x26b   : > { %1307 = vmatmul.mubr.bf16.gmra.mrb[48].mxu0 %v6539_v61 }
 0x26c   : > { %1316 = vmatprep.mubr.bf16.mxu0 %v9262_v0 }
 0x273   : > { %1317 = vmatmul.mubr.bf16.gmra.mrb[52].mxu0 %v6540_v62  ;;  %v6612_v62 = vld [vmem:[#allocation14 + $0x70] ss:$8 sps:$4 sm:$0xff]  }
 0x274   : > { %1326 = vmatprep.mubr.bf16.mxu0 %v9262_v0  ;;  %2091 = vmatpush1.bf16.msra.mxu0 %v6612_v62 }
 0x27b   : > { %1327 = vmatmul.mubr.bf16.gmra.mrb[56].mxu0 %v6541_v63 }
 0x27c   : > { %1336 = vmatprep.mubr.bf16.mxu0 %v9262_v0 }
 0x283   : > { %1337 = vmatmul.mubr.bf16.gmra.mrb[60].mxu0 %v6542_v1  ;;  %v6617_v1 = vld [vmem:[#allocation14 + $0x84] ss:$8 sps:$4 sm:$0xff]  }
 0x284   : > { %2092 = vmatprep.subr.bf16.mxu0 %v6617_v1 }
 0x285   : > { %2093 = vmatpush1.bf16.msra.mxu0 %v6615_v5 }
 0x2de   : > { %v1188_v8 = vpop.f32.mrb[0].mxu0 }
 0x2df   : > { %v1190_v10 = vpop.f32.mrb[1].mxu0  ;;  %v1189_v15 = vadd.f32 %v1188_v8, %v8244_v7 }
 0x2e0   : > { %v1192_v13 = vpop.f32.mrb[2].mxu0  ;;  %v1191_v18 = vadd.f32 %v1190_v10, %v8247_v9  ;;  %v6620_v10 = vld [vmem:[#allocation14 + $0x94] ss:$8 sps:$4 sm:$0xff]  }
 0x2e1   : > { %v1193_v16 = vadd.f32 %v1192_v13, %v8244_v7  ;;  %v1194_v17 = vpop.f32.mrb[3].mxu0  ;;  %2094 = vmatprep.subr.bf16.mxu0 %v6620_v10 }
 0x2e2   : > { %v1195_v19 = vadd.f32 %v1194_v17, %v8247_v9  ;;  %v6618_v17 = vld [vmem:[#allocation14 + $0x90] ss:$8 sps:$4 sm:$0xff]  }
 0x2e3   : > { %v8253_v21 = vpack.c.bf16 %v1193_v16, %v1189_v15  ;;  %2095 = vmatpush1.bf16.msra.mxu0 %v6618_v17 }
 0x2e4   : > { %v8255_v23 = vpack.c.bf16 %v1195_v19, %v1191_v18  ;;  %v6623_v19 = vld [vmem:[#allocation14 + $0xa4] ss:$8 sps:$4 sm:$0xff]  }
 0x2e5   : > { %2096 = vmatprep.subr.bf16.mxu0 %v6623_v19 }
 0x2e6   : > { %v1198_v24 = vpop.f32.mrb[4].mxu0  ;;  %1615 = vmatprep.mubr.bf16.mxu1 %v8255_v23 }
 0x2e7   : > { %v1200_v26 = vpop.f32.mrb[5].mxu0  ;;  %1616 = vmatmul.mubr.bf16.vlgmr.msra.gmra.mrb[0].mxu1 %v8253_v21  ;;  %v1199_v29 = vadd.f32 %v1198_v24, %v8244_v7  ;;  %v6621_v24 = vld [vmem:[#allocation14 + $0xa0] ss:$8 sps:$4 sm:$0xff]  }
 0x2e8   : > { %v1202_v28 = vpop.f32.mrb[6].mxu0  ;;  %v1201_v32 = vadd.f32 %v1200_v26, %v8247_v9  ;;  %v6626_v26 = vld [vmem:[#allocation14 + $0xb4] ss:$8 sps:$4 sm:$0xff]   ;;  %2097 = vmatpush1.bf16.msra.mxu0 %v6621_v24 }
 0x2e9   : > { %v1203_v30 = vadd.f32 %v1202_v28, %v8244_v7  ;;  %v1204_v31 = vpop.f32.mrb[7].mxu0  ;;  %2098 = vmatprep.subr.bf16.mxu0 %v6626_v26 }
 0x2ea   : > { %v1205_v33 = vadd.f32 %v1204_v31, %v8247_v9 }
 0x2eb   : > { %v8263_v35 = vpack.c.bf16 %v1203_v30, %v1199_v29 }
 0x2ec   : > { %v8265_v37 = vpack.c.bf16 %v1205_v33, %v1201_v32  ;;  %v6624_v33 = vld [vmem:[#allocation14 + $0xb0] ss:$8 sps:$4 sm:$0xff]  }
 0x2ed   : > { %2099 = vmatpush1.bf16.msra.mxu0 %v6624_v33 }
 0x2ee   : > { %v1208_v38 = vpop.f32.mrb[8].mxu0  ;;  %1625 = vmatprep.mubr.bf16.mxu1 %v8265_v37  ;;  %2100 = vmatprep.subr.bf16.mxu0 %v6629_v36 }
 0x2ef   : > { %v1210_v40 = vpop.f32.mrb[9].mxu0  ;;  %1626 = vmatmul.mubr.bf16.gmra.mrb[4].mxu1 %v8263_v35  ;;  %v1209_v43 = vadd.f32 %v1208_v38, %v8244_v7 }
 0x2f0   : > { %v1212_v42 = vpop.f32.mrb[10].mxu0  ;;  %v1211_v46 = vadd.f32 %v1210_v40, %v8247_v9  ;;  %v6627_v40 = vld [vmem:[#allocation14 + $0xc0] ss:$8 sps:$4 sm:$0xff]  }
 0x2f1   : > { %v1213_v44 = vadd.f32 %v1212_v42, %v8244_v7  ;;  %v1214_v45 = vpop.f32.mrb[11].mxu0  ;;  %v6632_v42 = vld [vmem:[#allocation14 + $0xd4] ss:$8 sps:$4 sm:$0xff]   ;;  %2101 = vmatpush1.bf16.msra.mxu0 %v6627_v40 }
 0x2f2   : > { %v1215_v47 = vadd.f32 %v1214_v45, %v8247_v9  ;;  %2102 = vmatprep.subr.bf16.mxu0 %v6632_v42 }
 0x2f3   : > { %v8273_v49 = vpack.c.bf16 %v1213_v44, %v1209_v43 }
 0x2f4   : > { %v8275_v51 = vpack.c.bf16 %v1215_v47, %v1211_v46 }
 0x2f5   : > { %2103 = vmatpush1.bf16.msra.mxu0 %v6630_v50 }
 0x2f6   : > { %v1218_v52 = vpop.f32.mrb[12].mxu0  ;;  %1635 = vmatprep.mubr.bf16.mxu1 %v8275_v51 }
 0x2f7   : > { %v1220_v54 = vpop.f32.mrb[13].mxu0  ;;  %1636 = vmatmul.mubr.bf16.gmra.mrb[8].mxu1 %v8273_v49  ;;  %v1219_v57 = vadd.f32 %v1218_v52, %v8244_v7 }
 0x2f8   : > { %v1222_v56 = vpop.f32.mrb[14].mxu0  ;;  %v1221_v60 = vadd.f32 %v1220_v54, %v8247_v9 }
 0x2f9   : > { %v1223_v58 = vadd.f32 %v1222_v56, %v8244_v7  ;;  %v1224_v59 = vpop.f32.mrb[15].mxu0 }
 0x2fa   : > { %v1225_v61 = vadd.f32 %v1224_v59, %v8247_v9 }
 0x2fb   : > { %v8283_v63 = vpack.c.bf16 %v1223_v58, %v1219_v57 }
 0x2fc   : > { %v8285_v2 = vpack.c.bf16 %v1225_v61, %v1221_v60 }
 0x2fe   : > { %v1228_v3 = vpop.f32.mrb[16].mxu0  ;;  %1645 = vmatprep.mubr.bf16.mxu1 %v8285_v2 }
 0x2ff   : > { %v1230_v8 = vpop.f32.mrb[17].mxu0  ;;  %1646 = vmatmul.mubr.bf16.gmra.mrb[12].mxu1 %v8283_v63  ;;  %v1229_v12 = vadd.f32 %v1228_v3, %v8244_v7 }
 0x300   : > { %v1232_v11 = vpop.f32.mrb[18].mxu0  ;;  %v1231_v15 = vadd.f32 %v1230_v8, %v8247_v9 }
 0x301   : > { %v1233_v13 = vadd.f32 %v1232_v11, %v8244_v7  ;;  %v1234_v14 = vpop.f32.mrb[19].mxu0 }
 0x302   : > { %v1235_v16 = vadd.f32 %v1234_v14, %v8247_v9 }
 0x303   : > { %v8293_v18 = vpack.c.bf16 %v1233_v13, %v1229_v12 }
 0x304   : > { %v8295_v20 = vpack.c.bf16 %v1235_v16, %v1231_v15 }
 0x306   : > { %v1238_v22 = vpop.f32.mrb[20].mxu0  ;;  %1655 = vmatprep.mubr.bf16.mxu1 %v8295_v20 }
 0x307   : > { %v1240_v25 = vpop.f32.mrb[21].mxu0  ;;  %1656 = vmatmul.mubr.bf16.gmra.mrb[16].mxu1 %v8293_v18  ;;  %v1239_v28 = vadd.f32 %v1238_v22, %v8244_v7 }
 0x308   : > { %v1242_v27 = vpop.f32.mrb[22].mxu0  ;;  %v1241_v31 = vadd.f32 %v1240_v25, %v8247_v9 }
 0x309   : > { %v1243_v29 = vadd.f32 %v1242_v27, %v8244_v7  ;;  %v1244_v30 = vpop.f32.mrb[23].mxu0 }
 0x30a   : > { %v1245_v32 = vadd.f32 %v1244_v30, %v8247_v9 }
 0x30b   : > { %v8303_v34 = vpack.c.bf16 %v1243_v29, %v1239_v28 }
 0x30c   : > { %v8305_v38 = vpack.c.bf16 %v1245_v32, %v1241_v31 }
 0x30e   : > { %v1248_v39 = vpop.f32.mrb[24].mxu0  ;;  %1665 = vmatprep.mubr.bf16.mxu1 %v8305_v38 }
 0x30f   : > { %v1250_v41 = vpop.f32.mrb[25].mxu0  ;;  %1666 = vmatmul.mubr.bf16.gmra.mrb[20].mxu1 %v8303_v34  ;;  %v1249_v44 = vadd.f32 %v1248_v39, %v8244_v7 }
 0x310   : > { %v1252_v43 = vpop.f32.mrb[26].mxu0  ;;  %v1251_v47 = vadd.f32 %v1250_v41, %v8247_v9 }
 0x311   : > { %v1253_v45 = vadd.f32 %v1252_v43, %v8244_v7  ;;  %v1254_v46 = vpop.f32.mrb[27].mxu0 }
 0x312   : > { %v1255_v48 = vadd.f32 %v1254_v46, %v8247_v9 }
 0x313   : > { %v8313_v52 = vpack.c.bf16 %v1253_v45, %v1249_v44 }
 0x314   : > { %v8315_v53 = vpack.c.bf16 %v1255_v48, %v1251_v47 }
 0x315   : > { %9357 = vst [vmem:[#allocation40_spill] sm:$0xff] %v8313_v52 }
 0x316   : > { %v1258_v54 = vpop.f32.mrb[28].mxu0  ;;  %1675 = vmatprep.mubr.bf16.mxu1 %v8315_v53 }
 0x317   : > { %v1260_v55 = vpop.f32.mrb[29].mxu0  ;;  %1676 = vmatmul.mubr.bf16.gmra.mrb[24].mxu1 %v8313_v52  ;;  %v1259_v57 = vadd.f32 %v1258_v54, %v8244_v7 }
 0x318   : > { %v1262_v56 = vpop.f32.mrb[30].mxu0  ;;  %v1261_v60 = vadd.f32 %v1260_v55, %v8247_v9 }
 0x319   : > { %v1263_v58 = vadd.f32 %v1262_v56, %v8244_v7  ;;  %v1264_v59 = vpop.f32.mrb[31].mxu0 }
 0x31a   : > { %v1265_v61 = vadd.f32 %v1264_v59, %v8247_v9 }
 0x31b   : > { %v8323_v62 = vpack.c.bf16 %v1263_v58, %v1259_v57  ;;  %v6635_v58 = vld [vmem:[#allocation14 + $0xe4] ss:$8 sps:$4 sm:$0xff]  }
 0x31c   : > { %v8325_v1 = vpack.c.bf16 %v1265_v61, %v1261_v60  ;;  %v6633_v60 = vld [vmem:[#allocation14 + $0xe0] ss:$8 sps:$4 sm:$0xff]   ;;  %2104 = vmatprep.subr.bf16.mxu0 %v6635_v58 }
 0x31d   : > { %9358 = vst [vmem:[#allocation41_spill] sm:$0xff] %v8323_v62  ;;  %2105 = vmatpush1.bf16.msra.mxu0 %v6633_v60 }
 0x31e   : > { %9359 = vst [vmem:[#allocation42_spill] sm:$0xff] %v8325_v1  ;;  %v1268_v3 = vpop.f32.mrb[32].mxu0  ;;  %1685 = vmatprep.mubr.bf16.mxu1 %v8325_v1 }
 0x31f   : > { %v1270_v5 = vpop.f32.mrb[33].mxu0  ;;  %1686 = vmatmul.mubr.bf16.gmra.mrb[28].mxu1 %v8323_v62  ;;  %v1269_v10 = vadd.f32 %v1268_v3, %v8244_v7 }
 0x320   : > { %v1272_v8 = vpop.f32.mrb[34].mxu0  ;;  %v1271_v13 = vadd.f32 %v1270_v5, %v8247_v9  ;;  %v6638_v5 = vld [vmem:[#allocation14 + $0xf4] ss:$8 sps:$4 sm:$0xff]  }
 0x321   : > { %v1273_v11 = vadd.f32 %v1272_v8, %v8244_v7  ;;  %v1274_v12 = vpop.f32.mrb[35].mxu0  ;;  %2106 = vmatprep.subr.bf16.mxu0 %v6638_v5 }
 0x322   : > { %v1275_v14 = vadd.f32 %v1274_v12, %v8247_v9 }
 0x323   : > { %v8333_v15 = vpack.c.bf16 %v1273_v11, %v1269_v10  ;;  %v6636_v10 = vld [vmem:[#allocation14 + $0xf0] ss:$8 sps:$4 sm:$0xff]  }
 0x324   : > { %v8335_v16 = vpack.c.bf16 %v1275_v14, %v1271_v13  ;;  %2107 = vmatpush1.bf16.msra.mxu0 %v6636_v10 }
 0x326   : > { %v1278_v17 = vpop.f32.mrb[36].mxu0  ;;  %1695 = vmatprep.mubr.bf16.mxu1 %v8335_v16 }
 0x327   : > { %v1280_v19 = vpop.f32.mrb[37].mxu0  ;;  %1696 = vmatmul.mubr.bf16.gmra.mrb[32].mxu1 %v8333_v15  ;;  %v1279_v24 = vadd.f32 %v1278_v17, %v8244_v7 }
 0x328   : > { %v1282_v22 = vpop.f32.mrb[38].mxu0  ;;  %v1281_v27 = vadd.f32 %v1280_v19, %v8247_v9 }
 0x329   : > { %v1283_v25 = vadd.f32 %v1282_v22, %v8244_v7  ;;  %v1284_v26 = vpop.f32.mrb[39].mxu0 }
 0x32a   : > { %v1285_v28 = vadd.f32 %v1284_v26, %v8247_v9 }
 0x32b   : > { %v8343_v29 = vpack.c.bf16 %v1283_v25, %v1279_v24 }
 0x32c   : > { %v8345_v30 = vpack.c.bf16 %v1285_v28, %v1281_v27 }
 0x32e   : > { %v1288_v31 = vpop.f32.mrb[40].mxu0  ;;  %1705 = vmatprep.mubr.bf16.mxu1 %v8345_v30 }
 0x32f   : > { %v1290_v32 = vpop.f32.mrb[41].mxu0  ;;  %1706 = vmatmul.mubr.bf16.gmra.mrb[36].mxu1 %v8343_v29  ;;  %v1289_v36 = vadd.f32 %v1288_v31, %v8244_v7 }
 0x330   : > { %v1292_v33 = vpop.f32.mrb[42].mxu0  ;;  %v1291_v41 = vadd.f32 %v1290_v32, %v8247_v9 }
 0x331   : > { %v1293_v39 = vadd.f32 %v1292_v33, %v8244_v7  ;;  %v1294_v40 = vpop.f32.mrb[43].mxu0 }
 0x332   : > { %v1295_v42 = vadd.f32 %v1294_v40, %v8247_v9 }
 0x333   : > { %v8353_v43 = vpack.c.bf16 %v1293_v39, %v1289_v36 }
 0x334   : > { %v8355_v44 = vpack.c.bf16 %v1295_v42, %v1291_v41 }
 0x335   : > { %9360 = vst [vmem:[#allocation43_spill] sm:$0xff] %v8353_v43 }
 0x336   : > { %9361 = vst [vmem:[#allocation44_spill] sm:$0xff] %v8355_v44  ;;  %v1298_v45 = vpop.f32.mrb[44].mxu0  ;;  %1715 = vmatprep.mubr.bf16.mxu1 %v8355_v44 }
 0x337   : > { %v1300_v46 = vpop.f32.mrb[45].mxu0  ;;  %1716 = vmatmul.mubr.bf16.gmra.mrb[40].mxu1 %v8353_v43  ;;  %v1299_v48 = vadd.f32 %v1298_v45, %v8244_v7 }
 0x338   : > { %v1302_v47 = vpop.f32.mrb[46].mxu0  ;;  %v1301_v55 = vadd.f32 %v1300_v46, %v8247_v9 }
 0x339   : > { %v1303_v50 = vadd.f32 %v1302_v47, %v8244_v7  ;;  %v1304_v54 = vpop.f32.mrb[47].mxu0 }
 0x33a   : > { %v1305_v56 = vadd.f32 %v1304_v54, %v8247_v9 }
 0x33b   : > { %v8363_v57 = vpack.c.bf16 %v1303_v50, %v1299_v48 }
 0x33c   : > { %v8365_v59 = vpack.c.bf16 %v1305_v56, %v1301_v55 }
 0x33d   : > { %9362 = vst [vmem:[#allocation45_spill] sm:$0xff] %v8363_v57 }
 0x33e   : > { %9363 = vst [vmem:[#allocation46_spill] sm:$0xff] %v8365_v59  ;;  %v1308_v61 = vpop.f32.mrb[48].mxu0  ;;  %1725 = vmatprep.mubr.bf16.mxu1 %v8365_v59 }
 0x33f   : > { %v1310_v3 = vpop.f32.mrb[49].mxu0  ;;  %1726 = vmatmul.mubr.bf16.gmra.mrb[44].mxu1 %v8363_v57  ;;  %v1309_v11 = vadd.f32 %v1308_v61, %v8244_v7 }
 0x340   : > { %v1312_v8 = vpop.f32.mrb[50].mxu0  ;;  %v1311_v14 = vadd.f32 %v1310_v3, %v8247_v9 }
 0x341   : > { %v1313_v12 = vadd.f32 %v1312_v8, %v8244_v7  ;;  %v1314_v13 = vpop.f32.mrb[51].mxu0 }
 0x342   : > { %v1315_v17 = vadd.f32 %v1314_v13, %v8247_v9  ;;  %v1411_v13 = vld [vmem:[%s9372_s16] sm:$0x3] }
 0x343   : > { %v8373_v19 = vpack.c.bf16 %v1313_v12, %v1309_v11 }
 0x344   : > { %v8375_v22 = vpack.c.bf16 %v1315_v17, %v1311_v14  ;;  %v8413_v14 = vrot.slane %v1411_v13, %v8236_v4 }
 0x345   : > { %9364 = vst [vmem:[#allocation47_spill] sm:$0xff] %v8373_v19 }
 0x346   : > { %9365 = vst [vmem:[#allocation48_spill] sm:$0xff] %v8375_v22  ;;  %v1318_v24 = vpop.f32.mrb[52].mxu0  ;;  %1735 = vmatprep.mubr.bf16.mxu1 %v8375_v22 }
 0x347   : > { %v1320_v25 = vpop.f32.mrb[53].mxu0  ;;  %1736 = vmatmul.mubr.bf16.gmra.mrb[48].mxu1 %v8373_v19  ;;  %v1319_v27 = vadd.f32 %v1318_v24, %v8244_v7 }
 0x348   : > { %v1322_v26 = vpop.f32.mrb[54].mxu0  ;;  %v1321_v32 = vadd.f32 %v1320_v25, %v8247_v9 }
 0x349   : > { %v1323_v28 = vadd.f32 %v1322_v26, %v8244_v7  ;;  %v1324_v31 = vpop.f32.mrb[55].mxu0 }
 0x34a   : > { %v1325_v33 = vadd.f32 %v1324_v31, %v8247_v9 }
 0x34b   : > { %v8383_v36 = vpack.c.bf16 %v1323_v28, %v1319_v27 }
 0x34c   : > { %v8385_v39 = vpack.c.bf16 %v1325_v33, %v1321_v32 }
 0x34d   : > { %9366 = vst [vmem:[#allocation49_spill] sm:$0xff] %v8383_v36 }
 0x34e   : > { %9367 = vst [vmem:[#allocation50_spill] sm:$0xff] %v8385_v39  ;;  %v1328_v40 = vpop.f32.mrb[56].mxu0  ;;  %1745 = vmatprep.mubr.bf16.mxu1 %v8385_v39 }
 0x34f   : > { %v1330_v41 = vpop.f32.mrb[57].mxu0  ;;  %1746 = vmatmul.mubr.bf16.gmra.mrb[52].mxu1 %v8383_v36  ;;  %v1329_v45 = vadd.f32 %v1328_v40, %v8244_v7 }
 0x350   : > { %v1332_v42 = vpop.f32.mrb[58].mxu0  ;;  %v1331_v48 = vadd.f32 %v1330_v41, %v8247_v9 }
 0x351   : > { %v1333_v46 = vadd.f32 %v1332_v42, %v8244_v7  ;;  %v1334_v47 = vpop.f32.mrb[59].mxu0 }
 0x352   : > { %v1335_v50 = vadd.f32 %v1334_v47, %v8247_v9 }
 0x353   : > { %v8393_v54 = vpack.c.bf16 %v1333_v46, %v1329_v45 }
 0x354   : > { %v8395_v55 = vpack.c.bf16 %v1335_v50, %v1331_v48 }
 0x355   : > { %9368 = vst [vmem:[#allocation51_spill] sm:$0xff] %v8393_v54 }
 0x356   : > { %9369 = vst [vmem:[#allocation52_spill] sm:$0xff] %v8395_v55  ;;  %v1338_v56 = vpop.f32.mrb[60].mxu0  ;;  %1755 = vmatprep.mubr.bf16.mxu1 %v8395_v55 }
 0x357   : > { %v1340_v58 = vpop.f32.mrb[61].mxu0  ;;  %1756 = vmatmul.mubr.bf16.gmra.mrb[56].mxu1 %v8393_v54  ;;  %v1339_v61 = vadd.f32 %v1338_v56, %v8244_v7 }
 0x358   : > { %v1342_v60 = vpop.f32.mrb[62].mxu0  ;;  %v1341_v8 = vadd.f32 %v1340_v58, %v8247_v9 }
 0x359   : > { %v1343_v3 = vadd.f32 %v1342_v60, %v8244_v7  ;;  %v1344_v5 = vpop.f32.mrb[63].mxu0  ;;  %v8416_v7 = vrot.slane %v1411_v13, %v8241_v6 }
 0x35a   : > { %v1345_v10 = vadd.f32 %v1344_v5, %v8247_v9 }
 0x35b   : > { %v8403_v11 = vpack.c.bf16 %v1343_v3, %v1339_v61 }
 0x35c   : > { %v8405_v12 = vpack.c.bf16 %v1345_v10, %v1341_v8 }
 0x35d   : > { %9370 = vst [vmem:[#allocation53_spill] sm:$0xff] %v8403_v11 }
 0x35e   : > { %9371 = vst [vmem:[#allocation54_spill] sm:$0xff] %v8405_v12  ;;  %1765 = vmatprep.mubr.bf16.mxu1 %v8405_v12 }
 0x35f   : > { %1766 = vmatmul.mubr.bf16.gmra.mrb[60].mxu1 %v8403_v11 }
 0x3ba   : > { %v1617_v17 = vpop.f32.mrb[0].mxu1 }
 0x3bb   : > { %v1618_v9 = vadd.f32 %v1617_v17, %v8413_v14  ;;  %v1619_v24 = vpop.f32.mrb[1].mxu1 }
 0x3bc   : > { %v1620_v25 = vadd.f32 %v1619_v24, %v8416_v7  ;;  %v1621_v26 = vpop.f32.mrb[2].mxu1 }
 0x3bd   : > { %v1622_v27 = vadd.f32 %v1621_v26, %v8413_v14  ;;  %v1623_v28 = vpop.f32.mrb[3].mxu1  ;;  %v1776_v32 = vmax.f32 %v1618_v9, 0.0 }
 0x3be   : > { %v1624_v31 = vadd.f32 %v1623_v28, %v8416_v7  ;;  %v1777_v40 = vmax.f32 %v1620_v25, 0.0 }
 0x3bf   : > { %v1778_v33 = vmax.f32 %v1622_v27, 0.0 }
 0x3c0   : > { %v1779_v41 = vmax.f32 %v1624_v31, 0.0 }
 0x3c1   : > { %v1840_v42 = vpack.c.bf16 %v1778_v33, %v1776_v32 }
 0x3c2   : > { %v1841_v45 = vpack.c.bf16 %v1779_v41, %v1777_v40  ;;  %v1627_v46 = vpop.f32.mrb[4].mxu1 }
 0x3c3   : > { %v1628_v47 = vadd.f32 %v1627_v46, %v8413_v14  ;;  %v1629_v48 = vpop.f32.mrb[5].mxu1 }
 0x3c4   : > { %v1630_v50 = vadd.f32 %v1629_v48, %v8416_v7  ;;  %v1631_v56 = vpop.f32.mrb[6].mxu1  ;;  %2108 = vmatprep.mubr.bf16.mxu0 %v1841_v45 }
 0x3c5   : > { %v1632_v58 = vadd.f32 %v1631_v56, %v8413_v14  ;;  %v1633_v60 = vpop.f32.mrb[7].mxu1  ;;  %2109 = vmatmul.mubr.bf16.vlgmr.msra.gmra.mrb[64].mxu0 %v1840_v42  ;;  %v1780_v3 = vmax.f32 %v1628_v47, 0.0 }
 0x3c6   : > { %v1634_v61 = vadd.f32 %v1633_v60, %v8416_v7  ;;  %v1781_v8 = vmax.f32 %v1630_v50, 0.0 }
 0x3c7   : > { %v1782_v5 = vmax.f32 %v1632_v58, 0.0 }
 0x3c8   : > { %v1783_v10 = vmax.f32 %v1634_v61, 0.0 }
 0x3c9   : > { %v1842_v13 = vpack.c.bf16 %v1782_v5, %v1780_v3 }
 0x3ca   : > { %v1843_v17 = vpack.c.bf16 %v1783_v10, %v1781_v8  ;;  %v1637_v9 = vpop.f32.mrb[8].mxu1 }
 0x3cb   : > { %v1638_v24 = vadd.f32 %v1637_v9, %v8413_v14  ;;  %v1639_v25 = vpop.f32.mrb[9].mxu1 }
 0x3cc   : > { %v1640_v26 = vadd.f32 %v1639_v25, %v8416_v7  ;;  %v1641_v27 = vpop.f32.mrb[10].mxu1  ;;  %2118 = vmatprep.mubr.bf16.mxu0 %v1843_v17 }
 0x3cd   : > { %v1642_v28 = vadd.f32 %v1641_v27, %v8413_v14  ;;  %v1643_v31 = vpop.f32.mrb[11].mxu1  ;;  %2119 = vmatmul.mubr.bf16.gmra.mrb[68].mxu0 %v1842_v13  ;;  %v1784_v33 = vmax.f32 %v1638_v24, 0.0 }
 0x3ce   : > { %v1644_v32 = vadd.f32 %v1643_v31, %v8416_v7  ;;  %v1785_v41 = vmax.f32 %v1640_v26, 0.0 }
 0x3cf   : > { %v1786_v40 = vmax.f32 %v1642_v28, 0.0 }
 0x3d0   : > { %v1787_v42 = vmax.f32 %v1644_v32, 0.0 }
 0x3d1   : > { %v1844_v45 = vpack.c.bf16 %v1786_v40, %v1784_v33 }
 0x3d2   : > { %v1845_v46 = vpack.c.bf16 %v1787_v42, %v1785_v41  ;;  %v1647_v47 = vpop.f32.mrb[12].mxu1 }
 0x3d3   : > { %v1648_v48 = vadd.f32 %v1647_v47, %v8413_v14  ;;  %v1649_v50 = vpop.f32.mrb[13].mxu1 }
 0x3d4   : > { %v1650_v56 = vadd.f32 %v1649_v50, %v8416_v7  ;;  %v1651_v58 = vpop.f32.mrb[14].mxu1  ;;  %2128 = vmatprep.mubr.bf16.mxu0 %v1845_v46 }
 0x3d5   : > { %v1652_v60 = vadd.f32 %v1651_v58, %v8413_v14  ;;  %v1653_v61 = vpop.f32.mrb[15].mxu1  ;;  %2129 = vmatmul.mubr.bf16.gmra.mrb[72].mxu0 %v1844_v45  ;;  %v1788_v5 = vmax.f32 %v1648_v48, 0.0 }
 0x3d6   : > { %v1654_v3 = vadd.f32 %v1653_v61, %v8416_v7  ;;  %v1789_v10 = vmax.f32 %v1650_v56, 0.0 }
 0x3d7   : > { %v1790_v8 = vmax.f32 %v1652_v60, 0.0 }
 0x3d8   : > { %v1791_v13 = vmax.f32 %v1654_v3, 0.0 }
 0x3d9   : > { %v1846_v17 = vpack.c.bf16 %v1790_v8, %v1788_v5 }
 0x3da   : > { %v1847_v9 = vpack.c.bf16 %v1791_v13, %v1789_v10  ;;  %v1657_v24 = vpop.f32.mrb[16].mxu1 }
 0x3db   : > { %v1658_v25 = vadd.f32 %v1657_v24, %v8413_v14  ;;  %v1659_v26 = vpop.f32.mrb[17].mxu1 }
 0x3dc   : > { %v1660_v27 = vadd.f32 %v1659_v26, %v8416_v7  ;;  %v1661_v28 = vpop.f32.mrb[18].mxu1  ;;  %2138 = vmatprep.mubr.bf16.mxu0 %v1847_v9 }
 0x3dd   : > { %v1662_v31 = vadd.f32 %v1661_v28, %v8413_v14  ;;  %v1663_v32 = vpop.f32.mrb[19].mxu1  ;;  %2139 = vmatmul.mubr.bf16.gmra.mrb[76].mxu0 %v1846_v17  ;;  %v1792_v40 = vmax.f32 %v1658_v25, 0.0 }
 0x3de   : > { %v1664_v33 = vadd.f32 %v1663_v32, %v8416_v7  ;;  %v1793_v42 = vmax.f32 %v1660_v27, 0.0 }
 0x3df   : > { %v1794_v41 = vmax.f32 %v1662_v31, 0.0 }
 0x3e0   : > { %v1795_v45 = vmax.f32 %v1664_v33, 0.0 }
 0x3e1   : > { %v1848_v46 = vpack.c.bf16 %v1794_v41, %v1792_v40 }
 0x3e2   : > { %v1849_v47 = vpack.c.bf16 %v1795_v45, %v1793_v42  ;;  %v1667_v48 = vpop.f32.mrb[20].mxu1 }
 0x3e3   : > { %v1668_v50 = vadd.f32 %v1667_v48, %v8413_v14  ;;  %v1669_v56 = vpop.f32.mrb[21].mxu1 }
 0x3e4   : > { %v1670_v58 = vadd.f32 %v1669_v56, %v8416_v7  ;;  %v1671_v60 = vpop.f32.mrb[22].mxu1  ;;  %2148 = vmatprep.mubr.bf16.mxu0 %v1849_v47 }
 0x3e5   : > { %v1672_v61 = vadd.f32 %v1671_v60, %v8413_v14  ;;  %v1673_v3 = vpop.f32.mrb[23].mxu1  ;;  %2149 = vmatmul.mubr.bf16.gmra.mrb[80].mxu0 %v1848_v46  ;;  %v1796_v8 = vmax.f32 %v1668_v50, 0.0 }
 0x3e6   : > { %v1674_v5 = vadd.f32 %v1673_v3, %v8416_v7  ;;  %v1797_v13 = vmax.f32 %v1670_v58, 0.0 }
 0x3e7   : > { %v1798_v10 = vmax.f32 %v1672_v61, 0.0 }
 0x3e8   : > { %v1799_v17 = vmax.f32 %v1674_v5, 0.0 }
 0x3e9   : > { %v1850_v9 = vpack.c.bf16 %v1798_v10, %v1796_v8 }
 0x3ea   : > { %v1851_v24 = vpack.c.bf16 %v1799_v17, %v1797_v13  ;;  %v1677_v25 = vpop.f32.mrb[24].mxu1 }
 0x3eb   : > { %v1678_v26 = vadd.f32 %v1677_v25, %v8413_v14  ;;  %v1679_v27 = vpop.f32.mrb[25].mxu1 }
 0x3ec   : > { %v1680_v28 = vadd.f32 %v1679_v27, %v8416_v7  ;;  %v1681_v31 = vpop.f32.mrb[26].mxu1  ;;  %2158 = vmatprep.mubr.bf16.mxu0 %v1851_v24 }
 0x3ed   : > { %v1682_v32 = vadd.f32 %v1681_v31, %v8413_v14  ;;  %v1683_v33 = vpop.f32.mrb[27].mxu1  ;;  %2159 = vmatmul.mubr.bf16.gmra.mrb[84].mxu0 %v1850_v9  ;;  %v1800_v41 = vmax.f32 %v1678_v26, 0.0 }
 0x3ee   : > { %v1684_v40 = vadd.f32 %v1683_v33, %v8416_v7  ;;  %v1801_v45 = vmax.f32 %v1680_v28, 0.0 }
 0x3ef   : > { %v1802_v42 = vmax.f32 %v1682_v32, 0.0 }
 0x3f0   : > { %v1803_v46 = vmax.f32 %v1684_v40, 0.0 }
 0x3f1   : > { %v1852_v47 = vpack.c.bf16 %v1802_v42, %v1800_v41 }
 0x3f2   : > { %v1853_v48 = vpack.c.bf16 %v1803_v46, %v1801_v45  ;;  %v1687_v50 = vpop.f32.mrb[28].mxu1 }
 0x3f3   : > { %v1688_v56 = vadd.f32 %v1687_v50, %v8413_v14  ;;  %v1689_v58 = vpop.f32.mrb[29].mxu1 }
 0x3f4   : > { %v1690_v60 = vadd.f32 %v1689_v58, %v8416_v7  ;;  %v1691_v61 = vpop.f32.mrb[30].mxu1  ;;  %2168 = vmatprep.mubr.bf16.mxu0 %v1853_v48 }
 0x3f5   : > { %v1692_v3 = vadd.f32 %v1691_v61, %v8413_v14  ;;  %v1693_v5 = vpop.f32.mrb[31].mxu1  ;;  %2169 = vmatmul.mubr.bf16.gmra.mrb[88].mxu0 %v1852_v47  ;;  %v1804_v10 = vmax.f32 %v1688_v56, 0.0 }
 0x3f6   : > { %v1694_v8 = vadd.f32 %v1693_v5, %v8416_v7  ;;  %v1805_v17 = vmax.f32 %v1690_v60, 0.0 }
 0x3f7   : > { %v1806_v13 = vmax.f32 %v1692_v3, 0.0 }
 0x3f8   : > { %v1807_v9 = vmax.f32 %v1694_v8, 0.0 }
 0x3f9   : > { %v1854_v24 = vpack.c.bf16 %v1806_v13, %v1804_v10 }
 0x3fa   : > { %v1855_v25 = vpack.c.bf16 %v1807_v9, %v1805_v17  ;;  %v1697_v26 = vpop.f32.mrb[32].mxu1 }
 0x3fb   : > { %v1698_v27 = vadd.f32 %v1697_v26, %v8413_v14  ;;  %v1699_v28 = vpop.f32.mrb[33].mxu1 }
 0x3fc   : > { %v1700_v31 = vadd.f32 %v1699_v28, %v8416_v7  ;;  %v1701_v32 = vpop.f32.mrb[34].mxu1  ;;  %2178 = vmatprep.mubr.bf16.mxu0 %v1855_v25 }
 0x3fd   : > { %v1702_v33 = vadd.f32 %v1701_v32, %v8413_v14  ;;  %v1703_v40 = vpop.f32.mrb[35].mxu1  ;;  %2179 = vmatmul.mubr.bf16.gmra.mrb[92].mxu0 %v1854_v24  ;;  %v1808_v42 = vmax.f32 %v1698_v27, 0.0 }
 0x3fe   : > { %v1704_v41 = vadd.f32 %v1703_v40, %v8416_v7  ;;  %v1809_v46 = vmax.f32 %v1700_v31, 0.0 }
 0x3ff   : > { %v1810_v45 = vmax.f32 %v1702_v33, 0.0 }
 0x400   : > { %v1811_v47 = vmax.f32 %v1704_v41, 0.0 }
 0x401   : > { %v1856_v48 = vpack.c.bf16 %v1810_v45, %v1808_v42 }
 0x402   : > { %v1857_v50 = vpack.c.bf16 %v1811_v47, %v1809_v46  ;;  %v1707_v56 = vpop.f32.mrb[36].mxu1 }
 0x403   : > { %v1708_v58 = vadd.f32 %v1707_v56, %v8413_v14  ;;  %v1709_v60 = vpop.f32.mrb[37].mxu1 }
 0x404   : > { %v1710_v61 = vadd.f32 %v1709_v60, %v8416_v7  ;;  %v1711_v3 = vpop.f32.mrb[38].mxu1  ;;  %2188 = vmatprep.mubr.bf16.mxu0 %v1857_v50 }
 0x405   : > { %v1712_v5 = vadd.f32 %v1711_v3, %v8413_v14  ;;  %v1713_v8 = vpop.f32.mrb[39].mxu1  ;;  %2189 = vmatmul.mubr.bf16.gmra.mrb[96].mxu0 %v1856_v48  ;;  %v1812_v13 = vmax.f32 %v1708_v58, 0.0 }
 0x406   : > { %v1714_v10 = vadd.f32 %v1713_v8, %v8416_v7  ;;  %v1813_v9 = vmax.f32 %v1710_v61, 0.0 }
 0x407   : > { %v1814_v17 = vmax.f32 %v1712_v5, 0.0 }
 0x408   : > { %v1815_v24 = vmax.f32 %v1714_v10, 0.0 }
 0x409   : > { %v1858_v25 = vpack.c.bf16 %v1814_v17, %v1812_v13 }
 0x40a   : > { %v1859_v26 = vpack.c.bf16 %v1815_v24, %v1813_v9  ;;  %v1717_v27 = vpop.f32.mrb[40].mxu1 }
 0x40b   : > { %v1718_v28 = vadd.f32 %v1717_v27, %v8413_v14  ;;  %v1719_v31 = vpop.f32.mrb[41].mxu1 }
 0x40c   : > { %v1720_v32 = vadd.f32 %v1719_v31, %v8416_v7  ;;  %v1721_v33 = vpop.f32.mrb[42].mxu1  ;;  %2198 = vmatprep.mubr.bf16.mxu0 %v1859_v26 }
 0x40d   : > { %v1722_v40 = vadd.f32 %v1721_v33, %v8413_v14  ;;  %v1723_v41 = vpop.f32.mrb[43].mxu1  ;;  %2199 = vmatmul.mubr.bf16.gmra.mrb[100].mxu0 %v1858_v25  ;;  %v1816_v45 = vmax.f32 %v1718_v28, 0.0 }
 0x40e   : > { %v1724_v42 = vadd.f32 %v1723_v41, %v8416_v7  ;;  %v1817_v47 = vmax.f32 %v1720_v32, 0.0 }
 0x40f   : > { %v1818_v46 = vmax.f32 %v1722_v40, 0.0 }
 0x410   : > { %v1819_v48 = vmax.f32 %v1724_v42, 0.0 }
 0x411   : > { %v1860_v50 = vpack.c.bf16 %v1818_v46, %v1816_v45 }
 0x412   : > { %v1861_v56 = vpack.c.bf16 %v1819_v48, %v1817_v47  ;;  %v1727_v58 = vpop.f32.mrb[44].mxu1 }
 0x413   : > { %v1728_v60 = vadd.f32 %v1727_v58, %v8413_v14  ;;  %v1729_v61 = vpop.f32.mrb[45].mxu1 }
 0x414   : > { %v1730_v3 = vadd.f32 %v1729_v61, %v8416_v7  ;;  %v1731_v5 = vpop.f32.mrb[46].mxu1  ;;  %2208 = vmatprep.mubr.bf16.mxu0 %v1861_v56 }
 0x415   : > { %v1732_v8 = vadd.f32 %v1731_v5, %v8413_v14  ;;  %v1733_v10 = vpop.f32.mrb[47].mxu1  ;;  %2209 = vmatmul.mubr.bf16.gmra.mrb[104].mxu0 %v1860_v50  ;;  %v1820_v17 = vmax.f32 %v1728_v60, 0.0 }
 0x416   : > { %v1734_v13 = vadd.f32 %v1733_v10, %v8416_v7  ;;  %v1821_v24 = vmax.f32 %v1730_v3, 0.0 }
 0x417   : > { %v1822_v9 = vmax.f32 %v1732_v8, 0.0 }
 0x418   : > { %v1823_v25 = vmax.f32 %v1734_v13, 0.0 }
 0x419   : > { %v1862_v26 = vpack.c.bf16 %v1822_v9, %v1820_v17 }
 0x41a   : > { %v1863_v27 = vpack.c.bf16 %v1823_v25, %v1821_v24  ;;  %v1737_v28 = vpop.f32.mrb[48].mxu1 }
 0x41b   : > { %v1738_v31 = vadd.f32 %v1737_v28, %v8413_v14  ;;  %v1739_v32 = vpop.f32.mrb[49].mxu1 }
 0x41c   : > { %v1740_v33 = vadd.f32 %v1739_v32, %v8416_v7  ;;  %v1741_v40 = vpop.f32.mrb[50].mxu1  ;;  %2218 = vmatprep.mubr.bf16.mxu0 %v1863_v27 }
 0x41d   : > { %v1742_v41 = vadd.f32 %v1741_v40, %v8413_v14  ;;  %v1743_v42 = vpop.f32.mrb[51].mxu1  ;;  %2219 = vmatmul.mubr.bf16.gmra.mrb[108].mxu0 %v1862_v26  ;;  %v1824_v46 = vmax.f32 %v1738_v31, 0.0 }
 0x41e   : > { %v1744_v45 = vadd.f32 %v1743_v42, %v8416_v7  ;;  %v1825_v48 = vmax.f32 %v1740_v33, 0.0 }
 0x41f   : > { %v1826_v47 = vmax.f32 %v1742_v41, 0.0 }
 0x420   : > { %v1827_v50 = vmax.f32 %v1744_v45, 0.0 }
 0x421   : > { %v1864_v56 = vpack.c.bf16 %v1826_v47, %v1824_v46 }
 0x422   : > { %v1865_v58 = vpack.c.bf16 %v1827_v50, %v1825_v48  ;;  %v1747_v60 = vpop.f32.mrb[52].mxu1 }
 0x423   : > { %v1748_v61 = vadd.f32 %v1747_v60, %v8413_v14  ;;  %v1749_v3 = vpop.f32.mrb[53].mxu1 }
 0x424   : > { %v1750_v5 = vadd.f32 %v1749_v3, %v8416_v7  ;;  %v1751_v8 = vpop.f32.mrb[54].mxu1  ;;  %2228 = vmatprep.mubr.bf16.mxu0 %v1865_v58 }
 0x425   : > { %v1752_v10 = vadd.f32 %v1751_v8, %v8413_v14  ;;  %v1753_v13 = vpop.f32.mrb[55].mxu1  ;;  %2229 = vmatmul.mubr.bf16.gmra.mrb[112].mxu0 %v1864_v56  ;;  %v1828_v9 = vmax.f32 %v1748_v61, 0.0 }
 0x426   : > { %v1754_v17 = vadd.f32 %v1753_v13, %v8416_v7  ;;  %v1829_v25 = vmax.f32 %v1750_v5, 0.0 }
 0x427   : > { %v1830_v24 = vmax.f32 %v1752_v10, 0.0 }
 0x428   : > { %v1831_v26 = vmax.f32 %v1754_v17, 0.0 }
 0x429   : > { %v1866_v27 = vpack.c.bf16 %v1830_v24, %v1828_v9 }
 0x42a   : > { %v1867_v28 = vpack.c.bf16 %v1831_v26, %v1829_v25  ;;  %v1757_v31 = vpop.f32.mrb[56].mxu1 }
 0x42b   : > { %v1758_v32 = vadd.f32 %v1757_v31, %v8413_v14  ;;  %v1759_v33 = vpop.f32.mrb[57].mxu1 }
 0x42c   : > { %v1760_v40 = vadd.f32 %v1759_v33, %v8416_v7  ;;  %v1761_v41 = vpop.f32.mrb[58].mxu1  ;;  %2238 = vmatprep.mubr.bf16.mxu0 %v1867_v28 }
 0x42d   : > { %v1762_v42 = vadd.f32 %v1761_v41, %v8413_v14  ;;  %v1763_v45 = vpop.f32.mrb[59].mxu1  ;;  %2239 = vmatmul.mubr.bf16.gmra.mrb[116].mxu0 %v1866_v27  ;;  %v1832_v47 = vmax.f32 %v1758_v32, 0.0  ;;  %v1904_v32 = vld [vmem:[%s9373_s0] sm:$0x3]  ;;  %s915_s0 = scalar_lea.vmem [#allocation26], %s5916_s13 }
 0x42e   : > { %v1764_v46 = vadd.f32 %v1763_v45, %v8416_v7  ;;  %v1833_v50 = vmax.f32 %v1760_v40, 0.0  ;;  %v8486_v33 = vrot.slane %v1904_v32, %v8236_v4  ;;  %s5670_s21 = sshll.u32 %s915_s0, 4  ;;  %s9173_s21 = int_to_ptr.vmem [resolvable:$true] %s5670_s21 }
 0x42f   : > { %v1834_v48 = vmax.f32 %v1762_v42, 0.0 }
 0x430   : > { %v1835_v56 = vmax.f32 %v1764_v46, 0.0 }
 0x431   : > { %v1868_v58 = vpack.c.bf16 %v1834_v48, %v1832_v47 }
 0x432   : > { %v1869_v60 = vpack.c.bf16 %v1835_v56, %v1833_v50  ;;  %v1767_v61 = vpop.f32.mrb[60].mxu1 }
 0x433   : > { %v1768_v3 = vadd.f32 %v1767_v61, %v8413_v14  ;;  %v1769_v5 = vpop.f32.mrb[61].mxu1 }
 0x434   : > { %v1770_v8 = vadd.f32 %v1769_v5, %v8416_v7  ;;  %v1771_v10 = vpop.f32.mrb[62].mxu1  ;;  %2248 = vmatprep.mubr.bf16.mxu0 %v1869_v60 }
 0x435   : > { %v1772_v13 = vadd.f32 %v1771_v10, %v8413_v14  ;;  %v1773_v17 = vpop.f32.mrb[63].mxu1  ;;  %2249 = vmatmul.mubr.bf16.gmra.mrb[120].mxu0 %v1868_v58  ;;  %v1836_v24 = vmax.f32 %v1768_v3, 0.0  ;;  %v8489_v14 = vrot.slane %v1904_v32, %v8241_v6 }
 0x436   : > { %v1774_v9 = vadd.f32 %v1773_v17, %v8416_v7  ;;  %v1837_v26 = vmax.f32 %v1770_v8, 0.0 }
 0x437   : > { %v1838_v25 = vmax.f32 %v1772_v13, 0.0 }
 0x438   : > { %v1839_v27 = vmax.f32 %v1774_v9, 0.0 }
 0x439   : > { %v1870_v28 = vpack.c.bf16 %v1838_v25, %v1836_v24 }
 0x43a   : > { %v1871_v31 = vpack.c.bf16 %v1839_v27, %v1837_v26 }
 0x43c   : > { %2258 = vmatprep.mubr.bf16.mxu0 %v1871_v31 }
 0x43d   : > { %2259 = vmatmul.mubr.bf16.gmra.mrb[124].mxu0 %v1870_v28 }
 0x498   : > { %v2110_v40 = vpop.f32.mrb[64].mxu0 }
 0x499   : > { %v2111_v7 = vadd.f32 %v2110_v40, %v8486_v33  ;;  %v2112_v41 = vpop.f32.mrb[65].mxu0 }
 0x49a   : > { %v2113_v42 = vadd.f32 %v2112_v41, %v8489_v14  ;;  %v2114_v45 = vpop.f32.mrb[66].mxu0 }
 0x49b   : > { %v2115_v46 = vadd.f32 %v2114_v45, %v8486_v33  ;;  %v2116_v47 = vpop.f32.mrb[67].mxu0  ;;  %v2269_v50 = vmax.f32 %v2111_v7, 0.0 }
 0x49c   : > { %v2117_v48 = vadd.f32 %v2116_v47, %v8489_v14  ;;  %v2270_v58 = vmax.f32 %v2113_v42, 0.0 }
 0x49d   : > { %v2271_v56 = vmax.f32 %v2115_v46, 0.0 }
 0x49e   : > { %v2272_v60 = vmax.f32 %v2117_v48, 0.0 }
 0x49f   : > { %v8495_v61 = vpack.c.bf16 %v2271_v56, %v2269_v50 }
 0x4a0   : > { %v2334_v3 = vpack.c.bf16 %v2272_v60, %v2270_v58  ;;  %v2120_v5 = vpop.f32.mrb[68].mxu0 }
 0x4a1   : > { %v2121_v8 = vadd.f32 %v2120_v5, %v8486_v33  ;;  %v2122_v10 = vpop.f32.mrb[69].mxu0 }
 0x4a2   : > { %v2123_v13 = vadd.f32 %v2122_v10, %v8489_v14  ;;  %v2124_v17 = vpop.f32.mrb[70].mxu0  ;;  %2413 = vmatprep.mubr.bf16.mxu1 %v2334_v3  ;;  %2759 = vmatprep.subr.bf16.mxu0 %v2334_v3 }
 0x4a3   : > { %v2125_v9 = vadd.f32 %v2124_v17, %v8486_v33  ;;  %v2126_v24 = vpop.f32.mrb[71].mxu0  ;;  %2760 = vmatpush1.bf16.xpose.msra.mxu0 %v8495_v61  ;;  %v2273_v26 = vmax.f32 %v2121_v8, 0.0 }
 0x4a4   : > { %v2127_v25 = vadd.f32 %v2126_v24, %v8489_v14  ;;  %v2274_v28 = vmax.f32 %v2123_v13, 0.0 }
 0x4a5   : > { %v2275_v27 = vmax.f32 %v2125_v9, 0.0 }
 0x4a6   : > { %v2276_v31 = vmax.f32 %v2127_v25, 0.0 }
 0x4a7   : > { %v8502_v32 = vpack.c.bf16 %v2275_v27, %v2273_v26 }
 0x4a8   : > { %v8504_v40 = vpack.c.bf16 %v2276_v31, %v2274_v28  ;;  %v2130_v7 = vpop.f32.mrb[72].mxu0 }
 0x4a9   : > { %v2131_v41 = vadd.f32 %v2130_v7, %v8486_v33  ;;  %v2132_v42 = vpop.f32.mrb[73].mxu0 }
 0x4aa   : > { %v2133_v45 = vadd.f32 %v2132_v42, %v8489_v14  ;;  %v2134_v46 = vpop.f32.mrb[74].mxu0  ;;  %2761 = vmatprep.subr.bf16.mxu0 %v8504_v40 }
 0x4ab   : > { %v2135_v47 = vadd.f32 %v2134_v46, %v8486_v33  ;;  %v2136_v48 = vpop.f32.mrb[75].mxu0  ;;  %2762 = vmatpush1.bf16.xpose.msra.mxu0 %v8502_v32  ;;  %v2277_v56 = vmax.f32 %v2131_v41, 0.0 }
 0x4ac   : > { %v2137_v50 = vadd.f32 %v2136_v48, %v8489_v14  ;;  %v2278_v60 = vmax.f32 %v2133_v45, 0.0 }
 0x4ad   : > { %v2279_v58 = vmax.f32 %v2135_v47, 0.0 }
 0x4ae   : > { %v2280_v3 = vmax.f32 %v2137_v50, 0.0 }
 0x4af   : > { %v8512_v5 = vpack.c.bf16 %v2279_v58, %v2277_v56 }
 0x4b0   : > { %v8514_v8 = vpack.c.bf16 %v2280_v3, %v2278_v60  ;;  %v2140_v10 = vpop.f32.mrb[76].mxu0 }
 0x4b1   : > { %v2141_v13 = vadd.f32 %v2140_v10, %v8486_v33  ;;  %v2142_v17 = vpop.f32.mrb[77].mxu0 }
 0x4b2   : > { %v2143_v9 = vadd.f32 %v2142_v17, %v8489_v14  ;;  %v2144_v24 = vpop.f32.mrb[78].mxu0  ;;  %2763 = vmatprep.subr.bf16.mxu0 %v8514_v8 }
 0x4b3   : > { %v2145_v25 = vadd.f32 %v2144_v24, %v8486_v33  ;;  %v2146_v26 = vpop.f32.mrb[79].mxu0  ;;  %2764 = vmatpush1.bf16.xpose.msra.mxu0 %v8512_v5  ;;  %v2281_v28 = vmax.f32 %v2141_v13, 0.0 }
 0x4b4   : > { %v2147_v27 = vadd.f32 %v2146_v26, %v8489_v14  ;;  %v2282_v7 = vmax.f32 %v2143_v9, 0.0 }
 0x4b5   : > { %v2283_v31 = vmax.f32 %v2145_v25, 0.0 }
 0x4b6   : > { %v2284_v41 = vmax.f32 %v2147_v27, 0.0 }
 0x4b7   : > { %v8522_v42 = vpack.c.bf16 %v2283_v31, %v2281_v28 }
 0x4b8   : > { %v8524_v45 = vpack.c.bf16 %v2284_v41, %v2282_v7  ;;  %v2150_v46 = vpop.f32.mrb[80].mxu0 }
 0x4b9   : > { %v2151_v47 = vadd.f32 %v2150_v46, %v8486_v33  ;;  %v2152_v48 = vpop.f32.mrb[81].mxu0 }
 0x4ba   : > { %v2153_v50 = vadd.f32 %v2152_v48, %v8489_v14  ;;  %v2154_v56 = vpop.f32.mrb[82].mxu0  ;;  %2765 = vmatprep.subr.bf16.mxu0 %v8524_v45 }
 0x4bb   : > { %v2155_v58 = vadd.f32 %v2154_v56, %v8486_v33  ;;  %v2156_v60 = vpop.f32.mrb[83].mxu0  ;;  %2766 = vmatpush1.bf16.xpose.msra.mxu0 %v8522_v42  ;;  %v2285_v10 = vmax.f32 %v2151_v47, 0.0 }
 0x4bc   : > { %v2157_v3 = vadd.f32 %v2156_v60, %v8489_v14  ;;  %v2286_v17 = vmax.f32 %v2153_v50, 0.0 }
 0x4bd   : > { %v2287_v13 = vmax.f32 %v2155_v58, 0.0 }
 0x4be   : > { %v2288_v9 = vmax.f32 %v2157_v3, 0.0 }
 0x4bf   : > { %v8532_v24 = vpack.c.bf16 %v2287_v13, %v2285_v10 }
 0x4c0   : > { %v8534_v25 = vpack.c.bf16 %v2288_v9, %v2286_v17  ;;  %v2160_v26 = vpop.f32.mrb[84].mxu0 }
 0x4c1   : > { %v2161_v27 = vadd.f32 %v2160_v26, %v8486_v33  ;;  %v2162_v28 = vpop.f32.mrb[85].mxu0 }
 0x4c2   : > { %v2163_v31 = vadd.f32 %v2162_v28, %v8489_v14  ;;  %v2164_v7 = vpop.f32.mrb[86].mxu0  ;;  %2767 = vmatprep.subr.bf16.mxu0 %v8534_v25 }
 0x4c3   : > { %v2165_v41 = vadd.f32 %v2164_v7, %v8486_v33  ;;  %v2166_v46 = vpop.f32.mrb[87].mxu0  ;;  %2768 = vmatpush1.bf16.xpose.msra.mxu0 %v8532_v24  ;;  %v2289_v48 = vmax.f32 %v2161_v27, 0.0 }
 0x4c4   : > { %v2167_v47 = vadd.f32 %v2166_v46, %v8489_v14  ;;  %v2290_v56 = vmax.f32 %v2163_v31, 0.0 }
 0x4c5   : > { %v2291_v50 = vmax.f32 %v2165_v41, 0.0 }
 0x4c6   : > { %v2292_v58 = vmax.f32 %v2167_v47, 0.0 }
 0x4c7   : > { %v8542_v60 = vpack.c.bf16 %v2291_v50, %v2289_v48 }
 0x4c8   : > { %v8544_v3 = vpack.c.bf16 %v2292_v58, %v2290_v56  ;;  %v2170_v10 = vpop.f32.mrb[88].mxu0 }
 0x4c9   : > { %v2171_v13 = vadd.f32 %v2170_v10, %v8486_v33  ;;  %v2172_v17 = vpop.f32.mrb[89].mxu0 }
 0x4ca   : > { %v2173_v9 = vadd.f32 %v2172_v17, %v8489_v14  ;;  %v2174_v26 = vpop.f32.mrb[90].mxu0  ;;  %2769 = vmatprep.subr.bf16.mxu0 %v8544_v3 }
 0x4cb   : > { %v2175_v28 = vadd.f32 %v2174_v26, %v8486_v33  ;;  %v2176_v7 = vpop.f32.mrb[91].mxu0  ;;  %2770 = vmatpush1.bf16.xpose.msra.mxu0 %v8542_v60  ;;  %v2293_v31 = vmax.f32 %v2171_v13, 0.0 }
 0x4cc   : > { %v2177_v27 = vadd.f32 %v2176_v7, %v8489_v14  ;;  %v2294_v46 = vmax.f32 %v2173_v9, 0.0 }
 0x4cd   : > { %v2295_v41 = vmax.f32 %v2175_v28, 0.0 }
 0x4ce   : > { %v2296_v47 = vmax.f32 %v2177_v27, 0.0 }
 0x4cf   : > { %v8552_v48 = vpack.c.bf16 %v2295_v41, %v2293_v31 }
 0x4d0   : > { %v8554_v50 = vpack.c.bf16 %v2296_v47, %v2294_v46  ;;  %v2180_v56 = vpop.f32.mrb[92].mxu0 }
 0x4d1   : > { %v2181_v58 = vadd.f32 %v2180_v56, %v8486_v33  ;;  %v2182_v10 = vpop.f32.mrb[93].mxu0 }
 0x4d2   : > { %v2183_v17 = vadd.f32 %v2182_v10, %v8489_v14  ;;  %v2184_v26 = vpop.f32.mrb[94].mxu0  ;;  %2771 = vmatprep.subr.bf16.mxu0 %v8554_v50 }
 0x4d3   : > { %v2185_v0 = vadd.f32 %v2184_v26, %v8486_v33  ;;  %v2186_v7 = vpop.f32.mrb[95].mxu0  ;;  %2772 = vmatpush1.bf16.xpose.msra.mxu0 %v8552_v48  ;;  %v2297_v9 = vmax.f32 %v2181_v58, 0.0 }
 0x4d4   : > { %v2187_v13 = vadd.f32 %v2186_v7, %v8489_v14  ;;  %v2298_v27 = vmax.f32 %v2183_v17, 0.0 }
 0x4d5   : > { %v2299_v28 = vmax.f32 %v2185_v0, 0.0 }
 0x4d6   : > { %v2300_v31 = vmax.f32 %v2187_v13, 0.0 }
 0x4d7   : > { %v8562_v41 = vpack.c.bf16 %v2299_v28, %v2297_v9 }
 0x4d8   : > { %v8564_v46 = vpack.c.bf16 %v2300_v31, %v2298_v27  ;;  %v2190_v47 = vpop.f32.mrb[96].mxu0 }
 0x4d9   : > { %v2191_v56 = vadd.f32 %v2190_v47, %v8486_v33  ;;  %v2192_v10 = vpop.f32.mrb[97].mxu0 }
 0x4da   : > { %v2193_v6 = vadd.f32 %v2192_v10, %v8489_v14  ;;  %v2194_v26 = vpop.f32.mrb[98].mxu0  ;;  %2773 = vmatprep.subr.bf16.mxu0 %v8564_v46 }
 0x4db   : > { %v2195_v4 = vadd.f32 %v2194_v26, %v8486_v33  ;;  %v2196_v7 = vpop.f32.mrb[99].mxu0  ;;  %2774 = vmatpush1.bf16.xpose.msra.mxu0 %v8562_v41  ;;  %v2301_v58 = vmax.f32 %v2191_v56, 0.0 }
 0x4dc   : > { %v2197_v0 = vadd.f32 %v2196_v7, %v8489_v14  ;;  %v2302_v13 = vmax.f32 %v2193_v6, 0.0 }
 0x4dd   : > { %v2303_v17 = vmax.f32 %v2195_v4, 0.0 }
 0x4de   : > { %v2304_v9 = vmax.f32 %v2197_v0, 0.0 }
 0x4df   : > { %v2349_v28 = vpack.c.bf16 %v2303_v17, %v2301_v58 }
 0x4e0   : > { %v2350_v27 = vpack.c.bf16 %v2304_v9, %v2302_v13  ;;  %v2200_v31 = vpop.f32.mrb[100].mxu0 }
 0x4e1   : > { %v2201_v47 = vadd.f32 %v2200_v31, %v8486_v33  ;;  %v2202_v10 = vpop.f32.mrb[101].mxu0 }
 0x4e2   : > { %v2203_v62 = vadd.f32 %v2202_v10, %v8489_v14  ;;  %v2204_v1 = vpop.f32.mrb[102].mxu0  ;;  %2381 = vmatprep.subr.bf16.mxu1 %v2350_v27  ;;  %2791 = vmatprep.mubr.bf16.mxu0 %v2350_v27 }
 0x4e3   : > { %v2205_v26 = vadd.f32 %v2204_v1, %v8486_v33  ;;  %v2206_v52 = vpop.f32.mrb[103].mxu0  ;;  %2382 = vmatpush1.bf16.xpose.msra.mxu1 %v2349_v28  ;;  %2792 = vmatmul.mubr.bf16.vlgmr.msra.gmra.mrb[128].mxu0 %v2349_v28  ;;  %v2305_v6 = vmax.f32 %v2201_v47, 0.0 }
 0x4e4   : > { %v2207_v4 = vadd.f32 %v2206_v52, %v8489_v14  ;;  %v2306_v7 = vmax.f32 %v2203_v62, 0.0 }
 0x4e5   : > { %v2307_v56 = vmax.f32 %v2205_v26, 0.0 }
 0x4e6   : > { %v2308_v0 = vmax.f32 %v2207_v4, 0.0 }
 0x4e7   : > { %v2351_v58 = vpack.c.bf16 %v2307_v56, %v2305_v6 }
 0x4e8   : > { %v2352_v17 = vpack.c.bf16 %v2308_v0, %v2306_v7  ;;  %v2210_v13 = vpop.f32.mrb[104].mxu0 }
 0x4e9   : > { %v2211_v9 = vadd.f32 %v2210_v13, %v8486_v33  ;;  %v2212_v31 = vpop.f32.mrb[105].mxu0 }
 0x4ea   : > { %v2213_v10 = vadd.f32 %v2212_v31, %v8489_v14  ;;  %v2214_v27 = vpop.f32.mrb[106].mxu0  ;;  %2383 = vmatprep.subr.bf16.mxu1 %v2352_v17  ;;  %2799 = vmatprep.mubr.bf16.mxu0 %v2352_v17 }
 0x4eb   : > { %v2215_v1 = vadd.f32 %v2214_v27, %v8486_v33  ;;  %v2216_v28 = vpop.f32.mrb[107].mxu0  ;;  %2384 = vmatpush1.bf16.xpose.msra.mxu1 %v2351_v58  ;;  %2800 = vmatmul.mubr.bf16.gmra.mrb[132].mxu0 %v2351_v58  ;;  %v2309_v62 = vmax.f32 %v2211_v9, 0.0 }
 0x4ec   : > { %v2217_v52 = vadd.f32 %v2216_v28, %v8489_v14  ;;  %v2310_v26 = vmax.f32 %v2213_v10, 0.0 }
 0x4ed   : > { %v2311_v47 = vmax.f32 %v2215_v1, 0.0 }
 0x4ee   : > { %v2312_v4 = vmax.f32 %v2217_v52, 0.0 }
 0x4ef   : > { %v2353_v6 = vpack.c.bf16 %v2311_v47, %v2309_v62 }
 0x4f0   : > { %v2354_v56 = vpack.c.bf16 %v2312_v4, %v2310_v26  ;;  %v2220_v7 = vpop.f32.mrb[108].mxu0 }
 0x4f1   : > { %v2221_v0 = vadd.f32 %v2220_v7, %v8486_v33  ;;  %v2222_v13 = vpop.f32.mrb[109].mxu0 }
 0x4f2   : > { %v2223_v31 = vadd.f32 %v2222_v13, %v8489_v14  ;;  %v2224_v17 = vpop.f32.mrb[110].mxu0  ;;  %2385 = vmatprep.subr.bf16.mxu1 %v2354_v56  ;;  %2807 = vmatprep.mubr.bf16.mxu0 %v2354_v56 }
 0x4f3   : > { %v2225_v27 = vadd.f32 %v2224_v17, %v8486_v33  ;;  %v2226_v58 = vpop.f32.mrb[111].mxu0  ;;  %2386 = vmatpush1.bf16.xpose.msra.mxu1 %v2353_v6  ;;  %2808 = vmatmul.mubr.bf16.gmra.mrb[136].mxu0 %v2353_v6  ;;  %v2313_v10 = vmax.f32 %v2221_v0, 0.0 }
 0x4f4   : > { %v2227_v9 = vadd.f32 %v2226_v58, %v8489_v14  ;;  %v2314_v28 = vmax.f32 %v2223_v31, 0.0 }
 0x4f5   : > { %v2315_v1 = vmax.f32 %v2225_v27, 0.0 }
 0x4f6   : > { %v2316_v52 = vmax.f32 %v2227_v9, 0.0 }
 0x4f7   : > { %v2355_v62 = vpack.c.bf16 %v2315_v1, %v2313_v10 }
 0x4f8   : > { %v2356_v47 = vpack.c.bf16 %v2316_v52, %v2314_v28  ;;  %v2230_v26 = vpop.f32.mrb[112].mxu0 }
 0x4f9   : > { %v2231_v4 = vadd.f32 %v2230_v26, %v8486_v33  ;;  %v2232_v7 = vpop.f32.mrb[113].mxu0 }
 0x4fa   : > { %v2233_v13 = vadd.f32 %v2232_v7, %v8489_v14  ;;  %v2234_v56 = vpop.f32.mrb[114].mxu0  ;;  %2387 = vmatprep.subr.bf16.mxu1 %v2356_v47  ;;  %2815 = vmatprep.mubr.bf16.mxu0 %v2356_v47 }
 0x4fb   : > { %v2235_v17 = vadd.f32 %v2234_v56, %v8486_v33  ;;  %v2236_v6 = vpop.f32.mrb[115].mxu0  ;;  %2388 = vmatpush1.bf16.xpose.msra.mxu1 %v2355_v62  ;;  %2816 = vmatmul.mubr.bf16.gmra.mrb[140].mxu0 %v2355_v62  ;;  %v2317_v31 = vmax.f32 %v2231_v4, 0.0 }
 0x4fc   : > { %v2237_v0 = vadd.f32 %v2236_v6, %v8489_v14  ;;  %v2318_v58 = vmax.f32 %v2233_v13, 0.0 }
 0x4fd   : > { %v2319_v27 = vmax.f32 %v2235_v17, 0.0 }
 0x4fe   : > { %v2320_v9 = vmax.f32 %v2237_v0, 0.0 }
 0x4ff   : > { %v2357_v10 = vpack.c.bf16 %v2319_v27, %v2317_v31 }
 0x500   : > { %v2358_v1 = vpack.c.bf16 %v2320_v9, %v2318_v58  ;;  %v2240_v28 = vpop.f32.mrb[116].mxu0 }
 0x501   : > { %v2241_v52 = vadd.f32 %v2240_v28, %v8486_v33  ;;  %v2242_v26 = vpop.f32.mrb[117].mxu0 }
 0x502   : > { %v2243_v7 = vadd.f32 %v2242_v26, %v8489_v14  ;;  %v2244_v47 = vpop.f32.mrb[118].mxu0  ;;  %2389 = vmatprep.subr.bf16.mxu1 %v2358_v1  ;;  %2823 = vmatprep.mubr.bf16.mxu0 %v2358_v1 }
 0x503   : > { %v2245_v56 = vadd.f32 %v2244_v47, %v8486_v33  ;;  %v2246_v62 = vpop.f32.mrb[119].mxu0  ;;  %2390 = vmatpush1.bf16.xpose.msra.mxu1 %v2357_v10  ;;  %2824 = vmatmul.mubr.bf16.gmra.mrb[144].mxu0 %v2357_v10  ;;  %v2321_v13 = vmax.f32 %v2241_v52, 0.0 }
 0x504   : > { %v2247_v4 = vadd.f32 %v2246_v62, %v8489_v14  ;;  %v2322_v6 = vmax.f32 %v2243_v7, 0.0 }
 0x505   : > { %v2323_v17 = vmax.f32 %v2245_v56, 0.0 }
 0x506   : > { %v2324_v0 = vmax.f32 %v2247_v4, 0.0 }
 0x507   : > { %v2359_v31 = vpack.c.bf16 %v2323_v17, %v2321_v13 }
 0x508   : > { %v2360_v27 = vpack.c.bf16 %v2324_v0, %v2322_v6  ;;  %v2250_v58 = vpop.f32.mrb[120].mxu0 }
 0x509   : > { %v2251_v9 = vadd.f32 %v2250_v58, %v8486_v33  ;;  %v2252_v28 = vpop.f32.mrb[121].mxu0 }
 0x50a   : > { %v2253_v26 = vadd.f32 %v2252_v28, %v8489_v14  ;;  %v2254_v1 = vpop.f32.mrb[122].mxu0  ;;  %2391 = vmatprep.subr.bf16.mxu1 %v2360_v27  ;;  %2831 = vmatprep.mubr.bf16.mxu0 %v2360_v27 }
 0x50b   : > { %v2255_v47 = vadd.f32 %v2254_v1, %v8486_v33  ;;  %v2256_v10 = vpop.f32.mrb[123].mxu0  ;;  %2392 = vmatpush1.bf16.xpose.msra.mxu1 %v2359_v31  ;;  %2832 = vmatmul.mubr.bf16.gmra.mrb[148].mxu0 %v2359_v31  ;;  %v2325_v7 = vmax.f32 %v2251_v9, 0.0 }
 0x50c   : > { %v2257_v52 = vadd.f32 %v2256_v10, %v8489_v14  ;;  %v2326_v62 = vmax.f32 %v2253_v26, 0.0 }
 0x50d   : > { %v2327_v56 = vmax.f32 %v2255_v47, 0.0 }
 0x50e   : > { %v2328_v4 = vmax.f32 %v2257_v52, 0.0 }
 0x50f   : > { %v2361_v13 = vpack.c.bf16 %v2327_v56, %v2325_v7 }
 0x510   : > { %v2362_v17 = vpack.c.bf16 %v2328_v4, %v2326_v62  ;;  %v2260_v6 = vpop.f32.mrb[124].mxu0 }
 0x511   : > { %v2261_v0 = vadd.f32 %v2260_v6, %v8486_v33  ;;  %v2262_v58 = vpop.f32.mrb[125].mxu0 }
 0x512   : > { %v2263_v28 = vadd.f32 %v2262_v58, %v8489_v14  ;;  %v2264_v27 = vpop.f32.mrb[126].mxu0  ;;  %2393 = vmatprep.subr.bf16.mxu1 %v2362_v17  ;;  %2839 = vmatprep.mubr.bf16.mxu0 %v2362_v17 }
 0x513   : > { %v2265_v1 = vadd.f32 %v2264_v27, %v8486_v33  ;;  %v2266_v31 = vpop.f32.mrb[127].mxu0  ;;  %2394 = vmatpush1.bf16.xpose.msra.mxu1 %v2361_v13  ;;  %2840 = vmatmul.mubr.bf16.gmra.mrb[152].mxu0 %v2361_v13  ;;  %v2329_v26 = vmax.f32 %v2261_v0, 0.0  ;;  %v9374_v33 = vmov 0  }
 0x514   : > { %v2267_v9 = vadd.f32 %v2266_v31, %v8489_v14  ;;  %v2330_v10 = vmax.f32 %v2263_v28, 0.0 }
 0x515   : > { %v2331_v47 = vmax.f32 %v2265_v1, 0.0 }
 0x516   : > { %v2332_v52 = vmax.f32 %v2267_v9, 0.0 }
 0x517   : > { %v2363_v7 = vpack.c.bf16 %v2331_v47, %v2329_v26 }
 0x518   : > { %v2364_v56 = vpack.c.bf16 %v2332_v52, %v2330_v10 }
 0x51a   : > { %2395 = vmatprep.subr.bf16.mxu1 %v2364_v56  ;;  %2847 = vmatprep.mubr.bf16.mxu0 %v2364_v56 }
 0x51b   : > { %2396 = vmatpush1.bf16.xpose.msra.mxu1 %v2363_v7  ;;  %2848 = vmatmul.mubr.bf16.gmra.mrb[156].mxu0 %v2363_v7  ;;  %v2365_v7 = vld [vmem:[#allocation8] sm:$0xff] }
 0x51c   : > { %2630 = vmatprep.subr.bf16.mxu1 %v8335_v16 }
 0x522   : > { %2414 = vmatmul.mubr.bf16.vlgmr.msra.gmra.mrb[64].mxu1 %v8495_v61 }
 0x523   : > { %2421 = vmatprep.mubr.bf16.mxu1 %v8504_v40  ;;  %2631 = vmatpush1.bf16.msra.mxu1 %v8333_v15 }
 0x524   : > { %2632 = vmatprep.subr.bf16.mxu1 %v8345_v30 }
 0x527   : > { %2633 = vmatpush1.bf16.msra.mxu1 %v8343_v29 }
 0x528   : > { %2634 = vmatprep.subr.bf16.mxu1 %v8355_v44 }
 0x52a   : > { %2422 = vmatmul.mubr.bf16.gmra.mrb[68].mxu1 %v8502_v32 }
 0x52b   : > { %2429 = vmatprep.mubr.bf16.mxu1 %v8514_v8  ;;  %2635 = vmatpush1.bf16.msra.mxu1 %v8353_v43  ;;  %v2749_v43 = vld [vmem:[#allocation9 + $0x30] sm:$0xff] }
 0x52c   : > { %2636 = vmatprep.subr.bf16.mxu1 %v8365_v59 }
 0x52f   : > { %2637 = vmatpush1.bf16.msra.mxu1 %v8363_v57 }
 0x530   : > { %2638 = vmatprep.subr.bf16.mxu1 %v8375_v22  ;;  %v2743_v22 = vld [vmem:[#allocation9] sm:$0xff] }
 0x532   : > { %2430 = vmatmul.mubr.bf16.gmra.mrb[72].mxu1 %v8512_v5 }
 0x533   : > { %2437 = vmatprep.mubr.bf16.mxu1 %v8524_v45  ;;  %2639 = vmatpush1.bf16.msra.mxu1 %v8373_v19 }
 0x534   : > { %2640 = vmatprep.subr.bf16.mxu1 %v8385_v39 }
 0x537   : > { %2641 = vmatpush1.bf16.msra.mxu1 %v8383_v36 }
 0x538   : > { %2642 = vmatprep.subr.bf16.mxu1 %v8395_v55 }
 0x53a   : > { %2438 = vmatmul.mubr.bf16.gmra.mrb[76].mxu1 %v8522_v42 }
 0x53b   : > { %2445 = vmatprep.mubr.bf16.mxu1 %v8534_v25  ;;  %2643 = vmatpush1.bf16.msra.mxu1 %v8393_v54 }
 0x53c   : > { %2644 = vmatprep.subr.bf16.mxu1 %v8405_v12 }
 0x53f   : > { %2645 = vmatpush1.bf16.msra.mxu1 %v8403_v11 }
 0x540   : > { %3008 = vmatprep.subr.bf16.mxu1 %v8255_v23 }
 0x542   : > { %2446 = vmatmul.mubr.bf16.gmra.mrb[80].mxu1 %v8532_v24 }
 0x543   : > { %2453 = vmatprep.mubr.bf16.mxu1 %v8544_v3 }
 0x54a   : > { %2454 = vmatmul.mubr.bf16.gmra.mrb[84].mxu1 %v8542_v60 }
 0x54b   : > { %2461 = vmatprep.mubr.bf16.mxu1 %v8554_v50 }
 0x552   : > { %2462 = vmatmul.mubr.bf16.gmra.mrb[88].mxu1 %v8552_v48 }
 0x553   : > { %2469 = vmatprep.mubr.bf16.mxu1 %v8564_v46 }
 0x55a   : > { %2470 = vmatmul.mubr.bf16.gmra.mrb[92].mxu1 %v8562_v41 }
 0x55b   : > { %2662 = vmatprep.mubr.bf16.mxu1 %v9374_v33 }
 0x5b6   : > { %v8633_v14 = vpop.f32.mrb[128].mxu0 }
 0x5b7   : > { %v2795_v61 = vpop.f32.mrb[129].mxu0 }
 0x5b8   : > { %v8635_v32 = vpop.f32.mrb[130].mxu0 }
 0x5b9   : > { %v2798_v40 = vpop.f32.mrb[131].mxu0 }
 0x5be   : > { %v8637_v5 = vpop.f32.mrb[132].mxu0 }
 0x5bf   : > { %v2803_v8 = vpop.f32.mrb[133].mxu0 }
 0x5c0   : > { %v8639_v42 = vpop.f32.mrb[134].mxu0  ;;  %v2366_v8 = vld [vmem:[#allocation8 + $0x8] sm:$0xff] }
 0x5c1   : > { %v2806_v45 = vpop.f32.mrb[135].mxu0 }
 0x5c6   : > { %v8641_v24 = vpop.f32.mrb[136].mxu0 }
 0x5c7   : > { %v2811_v25 = vpop.f32.mrb[137].mxu0 }
 0x5c8   : > { %v8643_v60 = vpop.f32.mrb[138].mxu0 }
 0x5c9   : > { %v2814_v3 = vpop.f32.mrb[139].mxu0 }
 0x5ce   : > { %v8645_v48 = vpop.f32.mrb[140].mxu0 }
 0x5cf   : > { %v2819_v50 = vpop.f32.mrb[141].mxu0 }
 0x5d0   : > { %v8647_v41 = vpop.f32.mrb[142].mxu0  ;;  %v2367_v50 = vld [vmem:[#allocation8 + $0x10] sm:$0xff] }
 0x5d1   : > { %v2822_v46 = vpop.f32.mrb[143].mxu0 }
 0x5d6   : > { %v8649_v62 = vpop.f32.mrb[144].mxu0 }
 0x5d7   : > { %v2827_v4 = vpop.f32.mrb[145].mxu0 }
 0x5d8   : > { %v8651_v13 = vpop.f32.mrb[146].mxu0 }
 0x5d9   : > { %v2830_v17 = vpop.f32.mrb[147].mxu0 }
 0x5de   : > { %v8653_v6 = vpop.f32.mrb[148].mxu0 }
 0x5df   : > { %v2835_v0 = vpop.f32.mrb[149].mxu0 }
 0x5e0   : > { %v8655_v58 = vpop.f32.mrb[150].mxu0  ;;  %v2368_v0 = vld [vmem:[#allocation8 + $0x18] sm:$0xff] }
 0x5e1   : > { %v2838_v28 = vpop.f32.mrb[151].mxu0 }
 0x5e6   : > { %v8657_v27 = vpop.f32.mrb[152].mxu0 }
 0x5e7   : > { %v2843_v1 = vpop.f32.mrb[153].mxu0 }
 0x5e8   : > { %v8659_v31 = vpop.f32.mrb[154].mxu0 }
 0x5e9   : > { %v2846_v9 = vpop.f32.mrb[155].mxu0 }
 0x5ee   : > { %v8661_v26 = vpop.f32.mrb[156].mxu0 }
 0x5ef   : > { %v2851_v47 = vpop.f32.mrb[157].mxu0 }
 0x5f0   : > { %v8663_v10 = vpop.f32.mrb[158].mxu0  ;;  %v2369_v47 = vld [vmem:[#allocation8 + $0x20] sm:$0xff] }
 0x5f1   : > { %v2854_v52 = vpop.f32.mrb[159].mxu0 }
 0x5f5   : > { %v2415_v56 = vpop.f32.mrb[64].mxu1 }
 0x5f6   : > { %v8665_v61 = vadd.f32 %v2415_v56, %v2365_v7  ;;  %v2417_v40 = vpop.f32.mrb[65].mxu1  ;;  %v2370_v7 = vld [vmem:[#allocation8 + $0x28] sm:$0xff] }
 0x5f7   : > { %v2418_v45 = vpop.f32.mrb[66].mxu1 }
 0x5f8   : > { %v2420_v25 = vpop.f32.mrb[67].mxu1  ;;  %2478 = vmax.xlane.f32.xlu0 %v8665_v61  ;;  %v8668_v3 = vadd.f32 %v2418_v45, %v2366_v8 }
 0x5fc   : > { %2480 = vmax.xlane.f32.xlu0 %v8668_v3 }
 0x5fd   : > { %v2423_v46 = vpop.f32.mrb[68].mxu1 }
 0x5fe   : > { %v8671_v4 = vadd.f32 %v2423_v46, %v2367_v50  ;;  %v2425_v17 = vpop.f32.mrb[69].mxu1  ;;  %v2371_v50 = vld [vmem:[#allocation8 + $0x30] sm:$0xff] }
 0x5ff   : > { %v2426_v28 = vpop.f32.mrb[70].mxu1  ;;  %v2372_v17 = vld [vmem:[#allocation8 + $0x38] sm:$0xff] }
 0x600   : > { %v2428_v1 = vpop.f32.mrb[71].mxu1  ;;  %2482 = vmax.xlane.f32.xlu1 %v8671_v4  ;;  %v8674_v9 = vadd.f32 %v2426_v28, %v2368_v0 }
 0x604   : > { %2484 = vmax.xlane.f32.xlu1 %v8674_v9 }
 0x605   : > { %v2431_v52 = vpop.f32.mrb[72].mxu1 }
 0x606   : > { %v8677_v56 = vadd.f32 %v2431_v52, %v2369_v47  ;;  %v2433_v40 = vpop.f32.mrb[73].mxu1  ;;  %v2373_v52 = vld [vmem:[#allocation8 + $0x40] sm:$0xff] }
 0x607   : > { %v2434_v8 = vpop.f32.mrb[74].mxu1  ;;  %v2374_v40 = vld [vmem:[#allocation8 + $0x48] sm:$0xff] }
 0x608   : > { %v8679_v45 = vadd.f32 %v2434_v8, %v2370_v7  ;;  %v2436_v25 = vpop.f32.mrb[75].mxu1  ;;  %2486 = vmax.xlane.f32.xlu0 %v8677_v56 }
 0x60a   : > { %2488 = vmax.xlane.f32.xlu1 %v8679_v45 }
 0x60d   : > { %v2439_v46 = vpop.f32.mrb[76].mxu1 }
 0x60e   : > { %v8683_v0 = vadd.f32 %v2439_v46, %v2371_v50  ;;  %v2441_v28 = vpop.f32.mrb[77].mxu1  ;;  %v2375_v46 = vld [vmem:[#allocation8 + $0x50] sm:$0xff] }
 0x60f   : > { %v2442_v1 = vpop.f32.mrb[78].mxu1  ;;  %v2376_v28 = vld [vmem:[#allocation8 + $0x58] sm:$0xff] }
 0x610   : > { %v8685_v11 = vadd.f32 %v2442_v1, %v2372_v17  ;;  %v2444_v47 = vpop.f32.mrb[79].mxu1  ;;  %2490 = vmax.xlane.f32.xlu0 %v8683_v0 }
 0x612   : > { %2492 = vmax.xlane.f32.xlu1 %v8685_v11 }
 0x615   : > { %v2447_v7 = vpop.f32.mrb[80].mxu1 }
 0x616   : > { %v8689_v8 = vadd.f32 %v2447_v7, %v2373_v52  ;;  %v2449_v25 = vpop.f32.mrb[81].mxu1 }
 0x617   : > { %v2450_v12 = vpop.f32.mrb[82].mxu1 }
 0x618   : > { %v8691_v54 = vadd.f32 %v2450_v12, %v2374_v40  ;;  %v2452_v50 = vpop.f32.mrb[83].mxu1  ;;  %2494 = vmax.xlane.f32.xlu0 %v8689_v8  ;;  %v2377_v12 = vld [vmem:[#allocation8 + $0x60] sm:$0xff]  ;;  %v2378_v40 = vld [vmem:[#allocation8 + $0x68] sm:$0xff] }
 0x61a   : > { %2496 = vmax.xlane.f32.xlu1 %v8691_v54 }
 0x61d   : > { %v2455_v17 = vpop.f32.mrb[84].mxu1 }
 0x61e   : > { %v8695_v1 = vadd.f32 %v2455_v17, %v2375_v46  ;;  %v2457_v47 = vpop.f32.mrb[85].mxu1 }
 0x61f   : > { %v2458_v55 = vpop.f32.mrb[86].mxu1 }
 0x620   : > { %v8697_v36 = vadd.f32 %v2458_v55, %v2376_v28  ;;  %v2460_v52 = vpop.f32.mrb[87].mxu1  ;;  %2498 = vmax.xlane.f32.xlu0 %v8695_v1  ;;  %v2379_v55 = vld [vmem:[#allocation8 + $0x70] sm:$0xff]  ;;  %v2380_v28 = vld [vmem:[#allocation8 + $0x78] sm:$0xff] }
 0x622   : > { %2500 = vmax.xlane.f32.xlu1 %v8697_v36 }
 0x625   : > { %v2463_v7 = vpop.f32.mrb[88].mxu1 }
 0x626   : > { %v8701_v25 = vadd.f32 %v2463_v7, %v2377_v12  ;;  %v2465_v50 = vpop.f32.mrb[89].mxu1  ;;  %v8713_v7 = vadd.f32 %v8633_v14, %v2743_v22  ;;  %v2748_v22 = vld [vmem:[#allocation9 + $0x28] sm:$0xff] }
 0x627   : > { %v2466_v39 = vpop.f32.mrb[90].mxu1 }
 0x628   : > { %v8703_v19 = vadd.f32 %v2466_v39, %v2378_v40  ;;  %v2468_v46 = vpop.f32.mrb[91].mxu1  ;;  %2502 = vmax.xlane.f32.xlu0 %v8701_v25  ;;  %v2744_v39 = vld [vmem:[#allocation9 + $0x8] sm:$0xff]  ;;  %v2745_v40 = vld [vmem:[#allocation9 + $0x10] sm:$0xff] }
 0x629   : > { %v8717_v50 = vadd.f32 %v8635_v32, %v2744_v39  ;;  %v2746_v46 = vld [vmem:[#allocation9 + $0x18] sm:$0xff]  ;;  %v8733_v32 = vadd.f32 %v8643_v60, %v2748_v22 }
 0x62a   : > { %2504 = vmax.xlane.f32.xlu1 %v8703_v19 }
 0x62d   : > { %v2471_v17 = vpop.f32.mrb[92].mxu1 }
 0x62e   : > { %v8707_v47 = vadd.f32 %v2471_v17, %v2379_v55  ;;  %v2473_v52 = vpop.f32.mrb[93].mxu1  ;;  %v8721_v55 = vadd.f32 %v8637_v5, %v2745_v40  ;;  %v8725_v17 = vadd.f32 %v8639_v42, %v2746_v46 }
 0x62f   : > { %v2474_v57 = vpop.f32.mrb[94].mxu1 }
 0x630   : > { %v8709_v59 = vadd.f32 %v2474_v57, %v2380_v28  ;;  %v2476_v12 = vpop.f32.mrb[95].mxu1  ;;  %2506 = vmax.xlane.f32.xlu0 %v8707_v47  ;;  %v2747_v57 = vld [vmem:[#allocation9 + $0x20] sm:$0xff] }
 0x631   : > { %v8729_v14 = vadd.f32 %v8641_v24, %v2747_v57 }
 0x632   : > { %2508 = vmax.xlane.f32.xlu1 %v8709_v59 }
 0x634   : > { %2856 = vmax.xlane.f32.xlu0 %v8713_v7 }
 0x636   : > { %2858 = vmax.xlane.f32.xlu1 %v8717_v50 }
 0x638   : > { %2860 = vmax.xlane.f32.xlu0 %v8721_v55 }
 0x63a   : > { %2862 = vmax.xlane.f32.xlu1 %v8725_v17 }
 0x63c   : > { %2864 = vmax.xlane.f32.xlu0 %v8729_v14 }
 0x63e   : > { %2866 = vmax.xlane.f32.xlu1 %v8733_v32 }
 0x685   : > { %v2479_v5 = vpop.xlane.xlu0 %2478 }
 0x686   : > { %v2510_v28 = vsub.f32 %v8665_v61, %v2479_v5  ;;  %v8746_v5 = vadd.f32 %v8645_v48, %v2749_v43  ;;  %v2751_v43 = vld [vmem:[#allocation9 + $0x40] sm:$0xff] }
 0x688   : > { %v2526_v42 = vmul.f32 1.442695, %v2510_v28 }
 0x689   : > { %v2481_v52 = vpop.xlane.xlu0 %2480 }
 0x68a   : > { %6949 = vpow2.f32 %v2526_v42  ;;  %v2511_v12 = vsub.f32 %v8668_v3, %v2481_v52  ;;  %v2750_v42 = vld [vmem:[#allocation9 + $0x38] sm:$0xff] }
 0x68c   : > { %v2528_v39 = vmul.f32 1.442695, %v2511_v12 }
 0x68d   : > { %v2483_v24 = vpop.xlane.xlu1 %2482 }
 0x68e   : > { %6951 = vpow2.f32 %v2528_v39  ;;  %v2512_v40 = vsub.f32 %v8671_v4, %v2483_v24  ;;  %v8762_v39 = vadd.f32 %v8649_v62, %v2751_v43  ;;  %v2753_v62 = vld [vmem:[#allocation9 + $0x50] sm:$0xff] }
 0x690   : > { %v2530_v46 = vmul.f32 1.442695, %v2512_v40 }
 0x691   : > { %v2485_v60 = vpop.xlane.xlu1 %2484 }
 0x692   : > { %6953 = vpow2.f32 %v2530_v46  ;;  %v2513_v57 = vsub.f32 %v8674_v9, %v2485_v60  ;;  %v2752_v46 = vld [vmem:[#allocation9 + $0x48] sm:$0xff] }
 0x694   : > { %v8741_v22 = vpop.eup %6949  ;;  %v2532_v44 = vmul.f32 1.442695, %v2513_v57 }
 0x695   : > { %2558 = vadd.xlane.f32.xlu0 %v8741_v22  ;;  %v2487_v61 = vpop.xlane.xlu0 %2486 }
 0x696   : > { %6955 = vpow2.f32 %v2532_v44  ;;  %v2514_v3 = vsub.f32 %v8677_v56, %v2487_v61  ;;  %v8754_v44 = vadd.f32 %v8647_v41, %v2750_v42  ;;  %v8770_v61 = vadd.f32 %v8651_v13, %v2752_v46 }
 0x697   : > { %v2489_v28 = vpop.xlane.xlu1 %2488 }
 0x698   : > { %v8748_v4 = vpop.eup %6951  ;;  %v2534_v52 = vmul.f32 1.442695, %v2514_v3  ;;  %v2515_v9 = vsub.f32 %v8679_v45, %v2489_v28  ;;  %v8778_v28 = vadd.f32 %v8653_v6, %v2753_v62  ;;  %v2755_v6 = vld [vmem:[#allocation9 + $0x60] sm:$0xff] }
 0x699   : > { %2868 = vmax.xlane.f32.xlu0 %v8746_v5  ;;  %2560 = vadd.xlane.f32.xlu1 %v8748_v4 }
 0x69a   : > { %6957 = vpow2.f32 %v2534_v52  ;;  %v2536_v12 = vmul.f32 1.442695, %v2515_v9  ;;  %v2754_v9 = vld [vmem:[#allocation9 + $0x58] sm:$0xff] }
 0x69c   : > { %v8756_v56 = vpop.eup %6953  ;;  %6959 = vpow2.f32 %v2536_v12 }
 0x69d   : > { %2562 = vadd.xlane.f32.xlu0 %v8756_v56  ;;  %2870 = vmax.xlane.f32.xlu1 %v8754_v44  ;;  %v2491_v48 = vpop.xlane.xlu0 %2490 }
 0x69e   : > { %v2516_v45 = vsub.f32 %v8683_v0, %v2491_v48  ;;  %v8786_v48 = vadd.f32 %v8655_v58, %v2754_v9 }
 0x69f   : > { %v2493_v24 = vpop.xlane.xlu1 %2492 }
 0x6a0   : > { %v8764_v40 = vpop.eup %6955  ;;  %v2538_v41 = vmul.f32 1.442695, %v2516_v45  ;;  %v2517_v60 = vsub.f32 %v8685_v11, %v2493_v24  ;;  %v8794_v24 = vadd.f32 %v8657_v27, %v2755_v6  ;;  %v2757_v27 = vld [vmem:[#allocation9 + $0x70] sm:$0xff] }
 0x6a1   : > { %2872 = vmax.xlane.f32.xlu0 %v8762_v39  ;;  %2564 = vadd.xlane.f32.xlu1 %v8764_v40 }
 0x6a2   : > { %6961 = vpow2.f32 %v2538_v41  ;;  %v2540_v57 = vmul.f32 1.442695, %v2517_v60  ;;  %v2756_v60 = vld [vmem:[#allocation9 + $0x68] sm:$0xff] }
 0x6a4   : > { %v8772_v0 = vpop.eup %6957  ;;  %6963 = vpow2.f32 %v2540_v57 }
 0x6a5   : > { %2874 = vmax.xlane.f32.xlu1 %v8770_v61  ;;  %2566 = vadd.xlane.f32.xlu0 %v8772_v0  ;;  %v2495_v3 = vpop.xlane.xlu0 %2494 }
 0x6a6   : > { %v2518_v11 = vsub.f32 %v8689_v8, %v2495_v3  ;;  %v8780_v52 = vpop.eup %6959  ;;  %v8802_v3 = vadd.f32 %v8659_v31, %v2756_v60 }
 0x6a7   : > { %v2497_v42 = vpop.xlane.xlu1 %2496 }
 0x6a8   : > { %v2542_v13 = vmul.f32 1.442695, %v2518_v11  ;;  %v2519_v12 = vsub.f32 %v8691_v54, %v2497_v42  ;;  %v8810_v42 = vadd.f32 %v8661_v26, %v2757_v27 }
 0x6a9   : > { %2568 = vadd.xlane.f32.xlu1 %v8780_v52  ;;  %2876 = vmax.xlane.f32.xlu0 %v8778_v28 }
 0x6aa   : > { %6965 = vpow2.f32 %v2542_v13  ;;  %v2544_v43 = vmul.f32 1.442695, %v2519_v12  ;;  %v2758_v12 = vld [vmem:[#allocation9 + $0x78] sm:$0xff] }
 0x6ac   : > { %v8788_v8 = vpop.eup %6961  ;;  %6967 = vpow2.f32 %v2544_v43 }
 0x6ad   : > { %2878 = vmax.xlane.f32.xlu1 %v8786_v48  ;;  %2570 = vadd.xlane.f32.xlu0 %v8788_v8  ;;  %v2499_v45 = vpop.xlane.xlu0 %2498 }
 0x6ae   : > { %v2520_v54 = vsub.f32 %v8695_v1, %v2499_v45  ;;  %v8796_v41 = vpop.eup %6963  ;;  %v8818_v45 = vadd.f32 %v8663_v10, %v2758_v12 }
 0x6af   : > { %v2501_v46 = vpop.xlane.xlu1 %2500 }
 0x6b0   : > { %v2546_v58 = vmul.f32 1.442695, %v2520_v54  ;;  %v2521_v57 = vsub.f32 %v8697_v36, %v2501_v46 }
 0x6b1   : > { %2572 = vadd.xlane.f32.xlu1 %v8796_v41  ;;  %2880 = vmax.xlane.f32.xlu0 %v8794_v24 }
 0x6b2   : > { %6969 = vpow2.f32 %v2546_v58  ;;  %v2548_v62 = vmul.f32 1.442695, %v2521_v57 }
 0x6b4   : > { %v8804_v1 = vpop.eup %6965  ;;  %6971 = vpow2.f32 %v2548_v62 }
 0x6b5   : > { %2882 = vmax.xlane.f32.xlu1 %v8802_v3  ;;  %2574 = vadd.xlane.f32.xlu0 %v8804_v1  ;;  %v2503_v11 = vpop.xlane.xlu0 %2502 }
 0x6b6   : > { %v2522_v36 = vsub.f32 %v8701_v25, %v2503_v11  ;;  %v8812_v13 = vpop.eup %6967 }
 0x6b7   : > { %v2505_v9 = vpop.xlane.xlu1 %2504 }
 0x6b8   : > { %v2550_v31 = vmul.f32 1.442695, %v2522_v36  ;;  %v2523_v43 = vsub.f32 %v8703_v19, %v2505_v9 }
 0x6b9   : > { %2576 = vadd.xlane.f32.xlu1 %v8812_v13  ;;  %2884 = vmax.xlane.f32.xlu0 %v8810_v42 }
 0x6ba   : > { %6973 = vpow2.f32 %v2550_v31  ;;  %v2552_v6 = vmul.f32 1.442695, %v2523_v43 }
 0x6bc   : > { %v8820_v25 = vpop.eup %6969  ;;  %6975 = vpow2.f32 %v2552_v6 }
 0x6bd   : > { %2886 = vmax.xlane.f32.xlu1 %v8818_v45  ;;  %2578 = vadd.xlane.f32.xlu0 %v8820_v25  ;;  %v2507_v26 = vpop.xlane.xlu0 %2506 }
 0x6be   : > { %v2524_v54 = vsub.f32 %v8707_v47, %v2507_v26  ;;  %v8825_v46 = vpop.eup %6971 }
 0x6bf   : > { %v2509_v19 = vpop.xlane.xlu1 %2508 }
 0x6c0   : > { %v2554_v60 = vmul.f32 1.442695, %v2524_v54  ;;  %v2525_v58 = vsub.f32 %v8709_v59, %v2509_v19 }
 0x6c1   : > { %2580 = vadd.xlane.f32.xlu1 %v8825_v46  ;;  %v2857_v10 = vpop.xlane.xlu0 %2856 }
 0x6c2   : > { %6977 = vpow2.f32 %v2554_v60  ;;  %v2556_v57 = vmul.f32 1.442695, %v2525_v58  ;;  %v2888_v62 = vsub.f32 %v8713_v7, %v2857_v10 }
 0x6c3   : > { %v2859_v27 = vpop.xlane.xlu1 %2858 }
 0x6c4   : > { %v8830_v11 = vpop.eup %6973  ;;  %6979 = vpow2.f32 %v2556_v57  ;;  %v2904_v36 = vmul.f32 1.442695, %v2888_v62  ;;  %v2889_v47 = vsub.f32 %v8717_v50, %v2859_v27 }
 0x6c5   : > { %2582 = vadd.xlane.f32.xlu0 %v8830_v11  ;;  %v2861_v9 = vpop.xlane.xlu0 %2860 }
 0x6c6   : > { %v8834_v12 = vpop.eup %6975  ;;  %6981 = vpow2.f32 %v2904_v36  ;;  %v2906_v59 = vmul.f32 1.442695, %v2889_v47  ;;  %v2890_v31 = vsub.f32 %v8721_v55, %v2861_v9 }
 0x6c7   : > { %v2863_v43 = vpop.xlane.xlu1 %2862  ;;  %2584 = vadd.xlane.f32.xlu1 %v8834_v12 }
 0x6c8   : > { %6983 = vpow2.f32 %v2906_v59  ;;  %v2908_v7 = vmul.f32 1.442695, %v2890_v31  ;;  %v2891_v6 = vsub.f32 %v8725_v17, %v2863_v43 }
 0x6c9   : > { %v2865_v26 = vpop.xlane.xlu0 %2864 }
 0x6ca   : > { %6985 = vpow2.f32 %v2908_v7  ;;  %v2910_v54 = vmul.f32 1.442695, %v2891_v6  ;;  %v2892_v50 = vsub.f32 %v8729_v14, %v2865_v26 }
 0x6cb   : > { %v2867_v19 = vpop.xlane.xlu1 %2866 }
 0x6cc   : > { %v8840_v60 = vpop.eup %6977  ;;  %6987 = vpow2.f32 %v2910_v54  ;;  %v2912_v58 = vmul.f32 1.442695, %v2892_v50  ;;  %v2893_v10 = vsub.f32 %v8733_v32, %v2867_v19 }
 0x6cd   : > { %2586 = vadd.xlane.f32.xlu0 %v8840_v60 }
 0x6ce   : > { %v8844_v55 = vpop.eup %6979  ;;  %6989 = vpow2.f32 %v2912_v58  ;;  %v2914_v57 = vmul.f32 1.442695, %v2893_v10 }
 0x6cf   : > { %2588 = vadd.xlane.f32.xlu1 %v8844_v55 }
 0x6d0   : > { %v8847_v17 = vpop.eup %6981  ;;  %6991 = vpow2.f32 %v2914_v57 }
 0x6d1   : > { %2936 = vadd.xlane.f32.xlu0 %v8847_v17 }
 0x6d2   : > { %v8850_v14 = vpop.eup %6983 }
 0x6d3   : > { %2938 = vadd.xlane.f32.xlu1 %v8850_v14 }
 0x6d4   : > { %v8853_v62 = vpop.eup %6985 }
 0x6d5   : > { %2940 = vadd.xlane.f32.xlu0 %v8853_v62 }
 0x6d6   : > { %v8856_v32 = vpop.eup %6987 }
 0x6d7   : > { %2942 = vadd.xlane.f32.xlu1 %v8856_v32 }
 0x6d8   : > { %v8859_v27 = vpop.eup %6989 }
 0x6d9   : > { %2944 = vadd.xlane.f32.xlu0 %v8859_v27 }
 0x6da   : > { %v8862_v36 = vpop.eup %6991 }
 0x6db   : > { %2946 = vadd.xlane.f32.xlu1 %v8862_v36 }
 0x722   : > { %v2559_v47 = vpop.xlane.xlu0 %2558 }
 0x723   : > { %6993 = vrcp.f32 %v2559_v47 }
 0x726   : > { %v2561_v9 = vpop.xlane.xlu1 %2560  ;;  %v2869_v59 = vpop.xlane.xlu0 %2868 }
 0x727   : > { %6995 = vrcp.f32 %v2561_v9  ;;  %v2894_v31 = vsub.f32 %v8746_v5, %v2869_v59 }
 0x729   : > { %v2916_v43 = vmul.f32 1.442695, %v2894_v31 }
 0x72a   : > { %v2871_v7 = vpop.xlane.xlu1 %2870  ;;  %v2563_v6 = vpop.xlane.xlu0 %2562 }
 0x72b   : > { %6997 = vpow2.f32 %v2916_v43  ;;  %v2895_v26 = vsub.f32 %v8754_v44, %v2871_v7 }
 0x72c   : > { %6999 = vrcp.f32 %v2563_v6 }
 0x72d   : > { %v2918_v54 = vmul.f32 1.442695, %v2895_v26  ;;  %v6994_v58 = vpop.eup %6993 }
 0x72e   : > { %v2565_v50 = vpop.xlane.xlu1 %2564  ;;  %v2873_v19 = vpop.xlane.xlu0 %2872  ;;  %v2606_v9 = vmul.f32 %v6994_v58, %v8741_v22 }
 0x72f   : > { %7001 = vpow2.f32 %v2918_v54  ;;  %v2896_v10 = vsub.f32 %v8762_v39, %v2873_v19 }
 0x730   : > { %7003 = vrcp.f32 %v2565_v50 }
 0x731   : > { %v6996_v57 = vpop.eup %6995  ;;  %v2920_v47 = vmul.f32 1.442695, %v2896_v10 }
 0x732   : > { %v2607_v5 = vmul.f32 %v6996_v57, %v8748_v4  ;;  %v2875_v59 = vpop.xlane.xlu1 %2874  ;;  %v2567_v31 = vpop.xlane.xlu0 %2566 }
 0x733   : > { %7005 = vpow2.f32 %v2920_v47  ;;  %v2897_v44 = vsub.f32 %v8770_v61, %v2875_v59 }
 0x734   : > { %v2622_v43 = vpack.c.bf16 %v2607_v5, %v2606_v9  ;;  %7007 = vrcp.f32 %v2567_v31 }
 0x735   : > { %v8871_v7 = vpop.eup %6997  ;;  %v2922_v6 = vmul.f32 1.442695, %v2897_v44 }
 0x736   : > { %v2569_v26 = vpop.xlane.xlu1 %2568  ;;  %2663 = vmatmul.mubr.bf16.vlgmr.msra.gmra.mrb[96].mxu1 %v2622_v43  ;;  %2948 = vadd.xlane.f32.xlu0 %v8871_v7  ;;  %v2877_v39 = vpop.xlane.xlu0 %2876 }
 0x737   : > { %7009 = vpow2.f32 %v2922_v6  ;;  %3009 = vmatpush1.bf16.msra.mxu1 %v8253_v21  ;;  %v2898_v22 = vsub.f32 %v8778_v28, %v2877_v39  ;;  %2672 = vmatprep.mubr.bf16.mxu1 %v9374_v33  ;;  %v7000_v4 = vpop.eup %6999 }
 0x738   : > { %7011 = vrcp.f32 %v2569_v26  ;;  %3010 = vmatprep.subr.bf16.mxu1 %v8265_v37  ;;  %v2608_v28 = vmul.f32 %v7000_v4, %v8756_v56 }
 0x739   : > { %v8878_v61 = vpop.eup %7001  ;;  %v2924_v54 = vmul.f32 1.442695, %v2898_v22 }
 0x73a   : > { %v7004_v50 = vpop.eup %7003  ;;  %2950 = vadd.xlane.f32.xlu1 %v8878_v61  ;;  %v2879_v19 = vpop.xlane.xlu1 %2878 }
 0x73b   : > { %v2571_v58 = vpop.xlane.xlu0 %2570  ;;  %7013 = vpow2.f32 %v2924_v54  ;;  %v2899_v10 = vsub.f32 %v8786_v48, %v2879_v19  ;;  %3011 = vmatpush1.bf16.msra.mxu1 %v8263_v35  ;;  %v2609_v57 = vmul.f32 %v7004_v50, %v8764_v40 }
 0x73c   : > { %3012 = vmatprep.subr.bf16.mxu1 %v8275_v51  ;;  %7015 = vrcp.f32 %v2571_v58 }
 0x73d   : > { %v8886_v47 = vpop.eup %7005  ;;  %v2926_v9 = vmul.f32 1.442695, %v2899_v10  ;;  %v2623_v5 = vpack.c.bf16 %v2609_v57, %v2608_v28 }
 0x73e   : > { %v2573_v59 = vpop.xlane.xlu1 %2572  ;;  %2952 = vadd.xlane.f32.xlu0 %v8886_v47  ;;  %v7008_v44 = vpop.eup %7007 }
 0x73f   : > { %v2881_v31 = vpop.xlane.xlu0 %2880  ;;  %7017 = vpow2.f32 %v2926_v9  ;;  %2673 = vmatmul.mubr.bf16.gmra.mrb[100].mxu1 %v2623_v5 }
 0x740   : > { %v2900_v48 = vsub.f32 %v8794_v24, %v2881_v31  ;;  %7019 = vrcp.f32 %v2573_v59  ;;  %3013 = vmatpush1.bf16.msra.mxu1 %v8273_v49  ;;  %2682 = vmatprep.mubr.bf16.mxu1 %v9374_v33  ;;  %v2610_v24 = vmul.f32 %v7008_v44, %v8772_v0 }
 0x741   : > { %v8892_v56 = vpop.eup %7009  ;;  %3014 = vmatprep.subr.bf16.mxu1 %v8285_v2 }
 0x742   : > { %v2928_v40 = vmul.f32 1.442695, %v2900_v48  ;;  %v7012_v43 = vpop.eup %7011  ;;  %2954 = vadd.xlane.f32.xlu1 %v8892_v56  ;;  %v2883_v6 = vpop.xlane.xlu1 %2882 }
 0x743   : > { %v2575_v26 = vpop.xlane.xlu0 %2574  ;;  %v2901_v39 = vsub.f32 %v8802_v3, %v2883_v6  ;;  %v2611_v22 = vmul.f32 %v7012_v43, %v8780_v52  ;;  %v9375_v43 = vld [vmem:[#allocation40_spill] sm:$0xff] }
 0x744   : > { %7021 = vpow2.f32 %v2928_v40  ;;  %3015 = vmatpush1.bf16.msra.mxu1 %v8283_v63 }
 0x745   : > { %v8900_v4 = vpop.eup %7013  ;;  %v2930_v54 = vmul.f32 1.442695, %v2901_v39  ;;  %3016 = vmatprep.subr.bf16.mxu1 %v8295_v20  ;;  %v2624_v50 = vpack.c.bf16 %v2611_v22, %v2610_v24  ;;  %7023 = vrcp.f32 %v2575_v26  ;;  %v9376_v26 = vld [vmem:[#allocation42_spill] sm:$0xff] }
 0x746   : > { %v2577_v19 = vpop.xlane.xlu1 %2576  ;;  %2956 = vadd.xlane.f32.xlu0 %v8900_v4  ;;  %v7016_v0 = vpop.eup %7015 }
 0x747   : > { %v2885_v58 = vpop.xlane.xlu0 %2884  ;;  %7025 = vpow2.f32 %v2930_v54  ;;  %2683 = vmatmul.mubr.bf16.gmra.mrb[104].mxu1 %v2624_v50  ;;  %v9377_v50 = vld [vmem:[#allocation41_spill] sm:$0xff] }
 0x748   : > { %v2902_v3 = vsub.f32 %v8810_v42, %v2885_v58  ;;  %7027 = vrcp.f32 %v2577_v19  ;;  %3017 = vmatpush1.bf16.msra.mxu1 %v8293_v18  ;;  %2692 = vmatprep.mubr.bf16.mxu1 %v9374_v33  ;;  %v2612_v42 = vmul.f32 %v7016_v0, %v8788_v8  ;;  %v6639_v8 = vld [vmem:[#allocation17] ss:$8 sps:$4 sm:$0xff]   ;;  %v6642_v58 = vld [vmem:[#allocation17 + $0x10] ss:$8 sps:$4 sm:$0xff]  }
 0x749   : > { %v8907_v52 = vpop.eup %7017  ;;  %3018 = vmatprep.subr.bf16.mxu1 %v8305_v38 }
 0x74a   : > { %v2932_v10 = vmul.f32 1.442695, %v2902_v3  ;;  %v7020_v28 = vpop.eup %7019  ;;  %2958 = vadd.xlane.f32.xlu1 %v8907_v52  ;;  %v2887_v57 = vpop.xlane.xlu1 %2886  ;;  %v6644_v3 = vld [vmem:[#allocation17 + $0x14] ss:$8 sps:$4 sm:$0xff]  }
 0x74b   : > { %v2903_v9 = vsub.f32 %v8818_v45, %v2887_v57  ;;  %v2579_v5 = vpop.xlane.xlu0 %2578  ;;  %v2613_v59 = vmul.f32 %v7020_v28, %v8796_v41  ;;  %v6641_v41 = vld [vmem:[#allocation17 + $0x4] ss:$8 sps:$4 sm:$0xff]  }
 0x74c   : > { %7029 = vpow2.f32 %v2932_v10  ;;  %3019 = vmatpush1.bf16.msra.mxu1 %v8303_v34  ;;  %3441 = vmatprep.subr.bf16.mxu0 %v6641_v41 }
 0x74d   : > { %v2934_v48 = vmul.f32 1.442695, %v2903_v9  ;;  %3020 = vmatprep.subr.bf16.mxu1 %v8315_v53  ;;  %v2625_v44 = vpack.c.bf16 %v2613_v59, %v2612_v42  ;;  %7031 = vrcp.f32 %v2579_v5  ;;  %3442 = vmatpush1.bf16.msra.mxu0 %v6639_v8 }
 0x74e   : > { %v8915_v31 = vpop.eup %7021  ;;  %v2581_v40 = vpop.xlane.xlu1 %2580  ;;  %3443 = vmatprep.subr.bf16.mxu0 %v6644_v3 }
 0x74f   : > { %2960 = vadd.xlane.f32.xlu0 %v8915_v31  ;;  %7033 = vpow2.f32 %v2934_v48  ;;  %2693 = vmatmul.mubr.bf16.gmra.mrb[108].mxu1 %v2625_v44  ;;  %v7024_v45 = vpop.eup %7023  ;;  %v6648_v44 = vld [vmem:[#allocation17 + $0x30] ss:$8 sps:$4 sm:$0xff]  }
 0x750   : > { %7035 = vrcp.f32 %v2581_v40  ;;  %3021 = vmatpush1.bf16.msra.mxu1 %v9375_v43  ;;  %2702 = vmatprep.mubr.bf16.mxu1 %v9374_v33  ;;  %v2614_v22 = vmul.f32 %v7024_v45, %v8804_v1  ;;  %v6645_v1 = vld [vmem:[#allocation17 + $0x20] ss:$8 sps:$4 sm:$0xff]   ;;  %v6650_v40 = vld [vmem:[#allocation17 + $0x34] ss:$8 sps:$4 sm:$0xff]  }
 0x751   : > { %v8921_v6 = vpop.eup %7025  ;;  %3022 = vmatprep.subr.bf16.mxu1 %v9376_v26  ;;  %3444 = vmatpush1.bf16.msra.mxu0 %v6642_v58  ;;  %v6656_v58 = vld [vmem:[#allocation17 + $0x54] ss:$8 sps:$4 sm:$0xff]  }
 0x752   : > { %v7028_v39 = vpop.eup %7027  ;;  %2962 = vadd.xlane.f32.xlu1 %v8921_v6  ;;  %v2583_v24 = vpop.xlane.xlu0 %2582 }
 0x753   : > { %v2615_v54 = vmul.f32 %v7028_v39, %v8812_v13  ;;  %v6647_v13 = vld [vmem:[#allocation17 + $0x24] ss:$8 sps:$4 sm:$0xff]   ;;  %v6651_v39 = vld [vmem:[#allocation17 + $0x40] ss:$8 sps:$4 sm:$0xff]  }
 0x754   : > { %3023 = vmatpush1.bf16.msra.mxu1 %v9377_v50  ;;  %v2585_v19 = vpop.xlane.xlu1 %2584  ;;  %3445 = vmatprep.subr.bf16.mxu0 %v6647_v13  ;;  %v6659_v13 = vld [vmem:[#allocation17 + $0x64] ss:$8 sps:$4 sm:$0xff]  }
 0x755   : > { %7037 = vrcp.f32 %v2585_v19  ;;  %v2626_v10 = vpack.c.bf16 %v2615_v54, %v2614_v22  ;;  %3446 = vmatpush1.bf16.msra.mxu0 %v6645_v1  ;;  %v6654_v19 = vld [vmem:[#allocation17 + $0x50] ss:$8 sps:$4 sm:$0xff]   ;;  %v6657_v1 = vld [vmem:[#allocation17 + $0x60] ss:$8 sps:$4 sm:$0xff]  }
 0x756   : > { %v8928_v0 = vpop.eup %7029  ;;  %7039 = vrcp.f32 %v2583_v24  ;;  %3447 = vmatprep.subr.bf16.mxu0 %v6650_v40  ;;  %v6653_v24 = vld [vmem:[#allocation17 + $0x44] ss:$8 sps:$4 sm:$0xff]   ;;  %v6663_v40 = vld [vmem:[#allocation17 + $0x80] ss:$8 sps:$4 sm:$0xff]  }
 0x757   : > { %2964 = vadd.xlane.f32.xlu0 %v8928_v0  ;;  %2703 = vmatmul.mubr.bf16.gmra.mrb[112].mxu1 %v2626_v10  ;;  %v7032_v28 = vpop.eup %7031 }
 0x758   : > { %2712 = vmatprep.mubr.bf16.mxu1 %v9374_v33  ;;  %v2616_v42 = vmul.f32 %v7032_v28, %v8820_v25 }
 0x759   : > { %v8932_v57 = vpop.eup %7033  ;;  %3448 = vmatpush1.bf16.msra.mxu0 %v6648_v44 }
 0x75a   : > { %v7036_v9 = vpop.eup %7035  ;;  %2966 = vadd.xlane.f32.xlu1 %v8932_v57  ;;  %v2587_v5 = vpop.xlane.xlu0 %2586  ;;  %3449 = vmatprep.subr.bf16.mxu0 %v6653_v24 }
 0x75b   : > { %v2617_v59 = vmul.f32 %v7036_v9, %v8825_v46 }
 0x75c   : > { %v2589_v48 = vpop.xlane.xlu1 %2588 }
 0x75d   : > { %7041 = vrcp.f32 %v2589_v48  ;;  %v2627_v45 = vpack.c.bf16 %v2617_v59, %v2616_v42  ;;  %3450 = vmatpush1.bf16.msra.mxu0 %v6651_v39  ;;  %v6660_v59 = vld [vmem:[#allocation17 + $0x70] ss:$8 sps:$4 sm:$0xff]  }
 0x75e   : > { %7043 = vrcp.f32 %v2587_v5  ;;  %v2937_v46 = vpop.xlane.xlu0 %2936  ;;  %3451 = vmatprep.subr.bf16.mxu0 %v6656_v58  ;;  %v6662_v5 = vld [vmem:[#allocation17 + $0x74] ss:$8 sps:$4 sm:$0xff]  }
 0x75f   : > { %v7038_v8 = vpop.eup %7037  ;;  %2713 = vmatmul.mubr.bf16.gmra.mrb[116].mxu1 %v2627_v45  ;;  %v6665_v45 = vld [vmem:[#allocation17 + $0x84] ss:$8 sps:$4 sm:$0xff]  }
 0x760   : > { %v7040_v41 = vpop.eup %7039  ;;  %2722 = vmatprep.mubr.bf16.mxu1 %v9374_v33  ;;  %v2939_v22 = vpop.xlane.xlu1 %2938  ;;  %v2619_v25 = vmul.f32 %v7038_v8, %v8834_v12 }
 0x761   : > { %v2618_v54 = vmul.f32 %v7040_v41, %v8830_v11  ;;  %7045 = vrcp.f32 %v2939_v22  ;;  %3452 = vmatpush1.bf16.msra.mxu0 %v6654_v19  ;;  %v6666_v22 = vld [vmem:[#allocation17 + $0x90] ss:$8 sps:$4 sm:$0xff]   ;;  %v6671_v19 = vld [vmem:[#allocation17 + $0xa4] ss:$8 sps:$4 sm:$0xff]  }
 0x762   : > { %7047 = vrcp.f32 %v2937_v46  ;;  %3453 = vmatprep.subr.bf16.mxu0 %v6659_v13  ;;  %v2941_v11 = vpop.xlane.xlu0 %2940 }
 0x763   : > { %v2628_v3 = vpack.c.bf16 %v2619_v25, %v2618_v54  ;;  %v6669_v54 = vld [vmem:[#allocation17 + $0xa0] ss:$8 sps:$4 sm:$0xff]  }
 0x764   : > { %v2943_v12 = vpop.xlane.xlu1 %2942 }
 0x765   : > { %3454 = vmatpush1.bf16.msra.mxu0 %v6657_v1  ;;  %7049 = vrcp.f32 %v2943_v12  ;;  %v6675_v12 = vld [vmem:[#allocation17 + $0xc0] ss:$8 sps:$4 sm:$0xff]  }
 0x766   : > { %3455 = vmatprep.subr.bf16.mxu0 %v6662_v5  ;;  %7051 = vrcp.f32 %v2941_v11  ;;  %v2945_v24 = vpop.xlane.xlu0 %2944  ;;  %v6680_v5 = vld [vmem:[#allocation17 + $0xd4] ss:$8 sps:$4 sm:$0xff]  }
 0x767   : > { %v7042_v10 = vpop.eup %7041  ;;  %2723 = vmatmul.mubr.bf16.gmra.mrb[120].mxu1 %v2628_v3 }
 0x768   : > { %v7044_v28 = vpop.eup %7043  ;;  %2732 = vmatprep.mubr.bf16.mxu1 %v9374_v33  ;;  %v2621_v9 = vmul.f32 %v7042_v10, %v8844_v55  ;;  %v6668_v55 = vld [vmem:[#allocation17 + $0x94] ss:$8 sps:$4 sm:$0xff]   ;;  %v2947_v39 = vpop.xlane.xlu1 %2946  ;;  %v6672_v10 = vld [vmem:[#allocation17 + $0xb0] ss:$8 sps:$4 sm:$0xff]  }
 0x769   : > { %v2620_v42 = vmul.f32 %v7044_v28, %v8840_v60  ;;  %3456 = vmatpush1.bf16.msra.mxu0 %v6660_v59  ;;  %7053 = vrcp.f32 %v2947_v39  ;;  %v6677_v28 = vld [vmem:[#allocation17 + $0xc4] ss:$8 sps:$4 sm:$0xff]  }
 0x76a   : > { %3457 = vmatprep.subr.bf16.mxu0 %v6665_v45  ;;  %7055 = vrcp.f32 %v2945_v24 }
 0x76b   : > { %v2629_v48 = vpack.c.bf16 %v2621_v9, %v2620_v42  ;;  %v7046_v44 = vpop.eup %7045  ;;  %v6683_v42 = vld [vmem:[#allocation17 + $0xe4] ss:$8 sps:$4 sm:$0xff]  }
 0x76c   : > { %v7048_v8 = vpop.eup %7047  ;;  %v2985_v41 = vmul.f32 %v7046_v44, %v8850_v14  ;;  %v6674_v14 = vld [vmem:[#allocation17 + $0xb4] ss:$8 sps:$4 sm:$0xff]  }
 0x76d   : > { %v2984_v60 = vmul.f32 %v7048_v8, %v8847_v17  ;;  %3458 = vmatpush1.bf16.msra.mxu0 %v6663_v40  ;;  %v6686_v44 = vld [vmem:[#allocation17 + $0xf4] ss:$8 sps:$4 sm:$0xff]   ;;  %v6684_v40 = vld [vmem:[#allocation17 + $0xf0] ss:$8 sps:$4 sm:$0xff]  }
 0x76e   : > { %3459 = vmatprep.subr.bf16.mxu0 %v6668_v55 }
 0x76f   : > { %2733 = vmatmul.mubr.bf16.gmra.mrb[124].mxu1 %v2629_v48  ;;  %v3000_v25 = vpack.c.bf16 %v2985_v41, %v2984_v60  ;;  %v7050_v46 = vpop.eup %7049  ;;  %v6681_v48 = vld [vmem:[#allocation17 + $0xe0] ss:$8 sps:$4 sm:$0xff]  }
 0x770   : > { %3040 = vmatprep.mubr.bf16.mxu1 %v9374_v33  ;;  %v7052_v58 = vpop.eup %7051  ;;  %v2987_v3 = vmul.f32 %v7050_v46, %v8856_v32 }
 0x771   : > { %3460 = vmatpush1.bf16.msra.mxu0 %v6666_v22  ;;  %v2986_v17 = vmul.f32 %v7052_v58, %v8853_v62  ;;  %v6678_v62 = vld [vmem:[#allocation17 + $0xd0] ss:$8 sps:$4 sm:$0xff]  }
 0x772   : > { %3461 = vmatprep.subr.bf16.mxu0 %v6671_v19 }
 0x773   : > { %v3001_v1 = vpack.c.bf16 %v2987_v3, %v2986_v17  ;;  %v7054_v13 = vpop.eup %7053 }
 0x774   : > { %v7056_v9 = vpop.eup %7055  ;;  %v2989_v11 = vmul.f32 %v7054_v13, %v8862_v36 }
 0x775   : > { %3462 = vmatpush1.bf16.msra.mxu0 %v6669_v54  ;;  %v2988_v32 = vmul.f32 %v7056_v9, %v8859_v27 }
 0x776   : > { %3463 = vmatprep.subr.bf16.mxu0 %v6674_v14 }
 0x777   : > { %3041 = vmatmul.mubr.bf16.vlgmr.msra.gmra.mrb[128].mxu1 %v3000_v25  ;;  %v3002_v59 = vpack.c.bf16 %v2989_v11, %v2988_v32 }
 0x778   : > { %3050 = vmatprep.mubr.bf16.mxu1 %v9374_v33 }
 0x779   : > { %3464 = vmatpush1.bf16.msra.mxu0 %v6672_v10 }
 0x77a   : > { %3465 = vmatprep.subr.bf16.mxu0 %v6677_v28 }
 0x77d   : > { %3466 = vmatpush1.bf16.msra.mxu0 %v6675_v12 }
 0x77e   : > { %3467 = vmatprep.subr.bf16.mxu0 %v6680_v5 }
 0x77f   : > { %3051 = vmatmul.mubr.bf16.gmra.mrb[132].mxu1 %v3001_v1 }
 0x780   : > { %3060 = vmatprep.mubr.bf16.mxu1 %v9374_v33 }
 0x781   : > { %3468 = vmatpush1.bf16.msra.mxu0 %v6678_v62 }
 0x782   : > { %3469 = vmatprep.subr.bf16.mxu0 %v6683_v42 }
 0x785   : > { %3470 = vmatpush1.bf16.msra.mxu0 %v6681_v48 }
 0x786   : > { %3471 = vmatprep.subr.bf16.mxu0 %v6686_v44 }
 0x787   : > { %3061 = vmatmul.mubr.bf16.gmra.mrb[136].mxu1 %v3002_v59 }
 0x788   : > { %3070 = vmatprep.mubr.bf16.mxu1 %v9374_v33 }
 0x789   : > { %3472 = vmatpush1.bf16.msra.mxu0 %v6684_v40 }
 0x7c3   : > { %v2949_v45 = vpop.xlane.xlu0 %2948 }
 0x7c4   : > { %7057 = vrcp.f32 %v2949_v45 }
 0x7c7   : > { %v2951_v36 = vpop.xlane.xlu1 %2950 }
 0x7c8   : > { %7059 = vrcp.f32 %v2951_v36 }
 0x7cb   : > { %v2953_v27 = vpop.xlane.xlu0 %2952 }
 0x7cc   : > { %7061 = vrcp.f32 %v2953_v27  ;;  %v6687_v27 = vld [vmem:[#allocation15] ss:$8 sps:$4 sm:$0xff]  }
 0x7ce   : > { %v7058_v55 = vpop.eup %7057 }
 0x7cf   : > { %v2955_v8 = vpop.xlane.xlu1 %2954  ;;  %v2990_v60 = vmul.f32 %v7058_v55, %v8871_v7  ;;  %v6695_v55 = vld [vmem:[#allocation15 + $0x24] ss:$8 sps:$4 sm:$0xff]  }
 0x7d0   : > { %7063 = vrcp.f32 %v2955_v8  ;;  %v6690_v8 = vld [vmem:[#allocation15 + $0x10] ss:$8 sps:$4 sm:$0xff]  }
 0x7d2   : > { %v7060_v41 = vpop.eup %7059 }
 0x7d3   : > { %v2957_v39 = vpop.xlane.xlu0 %2956  ;;  %v2991_v24 = vmul.f32 %v7060_v41, %v8878_v61  ;;  %v6689_v61 = vld [vmem:[#allocation15 + $0x4] ss:$8 sps:$4 sm:$0xff]  }
 0x7d4   : > { %7065 = vrcp.f32 %v2957_v39  ;;  %3794 = vmatprep.subr.bf16.mxu0 %v6689_v61 }
 0x7d5   : > { %v3003_v22 = vpack.c.bf16 %v2991_v24, %v2990_v60  ;;  %v6693_v24 = vld [vmem:[#allocation15 + $0x20] ss:$8 sps:$4 sm:$0xff]  }
 0x7d6   : > { %v7062_v46 = vpop.eup %7061 }
 0x7d7   : > { %v2959_v25 = vpop.xlane.xlu1 %2958  ;;  %3071 = vmatmul.mubr.bf16.gmra.mrb[140].mxu1 %v3003_v22  ;;  %v2992_v58 = vmul.f32 %v7062_v46, %v8886_v47  ;;  %v6698_v22 = vld [vmem:[#allocation15 + $0x34] ss:$8 sps:$4 sm:$0xff]   ;;  %v6696_v46 = vld [vmem:[#allocation15 + $0x30] ss:$8 sps:$4 sm:$0xff]  }
 0x7d8   : > { %7067 = vrcp.f32 %v2959_v25  ;;  %3080 = vmatprep.mubr.bf16.mxu1 %v9374_v33 }
 0x7da   : > { %v7064_v54 = vpop.eup %7063 }
 0x7db   : > { %v2993_v14 = vmul.f32 %v7064_v54, %v8892_v56 }
 0x7dc   : > { %v2961_v19 = vpop.xlane.xlu0 %2960 }
 0x7dd   : > { %v3004_v3 = vpack.c.bf16 %v2993_v14, %v2992_v58  ;;  %7069 = vrcp.f32 %v2961_v19  ;;  %v6701_v19 = vld [vmem:[#allocation15 + $0x44] ss:$8 sps:$4 sm:$0xff]  }
 0x7de   : > { %v7066_v7 = vpop.eup %7065 }
 0x7df   : > { %v2963_v17 = vpop.xlane.xlu1 %2962  ;;  %3081 = vmatmul.mubr.bf16.gmra.mrb[144].mxu1 %v3004_v3  ;;  %v2994_v1 = vmul.f32 %v7066_v7, %v8900_v4  ;;  %v6699_v7 = vld [vmem:[#allocation15 + $0x40] ss:$8 sps:$4 sm:$0xff]  }
 0x7e0   : > { %7071 = vrcp.f32 %v2963_v17  ;;  %3090 = vmatprep.mubr.bf16.mxu1 %v9374_v33 }
 0x7e2   : > { %v7068_v10 = vpop.eup %7067 }
 0x7e3   : > { %v2995_v13 = vmul.f32 %v7068_v10, %v8907_v52 }
 0x7e4   : > { %v2965_v28 = vpop.xlane.xlu0 %2964 }
 0x7e5   : > { %v3005_v12 = vpack.c.bf16 %v2995_v13, %v2994_v1  ;;  %7073 = vrcp.f32 %v2965_v28 }
 0x7e7   : > { %v2967_v47 = vpop.xlane.xlu1 %2966  ;;  %3091 = vmatmul.mubr.bf16.gmra.mrb[148].mxu1 %v3005_v12  ;;  %v7070_v56 = vpop.eup %7069 }
 0x7e8   : > { %7075 = vrcp.f32 %v2967_v47  ;;  %3100 = vmatprep.mubr.bf16.mxu1 %v9374_v33  ;;  %v2996_v5 = vmul.f32 %v7070_v56, %v8915_v31 }
 0x7ea   : > { %v7072_v9 = vpop.eup %7071 }
 0x7eb   : > { %v2997_v11 = vmul.f32 %v7072_v9, %v8921_v6  ;;  %v6692_v6 = vld [vmem:[#allocation15 + $0x14] ss:$8 sps:$4 sm:$0xff]  }
 0x7ed   : > { %v3006_v32 = vpack.c.bf16 %v2997_v11, %v2996_v5 }
 0x7ef   : > { %3101 = vmatmul.mubr.bf16.gmra.mrb[152].mxu1 %v3006_v32  ;;  %v7074_v62 = vpop.eup %7073  ;;  %v6704_v32 = vld [vmem:[#allocation15 + $0x54] ss:$8 sps:$4 sm:$0xff]  }
 0x7f0   : > { %3110 = vmatprep.mubr.bf16.mxu1 %v9374_v33  ;;  %v2998_v52 = vmul.f32 %v7074_v62, %v8928_v0 }
 0x7f2   : > { %v7076_v4 = vpop.eup %7075 }
 0x7f3   : > { %v2999_v42 = vmul.f32 %v7076_v4, %v8932_v57  ;;  %v6702_v4 = vld [vmem:[#allocation15 + $0x50] ss:$8 sps:$4 sm:$0xff]  }
 0x7f5   : > { %v3007_v59 = vpack.c.bf16 %v2999_v42, %v2998_v52  ;;  %v6705_v52 = vld [vmem:[#allocation15 + $0x60] ss:$8 sps:$4 sm:$0xff]   ;;  %v6707_v42 = vld [vmem:[#allocation15 + $0x64] ss:$8 sps:$4 sm:$0xff]  }
 0x7f7   : > { %3111 = vmatmul.mubr.bf16.gmra.mrb[156].mxu1 %v3007_v59 }
 0x809   : > { %v2664_v48 = vpop.f32.mrb[96].mxu1 }
 0x80a   : > { %v2666_v44 = vpop.f32.mrb[97].mxu1 }
 0x80b   : > { %v2668_v40 = vpop.f32.mrb[98].mxu1 }
 0x80c   : > { %v3121_v45 = vpack.c.bf16 %v2668_v40, %v2664_v48  ;;  %v2670_v36 = vpop.f32.mrb[99].mxu1 }
 0x80d   : > { %v3122_v31 = vpack.c.bf16 %v2670_v36, %v2666_v44  ;;  %v6710_v36 = vld [vmem:[#allocation15 + $0x74] ss:$8 sps:$4 sm:$0xff]  }
 0x80f   : > { %3473 = vmatprep.mubr.bf16.mxu0 %v3122_v31 }
 0x810   : > { %3474 = vmatmul.mubr.bf16.vlgmr.msra.gmra.mrb[160].mxu0 %v3121_v45 }
 0x811   : > { %3795 = vmatpush1.bf16.msra.mxu0 %v6687_v27  ;;  %v6708_v27 = vld [vmem:[#allocation15 + $0x70] ss:$8 sps:$4 sm:$0xff]  }
 0x812   : > { %v2674_v33 = vpop.f32.mrb[100].mxu1  ;;  %3796 = vmatprep.subr.bf16.mxu0 %v6692_v6  ;;  %v6711_v6 = vld [vmem:[#allocation15 + $0x80] ss:$8 sps:$4 sm:$0xff]  }
 0x813   : > { %v2676_v0 = vpop.f32.mrb[101].mxu1 }
 0x814   : > { %v2678_v41 = vpop.f32.mrb[102].mxu1 }
 0x815   : > { %v3123_v57 = vpack.c.bf16 %v2678_v41, %v2674_v33  ;;  %v2680_v39 = vpop.f32.mrb[103].mxu1  ;;  %3797 = vmatpush1.bf16.msra.mxu0 %v6690_v8  ;;  %v6713_v8 = vld [vmem:[#allocation15 + $0x84] ss:$8 sps:$4 sm:$0xff]  }
 0x816   : > { %v3124_v60 = vpack.c.bf16 %v2680_v39, %v2676_v0  ;;  %3798 = vmatprep.subr.bf16.mxu0 %v6695_v55  ;;  %v6716_v39 = vld [vmem:[#allocation15 + $0x94] ss:$8 sps:$4 sm:$0xff]  }
 0x818   : > { %3483 = vmatprep.mubr.bf16.mxu0 %v3124_v60 }
 0x819   : > { %3484 = vmatmul.mubr.bf16.gmra.mrb[164].mxu0 %v3123_v57 }
 0x81a   : > { %v2684_v25 = vpop.f32.mrb[104].mxu1  ;;  %3799 = vmatpush1.bf16.msra.mxu0 %v6693_v24  ;;  %v6714_v24 = vld [vmem:[#allocation15 + $0x90] ss:$8 sps:$4 sm:$0xff]  }
 0x81b   : > { %v2686_v54 = vpop.f32.mrb[105].mxu1  ;;  %3800 = vmatprep.subr.bf16.mxu0 %v6698_v22  ;;  %v6717_v22 = vld [vmem:[#allocation15 + $0xa0] ss:$8 sps:$4 sm:$0xff]  }
 0x81c   : > { %v2688_v58 = vpop.f32.mrb[106].mxu1 }
 0x81d   : > { %v3125_v14 = vpack.c.bf16 %v2688_v58, %v2684_v25  ;;  %v2690_v3 = vpop.f32.mrb[107].mxu1  ;;  %v6719_v25 = vld [vmem:[#allocation15 + $0xa4] ss:$8 sps:$4 sm:$0xff]  }
 0x81e   : > { %v3126_v17 = vpack.c.bf16 %v2690_v3, %v2686_v54  ;;  %3801 = vmatpush1.bf16.msra.mxu0 %v6696_v46  ;;  %v6722_v3 = vld [vmem:[#allocation15 + $0xb4] ss:$8 sps:$4 sm:$0xff]  }
 0x81f   : > { %3802 = vmatprep.subr.bf16.mxu0 %v6701_v19 }
 0x820   : > { %3493 = vmatprep.mubr.bf16.mxu0 %v3126_v17 }
 0x821   : > { %3494 = vmatmul.mubr.bf16.gmra.mrb[168].mxu0 %v3125_v14 }
 0x822   : > { %v2694_v61 = vpop.f32.mrb[108].mxu1  ;;  %3803 = vmatpush1.bf16.msra.mxu0 %v6699_v7  ;;  %v6720_v7 = vld [vmem:[#allocation15 + $0xb0] ss:$8 sps:$4 sm:$0xff]  }
 0x823   : > { %v2696_v10 = vpop.f32.mrb[109].mxu1  ;;  %3804 = vmatprep.subr.bf16.mxu0 %v6704_v32  ;;  %v6731_v32 = vld [vmem:[#allocation15 + $0xe4] ss:$8 sps:$4 sm:$0xff]  }
 0x824   : > { %v2698_v28 = vpop.f32.mrb[110].mxu1 }
 0x825   : > { %v3127_v1 = vpack.c.bf16 %v2698_v28, %v2694_v61  ;;  %v2700_v13 = vpop.f32.mrb[111].mxu1  ;;  %v6723_v61 = vld [vmem:[#allocation15 + $0xc0] ss:$8 sps:$4 sm:$0xff]  }
 0x826   : > { %v3128_v12 = vpack.c.bf16 %v2700_v13, %v2696_v10  ;;  %3805 = vmatpush1.bf16.msra.mxu0 %v6702_v4  ;;  %v6725_v10 = vld [vmem:[#allocation15 + $0xc4] ss:$8 sps:$4 sm:$0xff]   ;;  %v6734_v4 = vld [vmem:[#allocation15 + $0xf4] ss:$8 sps:$4 sm:$0xff]  }
 0x827   : > { %3806 = vmatprep.subr.bf16.mxu0 %v6707_v42 }
 0x828   : > { %3503 = vmatprep.mubr.bf16.mxu0 %v3128_v12 }
 0x829   : > { %3504 = vmatmul.mubr.bf16.gmra.mrb[172].mxu0 %v3127_v1 }
 0x82a   : > { %v2704_v47 = vpop.f32.mrb[112].mxu1  ;;  %3807 = vmatpush1.bf16.msra.mxu0 %v6705_v52 }
 0x82b   : > { %v2706_v56 = vpop.f32.mrb[113].mxu1  ;;  %3808 = vmatprep.subr.bf16.mxu0 %v6710_v36 }
 0x82c   : > { %v2708_v9 = vpop.f32.mrb[114].mxu1 }
 0x82d   : > { %v3129_v5 = vpack.c.bf16 %v2708_v9, %v2704_v47  ;;  %v2710_v11 = vpop.f32.mrb[115].mxu1 }
 0x82e   : > { %v3130_v62 = vpack.c.bf16 %v2710_v11, %v2706_v56  ;;  %3809 = vmatpush1.bf16.msra.mxu0 %v6708_v27  ;;  %v6728_v56 = vld [vmem:[#allocation15 + $0xd4] ss:$8 sps:$4 sm:$0xff]   ;;  %v6729_v11 = vld [vmem:[#allocation15 + $0xe0] ss:$8 sps:$4 sm:$0xff]  }
 0x82f   : > { %3810 = vmatprep.subr.bf16.mxu0 %v6713_v8 }
 0x830   : > { %3513 = vmatprep.mubr.bf16.mxu0 %v3130_v62 }
 0x831   : > { %3514 = vmatmul.mubr.bf16.gmra.mrb[176].mxu0 %v3129_v5  ;;  %v6726_v5 = vld [vmem:[#allocation15 + $0xd0] ss:$8 sps:$4 sm:$0xff]  }
 0x832   : > { %v2714_v59 = vpop.f32.mrb[116].mxu1  ;;  %3811 = vmatpush1.bf16.msra.mxu0 %v6711_v6 }
 0x833   : > { %v2716_v48 = vpop.f32.mrb[117].mxu1  ;;  %3812 = vmatprep.subr.bf16.mxu0 %v6716_v39 }
 0x834   : > { %v2718_v44 = vpop.f32.mrb[118].mxu1 }
 0x835   : > { %v3131_v40 = vpack.c.bf16 %v2718_v44, %v2714_v59  ;;  %v2720_v45 = vpop.f32.mrb[119].mxu1  ;;  %v6732_v59 = vld [vmem:[#allocation15 + $0xf0] ss:$8 sps:$4 sm:$0xff]  }
 0x836   : > { %v3132_v31 = vpack.c.bf16 %v2720_v45, %v2716_v48  ;;  %3813 = vmatpush1.bf16.msra.mxu0 %v6714_v24 }
 0x837   : > { %3814 = vmatprep.subr.bf16.mxu0 %v6719_v25 }
 0x838   : > { %3523 = vmatprep.mubr.bf16.mxu0 %v3132_v31 }
 0x839   : > { %3524 = vmatmul.mubr.bf16.gmra.mrb[180].mxu0 %v3131_v40 }
 0x83a   : > { %v2724_v33 = vpop.f32.mrb[120].mxu1  ;;  %3815 = vmatpush1.bf16.msra.mxu0 %v6717_v22 }
 0x83b   : > { %v2726_v55 = vpop.f32.mrb[121].mxu1  ;;  %3816 = vmatprep.subr.bf16.mxu0 %v6722_v3 }
 0x83c   : > { %v2728_v0 = vpop.f32.mrb[122].mxu1 }
 0x83d   : > { %v3133_v41 = vpack.c.bf16 %v2728_v0, %v2724_v33  ;;  %v2730_v57 = vpop.f32.mrb[123].mxu1 }
 0x83e   : > { %v3134_v60 = vpack.c.bf16 %v2730_v57, %v2726_v55  ;;  %3817 = vmatpush1.bf16.msra.mxu0 %v6720_v7 }
 0x83f   : > { %3818 = vmatprep.subr.bf16.mxu0 %v6725_v10 }
 0x840   : > { %3533 = vmatprep.mubr.bf16.mxu0 %v3134_v60 }
 0x841   : > { %3534 = vmatmul.mubr.bf16.gmra.mrb[184].mxu0 %v3133_v41 }
 0x842   : > { %v2734_v46 = vpop.f32.mrb[124].mxu1  ;;  %3819 = vmatpush1.bf16.msra.mxu0 %v6723_v61 }
 0x843   : > { %v2736_v54 = vpop.f32.mrb[125].mxu1  ;;  %3820 = vmatprep.subr.bf16.mxu0 %v6728_v56 }
 0x844   : > { %v2738_v19 = vpop.f32.mrb[126].mxu1 }
 0x845   : > { %v3135_v58 = vpack.c.bf16 %v2738_v19, %v2734_v46  ;;  %v2740_v14 = vpop.f32.mrb[127].mxu1 }
 0x846   : > { %v3136_v17 = vpack.c.bf16 %v2740_v14, %v2736_v54  ;;  %3821 = vmatpush1.bf16.msra.mxu0 %v6726_v5 }
 0x847   : > { %3822 = vmatprep.subr.bf16.mxu0 %v6731_v32 }
 0x848   : > { %3543 = vmatprep.mubr.bf16.mxu0 %v3136_v17 }
 0x849   : > { %3544 = vmatmul.mubr.bf16.gmra.mrb[188].mxu0 %v3135_v58 }
 0x84a   : > { %v3042_v28 = vpop.f32.mrb[128].mxu1  ;;  %3823 = vmatpush1.bf16.msra.mxu0 %v6729_v11 }
 0x84b   : > { %v3044_v1 = vpop.f32.mrb[129].mxu1  ;;  %3824 = vmatprep.subr.bf16.mxu0 %v6734_v4  ;;  %v6737_v4 = vld [vmem:[#allocation18 + $0x4] ss:$8 sps:$4 sm:$0xff]  }
 0x84c   : > { %v3046_v13 = vpop.f32.mrb[130].mxu1  ;;  %4363 = vmatprep.subr.bf16.mxu1 %v6737_v4 }
 0x84d   : > { %v3153_v12 = vpack.c.bf16 %v3046_v13, %v3042_v28  ;;  %v3048_v47 = vpop.f32.mrb[131].mxu1 }
 0x84e   : > { %v3154_v9 = vpack.c.bf16 %v3048_v47, %v3044_v1  ;;  %3825 = vmatpush1.bf16.msra.mxu0 %v6732_v59  ;;  %v6743_v59 = vld [vmem:[#allocation18 + $0x24] ss:$8 sps:$4 sm:$0xff]  }
 0x850   : > { %3553 = vmatprep.mubr.bf16.mxu0 %v3154_v9 }
 0x851   : > { %3554 = vmatmul.mubr.bf16.gmra.mrb[192].mxu0 %v3153_v12 }
 0x852   : > { %v3052_v62 = vpop.f32.mrb[132].mxu1 }
 0x853   : > { %v3054_v52 = vpop.f32.mrb[133].mxu1 }
 0x854   : > { %v3056_v42 = vpop.f32.mrb[134].mxu1 }
 0x855   : > { %v3155_v48 = vpack.c.bf16 %v3056_v42, %v3052_v62  ;;  %v3058_v44 = vpop.f32.mrb[135].mxu1  ;;  %v6735_v62 = vld [vmem:[#allocation18] ss:$8 sps:$4 sm:$0xff]   ;;  %v6738_v42 = vld [vmem:[#allocation18 + $0x10] ss:$8 sps:$4 sm:$0xff]  }
 0x856   : > { %v3156_v40 = vpack.c.bf16 %v3058_v44, %v3054_v52  ;;  %v6740_v52 = vld [vmem:[#allocation18 + $0x14] ss:$8 sps:$4 sm:$0xff]   ;;  %4364 = vmatpush1.bf16.msra.mxu1 %v6735_v62 }
 0x857   : > { %4365 = vmatprep.subr.bf16.mxu1 %v6740_v52  ;;  %v6746_v44 = vld [vmem:[#allocation18 + $0x34] ss:$8 sps:$4 sm:$0xff]  }
 0x858   : > { %3563 = vmatprep.mubr.bf16.mxu0 %v3156_v40  ;;  %v6744_v40 = vld [vmem:[#allocation18 + $0x30] ss:$8 sps:$4 sm:$0xff]  }
 0x859   : > { %3564 = vmatmul.mubr.bf16.gmra.mrb[196].mxu0 %v3155_v48  ;;  %v6741_v48 = vld [vmem:[#allocation18 + $0x20] ss:$8 sps:$4 sm:$0xff]  }
 0x85a   : > { %v3062_v45 = vpop.f32.mrb[136].mxu1  ;;  %4366 = vmatpush1.bf16.msra.mxu1 %v6738_v42 }
 0x85b   : > { %v3064_v36 = vpop.f32.mrb[137].mxu1  ;;  %4367 = vmatprep.subr.bf16.mxu1 %v6743_v59 }
 0x85c   : > { %v3066_v31 = vpop.f32.mrb[138].mxu1 }
 0x85d   : > { %v3157_v27 = vpack.c.bf16 %v3066_v31, %v3062_v45  ;;  %v3068_v6 = vpop.f32.mrb[139].mxu1  ;;  %v6749_v45 = vld [vmem:[#allocation18 + $0x44] ss:$8 sps:$4 sm:$0xff]   ;;  %v6750_v31 = vld [vmem:[#allocation18 + $0x50] ss:$8 sps:$4 sm:$0xff]  }
 0x85e   : > { %v3158_v8 = vpack.c.bf16 %v3068_v6, %v3064_v36  ;;  %4368 = vmatpush1.bf16.msra.mxu1 %v6741_v48  ;;  %v6752_v36 = vld [vmem:[#allocation18 + $0x54] ss:$8 sps:$4 sm:$0xff]   ;;  %v6756_v6 = vld [vmem:[#allocation18 + $0x70] ss:$8 sps:$4 sm:$0xff]  }
 0x85f   : > { %4369 = vmatprep.subr.bf16.mxu1 %v6746_v44 }
 0x860   : > { %3573 = vmatprep.mubr.bf16.mxu0 %v3158_v8  ;;  %v6759_v8 = vld [vmem:[#allocation18 + $0x80] ss:$8 sps:$4 sm:$0xff]  }
 0x861   : > { %3574 = vmatmul.mubr.bf16.gmra.mrb[200].mxu0 %v3157_v27  ;;  %v6753_v27 = vld [vmem:[#allocation18 + $0x60] ss:$8 sps:$4 sm:$0xff]  }
 0x862   : > { %4370 = vmatpush1.bf16.msra.mxu1 %v6744_v40 }
 0x863   : > { %4371 = vmatprep.subr.bf16.mxu1 %v6749_v45 }
 0x8aa   : > { %v3072_v33 = vpop.f32.mrb[140].mxu1 }
 0x8ab   : > { %v3074_v55 = vpop.f32.mrb[141].mxu1 }
 0x8ac   : > { %v3076_v0 = vpop.f32.mrb[142].mxu1 }
 0x8ad   : > { %v3159_v41 = vpack.c.bf16 %v3076_v0, %v3072_v33  ;;  %v3078_v57 = vpop.f32.mrb[143].mxu1  ;;  %v6762_v33 = vld [vmem:[#allocation18 + $0x90] ss:$8 sps:$4 sm:$0xff]  }
 0x8ae   : > { %v3160_v39 = vpack.c.bf16 %v3078_v57, %v3074_v55  ;;  %v6765_v55 = vld [vmem:[#allocation18 + $0xa0] ss:$8 sps:$4 sm:$0xff]   ;;  %v6768_v0 = vld [vmem:[#allocation18 + $0xb0] ss:$8 sps:$4 sm:$0xff]  }
 0x8af   : > { %v6774_v57 = vld [vmem:[#allocation18 + $0xd0] ss:$8 sps:$4 sm:$0xff]  }
 0x8b0   : > { %3583 = vmatprep.mubr.bf16.mxu0 %v3160_v39  ;;  %v9381_v39 = vld [vmem:[#allocation45_spill] sm:$0xff] }
 0x8b1   : > { %3584 = vmatmul.mubr.bf16.gmra.mrb[204].mxu0 %v3159_v41  ;;  %v6771_v41 = vld [vmem:[#allocation18 + $0xc0] ss:$8 sps:$4 sm:$0xff]  }
 0x8b2   : > { %v3082_v60 = vpop.f32.mrb[144].mxu1 }
 0x8b3   : > { %v3084_v24 = vpop.f32.mrb[145].mxu1 }
 0x8b4   : > { %v3086_v22 = vpop.f32.mrb[146].mxu1 }
 0x8b5   : > { %v3161_v25 = vpack.c.bf16 %v3086_v22, %v3082_v60  ;;  %v3088_v46 = vpop.f32.mrb[147].mxu1  ;;  %v9386_v60 = vld [vmem:[#allocation52_spill] sm:$0xff]  ;;  %v9388_v22 = vld [vmem:[#allocation54_spill] sm:$0xff] }
 0x8b6   : > { %v3162_v54 = vpack.c.bf16 %v3088_v46, %v3084_v24  ;;  %v9387_v24 = vld [vmem:[#allocation51_spill] sm:$0xff]  ;;  %v3987_v46 = vld [vmem:[%s9390_s12] sm:$0x3] }
 0x8b8   : > { %3593 = vmatprep.mubr.bf16.mxu0 %v3162_v54  ;;  %v9391_v54 = vld [vmem:[#allocation38_spill] sm:$0xff] }
 0x8b9   : > { %3594 = vmatmul.mubr.bf16.gmra.mrb[208].mxu0 %v3161_v25  ;;  %v9389_v25 = vld [vmem:[#allocation53_spill] sm:$0xff] }
 0x8ba   : > { %v3092_v19 = vpop.f32.mrb[148].mxu1 }
 0x8bb   : > { %v3094_v58 = vpop.f32.mrb[149].mxu1 }
 0x8bc   : > { %v3096_v14 = vpop.f32.mrb[150].mxu1 }
 0x8bd   : > { %v3163_v3 = vpack.c.bf16 %v3096_v14, %v3092_v19  ;;  %v3098_v17 = vpop.f32.mrb[151].mxu1  ;;  %v9003_v19 = vrot.slane %v3987_v46, %v9391_v54 }
 0x8be   : > { %v3164_v7 = vpack.c.bf16 %v3098_v17, %v3094_v58  ;;  %v9392_v58 = vld [vmem:[#allocation39_spill] sm:$0xff] }
 0x8bf   : > { %v9006_v14 = vrot.slane %v3987_v46, %v9392_v58 }
 0x8c0   : > { %3603 = vmatprep.mubr.bf16.mxu0 %v3164_v7 }
 0x8c1   : > { %3604 = vmatmul.mubr.bf16.gmra.mrb[212].mxu0 %v3163_v3 }
 0x8c2   : > { %v3102_v61 = vpop.f32.mrb[152].mxu1 }
 0x8c3   : > { %v3104_v10 = vpop.f32.mrb[153].mxu1 }
 0x8c4   : > { %v3106_v28 = vpop.f32.mrb[154].mxu1 }
 0x8c5   : > { %v3165_v1 = vpack.c.bf16 %v3106_v28, %v3102_v61  ;;  %v3108_v13 = vpop.f32.mrb[155].mxu1 }
 0x8c6   : > { %v3166_v12 = vpack.c.bf16 %v3108_v13, %v3104_v10 }
 0x8c8   : > { %3613 = vmatprep.mubr.bf16.mxu0 %v3166_v12 }
 0x8c9   : > { %3614 = vmatmul.mubr.bf16.gmra.mrb[216].mxu0 %v3165_v1 }
 0x8ca   : > { %v3112_v47 = vpop.f32.mrb[156].mxu1 }
 0x8cb   : > { %v3114_v56 = vpop.f32.mrb[157].mxu1 }
 0x8cc   : > { %v3116_v9 = vpop.f32.mrb[158].mxu1 }
 0x8cd   : > { %v3167_v5 = vpack.c.bf16 %v3116_v9, %v3112_v47  ;;  %v3118_v11 = vpop.f32.mrb[159].mxu1 }
 0x8ce   : > { %v3168_v32 = vpack.c.bf16 %v3118_v11, %v3114_v56 }
 0x8d0   : > { %3623 = vmatprep.mubr.bf16.mxu0 %v3168_v32 }
 0x8d1   : > { %3624 = vmatmul.mubr.bf16.gmra.mrb[220].mxu0 %v3167_v5 }
 0x8d2   : > { %3826 = vmatprep.mubr.bf16.mxu0 %v8255_v23  ;;  %v6747_v23 = vld [vmem:[#allocation18 + $0x40] ss:$8 sps:$4 sm:$0xff]  }
 0x8d3   : > { %4372 = vmatpush1.bf16.msra.mxu1 %v6747_v23 }
 0x8d4   : > { %4373 = vmatprep.subr.bf16.mxu1 %v6752_v36 }
 0x8d7   : > { %4374 = vmatpush1.bf16.msra.mxu1 %v6750_v31 }
 0x8d9   : > { %3827 = vmatmul.mubr.bf16.vlgmr.msra.gmra.mrb[160].mxu0 %v8253_v21  ;;  %v6755_v21 = vld [vmem:[#allocation18 + $0x64] ss:$8 sps:$4 sm:$0xff]  }
 0x8da   : > { %3836 = vmatprep.mubr.bf16.mxu0 %v8265_v37  ;;  %4375 = vmatprep.subr.bf16.mxu1 %v6755_v21  ;;  %v6758_v37 = vld [vmem:[#allocation18 + $0x74] ss:$8 sps:$4 sm:$0xff]  }
 0x8db   : > { %4376 = vmatpush1.bf16.msra.mxu1 %v6753_v27 }
 0x8dc   : > { %4377 = vmatprep.subr.bf16.mxu1 %v6758_v37 }
 0x8df   : > { %4378 = vmatpush1.bf16.msra.mxu1 %v6756_v6 }
 0x8e1   : > { %3837 = vmatmul.mubr.bf16.gmra.mrb[164].mxu0 %v8263_v35  ;;  %v6761_v35 = vld [vmem:[#allocation18 + $0x84] ss:$8 sps:$4 sm:$0xff]  }
 0x8e2   : > { %3846 = vmatprep.mubr.bf16.mxu0 %v8275_v51  ;;  %4379 = vmatprep.subr.bf16.mxu1 %v6761_v35  ;;  %v6764_v51 = vld [vmem:[#allocation18 + $0x94] ss:$8 sps:$4 sm:$0xff]  }
 0x8e3   : > { %4380 = vmatpush1.bf16.msra.mxu1 %v6759_v8 }
 0x8e4   : > { %4381 = vmatprep.subr.bf16.mxu1 %v6764_v51 }
 0x8e7   : > { %4382 = vmatpush1.bf16.msra.mxu1 %v6762_v33 }
 0x8e9   : > { %3847 = vmatmul.mubr.bf16.gmra.mrb[168].mxu0 %v8273_v49  ;;  %v6767_v49 = vld [vmem:[#allocation18 + $0xa4] ss:$8 sps:$4 sm:$0xff]  }
 0x8ea   : > { %3856 = vmatprep.mubr.bf16.mxu0 %v8285_v2  ;;  %4383 = vmatprep.subr.bf16.mxu1 %v6767_v49  ;;  %v6770_v2 = vld [vmem:[#allocation18 + $0xb4] ss:$8 sps:$4 sm:$0xff]  }
 0x8eb   : > { %4384 = vmatpush1.bf16.msra.mxu1 %v6765_v55 }
 0x8ec   : > { %4385 = vmatprep.subr.bf16.mxu1 %v6770_v2 }
 0x8ef   : > { %4386 = vmatpush1.bf16.msra.mxu1 %v6768_v0 }
 0x8f1   : > { %3857 = vmatmul.mubr.bf16.gmra.mrb[172].mxu0 %v8283_v63  ;;  %v6773_v63 = vld [vmem:[#allocation18 + $0xc4] ss:$8 sps:$4 sm:$0xff]  }
 0x8f2   : > { %3866 = vmatprep.mubr.bf16.mxu0 %v8295_v20  ;;  %4387 = vmatprep.subr.bf16.mxu1 %v6773_v63  ;;  %v6776_v20 = vld [vmem:[#allocation18 + $0xd4] ss:$8 sps:$4 sm:$0xff]  }
 0x8f3   : > { %4388 = vmatpush1.bf16.msra.mxu1 %v6771_v41 }
 0x8f4   : > { %4389 = vmatprep.subr.bf16.mxu1 %v6776_v20 }
 0x8f7   : > { %4390 = vmatpush1.bf16.msra.mxu1 %v6774_v57 }
 0x8f9   : > { %3867 = vmatmul.mubr.bf16.gmra.mrb[176].mxu0 %v8293_v18  ;;  %v9378_v18 = vld [vmem:[#allocation44_spill] sm:$0xff] }
 0x8fa   : > { %3876 = vmatprep.mubr.bf16.mxu0 %v8305_v38  ;;  %v9380_v38 = vld [vmem:[#allocation46_spill] sm:$0xff] }
 0x901   : > { %3877 = vmatmul.mubr.bf16.gmra.mrb[180].mxu0 %v8303_v34  ;;  %v9379_v34 = vld [vmem:[#allocation43_spill] sm:$0xff] }
 0x902   : > { %3886 = vmatprep.mubr.bf16.mxu0 %v8315_v53  ;;  %v6779_v53 = vld [vmem:[#allocation18 + $0xe4] ss:$8 sps:$4 sm:$0xff]  }
 0x903   : > { %4391 = vmatprep.subr.bf16.mxu1 %v6779_v53 }
 0x909   : > { %3887 = vmatmul.mubr.bf16.gmra.mrb[184].mxu0 %v9375_v43  ;;  %v6777_v43 = vld [vmem:[#allocation18 + $0xe0] ss:$8 sps:$4 sm:$0xff]  }
 0x90a   : > { %3896 = vmatprep.mubr.bf16.mxu0 %v9376_v26  ;;  %v9382_v26 = vld [vmem:[#allocation48_spill] sm:$0xff]  ;;  %4392 = vmatpush1.bf16.msra.mxu1 %v6777_v43 }
 0x911   : > { %3897 = vmatmul.mubr.bf16.gmra.mrb[188].mxu0 %v9377_v50  ;;  %v9385_v50 = vld [vmem:[#allocation49_spill] sm:$0xff] }
 0x912   : > { %3906 = vmatprep.mubr.bf16.mxu0 %v8335_v16  ;;  %v6782_v16 = vld [vmem:[#allocation18 + $0xf4] ss:$8 sps:$4 sm:$0xff]  }
 0x913   : > { %4393 = vmatprep.subr.bf16.mxu1 %v6782_v16 }
 0x919   : > { %3907 = vmatmul.mubr.bf16.gmra.mrb[192].mxu0 %v8333_v15  ;;  %v6780_v15 = vld [vmem:[#allocation18 + $0xf0] ss:$8 sps:$4 sm:$0xff]  }
 0x91a   : > { %3916 = vmatprep.mubr.bf16.mxu0 %v8345_v30  ;;  %4394 = vmatpush1.bf16.msra.mxu1 %v6780_v15  ;;  %v9383_v30 = vld [vmem:[#allocation47_spill] sm:$0xff] }
 0x921   : > { %3917 = vmatmul.mubr.bf16.gmra.mrb[196].mxu0 %v8343_v29  ;;  %v9384_v29 = vld [vmem:[#allocation50_spill] sm:$0xff] }
 0x922   : > { %3926 = vmatprep.mubr.bf16.mxu0 %v9378_v18 }
 0x929   : > { %3927 = vmatmul.mubr.bf16.gmra.mrb[200].mxu0 %v9379_v34 }
 0x92a   : > { %3936 = vmatprep.mubr.bf16.mxu0 %v9380_v38 }
 0x931   : > { %3937 = vmatmul.mubr.bf16.gmra.mrb[204].mxu0 %v9381_v39 }
 0x932   : > { %3946 = vmatprep.mubr.bf16.mxu0 %v9382_v26 }
 0x939   : > { %3947 = vmatmul.mubr.bf16.gmra.mrb[208].mxu0 %v9383_v30 }
 0x93a   : > { %3956 = vmatprep.mubr.bf16.mxu0 %v9384_v29 }
 0x941   : > { %3957 = vmatmul.mubr.bf16.gmra.mrb[212].mxu0 %v9385_v50 }
 0x942   : > { %3966 = vmatprep.mubr.bf16.mxu0 %v9386_v60 }
 0x949   : > { %3967 = vmatmul.mubr.bf16.gmra.mrb[216].mxu0 %v9387_v24 }
 0x94a   : > { %3976 = vmatprep.mubr.bf16.mxu0 %v9388_v22 }
 0x951   : > { %3977 = vmatmul.mubr.bf16.gmra.mrb[220].mxu0 %v9389_v25 }
 0x9ac   : > { %v3828_v3 = vpop.f32.mrb[160].mxu0 }
 0x9ad   : > { %v3999_v17 = vadd.f32 %v9003_v19, %v3828_v3  ;;  %v3830_v7 = vpop.f32.mrb[161].mxu0 }
 0x9ae   : > { %v4000_v61 = vadd.f32 %v9006_v14, %v3830_v7  ;;  %v3832_v10 = vpop.f32.mrb[162].mxu0 }
 0x9af   : > { %v4001_v28 = vadd.f32 %v9003_v19, %v3832_v10  ;;  %v3834_v1 = vpop.f32.mrb[163].mxu0  ;;  %v4063_v12 = vmax.f32 %v3999_v17, 0.0 }
 0x9b0   : > { %v4002_v13 = vadd.f32 %v9006_v14, %v3834_v1  ;;  %v4064_v56 = vmax.f32 %v4000_v61, 0.0 }
 0x9b1   : > { %v4065_v47 = vmax.f32 %v4001_v28, 0.0 }
 0x9b2   : > { %v4066_v9 = vmax.f32 %v4002_v13, 0.0 }
 0x9b3   : > { %v4127_v5 = vpack.c.bf16 %v4065_v47, %v4063_v12 }
 0x9b4   : > { %v4128_v11 = vpack.c.bf16 %v4066_v9, %v4064_v56  ;;  %v3838_v32 = vpop.f32.mrb[164].mxu0 }
 0x9b5   : > { %v4003_v62 = vadd.f32 %v9003_v19, %v3838_v32  ;;  %v3840_v4 = vpop.f32.mrb[165].mxu0 }
 0x9b6   : > { %v4004_v52 = vadd.f32 %v9006_v14, %v3840_v4  ;;  %v3842_v42 = vpop.f32.mrb[166].mxu0  ;;  %4395 = vmatprep.mubr.bf16.mxu1 %v4128_v11 }
 0x9b7   : > { %v4005_v59 = vadd.f32 %v9003_v19, %v3842_v42  ;;  %v3844_v48 = vpop.f32.mrb[167].mxu0  ;;  %4396 = vmatmul.mubr.bf16.vlgmr.msra.gmra.mrb[160].mxu1 %v4127_v5  ;;  %v4067_v40 = vmax.f32 %v4003_v62, 0.0 }
 0x9b8   : > { %v4006_v44 = vadd.f32 %v9006_v14, %v3844_v48  ;;  %v4068_v23 = vmax.f32 %v4004_v52, 0.0 }
 0x9b9   : > { %v4069_v45 = vmax.f32 %v4005_v59, 0.0 }
 0x9ba   : > { %v4070_v36 = vmax.f32 %v4006_v44, 0.0 }
 0x9bb   : > { %v4129_v31 = vpack.c.bf16 %v4069_v45, %v4067_v40 }
 0x9bc   : > { %v4130_v21 = vpack.c.bf16 %v4070_v36, %v4068_v23  ;;  %v3848_v27 = vpop.f32.mrb[168].mxu0 }
 0x9bd   : > { %v4007_v37 = vadd.f32 %v9003_v19, %v3848_v27  ;;  %v3850_v6 = vpop.f32.mrb[169].mxu0 }
 0x9be   : > { %v4008_v35 = vadd.f32 %v9006_v14, %v3850_v6  ;;  %v3852_v8 = vpop.f32.mrb[170].mxu0  ;;  %4405 = vmatprep.mubr.bf16.mxu1 %v4130_v21 }
 0x9bf   : > { %v4009_v51 = vadd.f32 %v9003_v19, %v3852_v8  ;;  %v3854_v33 = vpop.f32.mrb[171].mxu0  ;;  %4406 = vmatmul.mubr.bf16.gmra.mrb[164].mxu1 %v4129_v31  ;;  %v4071_v55 = vmax.f32 %v4007_v37, 0.0 }
 0x9c0   : > { %v4010_v49 = vadd.f32 %v9006_v14, %v3854_v33  ;;  %v4072_v0 = vmax.f32 %v4008_v35, 0.0 }
 0x9c1   : > { %v4073_v2 = vmax.f32 %v4009_v51, 0.0 }
 0x9c2   : > { %v4074_v63 = vmax.f32 %v4010_v49, 0.0 }
 0x9c3   : > { %v4131_v41 = vpack.c.bf16 %v4073_v2, %v4071_v55 }
 0x9c4   : > { %v4132_v20 = vpack.c.bf16 %v4074_v63, %v4072_v0  ;;  %v3858_v57 = vpop.f32.mrb[172].mxu0 }
 0x9c5   : > { %v4011_v18 = vadd.f32 %v9003_v19, %v3858_v57  ;;  %v3860_v34 = vpop.f32.mrb[173].mxu0 }
 0x9c6   : > { %v4012_v38 = vadd.f32 %v9006_v14, %v3860_v34  ;;  %v3862_v53 = vpop.f32.mrb[174].mxu0  ;;  %4415 = vmatprep.mubr.bf16.mxu1 %v4132_v20 }
 0x9c7   : > { %v4013_v43 = vadd.f32 %v9003_v19, %v3862_v53  ;;  %v3864_v39 = vpop.f32.mrb[175].mxu0  ;;  %4416 = vmatmul.mubr.bf16.gmra.mrb[168].mxu1 %v4131_v41  ;;  %v4075_v16 = vmax.f32 %v4011_v18, 0.0 }
 0x9c8   : > { %v4014_v26 = vadd.f32 %v9006_v14, %v3864_v39  ;;  %v4076_v30 = vmax.f32 %v4012_v38, 0.0 }
 0x9c9   : > { %v4077_v15 = vmax.f32 %v4013_v43, 0.0 }
 0x9ca   : > { %v4078_v29 = vmax.f32 %v4014_v26, 0.0 }
 0x9cb   : > { %v4133_v50 = vpack.c.bf16 %v4077_v15, %v4075_v16 }
 0x9cc   : > { %v4134_v60 = vpack.c.bf16 %v4078_v29, %v4076_v30  ;;  %v3868_v24 = vpop.f32.mrb[176].mxu0 }
 0x9cd   : > { %v4015_v22 = vadd.f32 %v9003_v19, %v3868_v24  ;;  %v3870_v25 = vpop.f32.mrb[177].mxu0 }
 0x9ce   : > { %v4016_v46 = vadd.f32 %v9006_v14, %v3870_v25  ;;  %v3872_v3 = vpop.f32.mrb[178].mxu0  ;;  %4425 = vmatprep.mubr.bf16.mxu1 %v4134_v60 }
 0x9cf   : > { %v4017_v17 = vadd.f32 %v9003_v19, %v3872_v3  ;;  %v3874_v7 = vpop.f32.mrb[179].mxu0  ;;  %4426 = vmatmul.mubr.bf16.gmra.mrb[172].mxu1 %v4133_v50  ;;  %v4079_v10 = vmax.f32 %v4015_v22, 0.0 }
 0x9d0   : > { %v4018_v61 = vadd.f32 %v9006_v14, %v3874_v7  ;;  %v4080_v1 = vmax.f32 %v4016_v46, 0.0 }
 0x9d1   : > { %v4081_v28 = vmax.f32 %v4017_v17, 0.0 }
 0x9d2   : > { %v4082_v13 = vmax.f32 %v4018_v61, 0.0 }
 0x9d3   : > { %v4135_v12 = vpack.c.bf16 %v4081_v28, %v4079_v10 }
 0x9d4   : > { %v4136_v47 = vpack.c.bf16 %v4082_v13, %v4080_v1  ;;  %v3878_v56 = vpop.f32.mrb[180].mxu0 }
 0x9d5   : > { %v4019_v9 = vadd.f32 %v9003_v19, %v3878_v56  ;;  %v3880_v5 = vpop.f32.mrb[181].mxu0 }
 0x9d6   : > { %v4020_v11 = vadd.f32 %v9006_v14, %v3880_v5  ;;  %v3882_v32 = vpop.f32.mrb[182].mxu0  ;;  %4435 = vmatprep.mubr.bf16.mxu1 %v4136_v47 }
 0x9d7   : > { %v4021_v62 = vadd.f32 %v9003_v19, %v3882_v32  ;;  %v3884_v4 = vpop.f32.mrb[183].mxu0  ;;  %4436 = vmatmul.mubr.bf16.gmra.mrb[176].mxu1 %v4135_v12  ;;  %v4083_v42 = vmax.f32 %v4019_v9, 0.0 }
 0x9d8   : > { %v4022_v52 = vadd.f32 %v9006_v14, %v3884_v4  ;;  %v4084_v48 = vmax.f32 %v4020_v11, 0.0 }
 0x9d9   : > { %v4085_v59 = vmax.f32 %v4021_v62, 0.0 }
 0x9da   : > { %v4086_v44 = vmax.f32 %v4022_v52, 0.0 }
 0x9db   : > { %v4137_v40 = vpack.c.bf16 %v4085_v59, %v4083_v42 }
 0x9dc   : > { %v4138_v45 = vpack.c.bf16 %v4086_v44, %v4084_v48  ;;  %v3888_v23 = vpop.f32.mrb[184].mxu0 }
 0x9dd   : > { %v4023_v36 = vadd.f32 %v9003_v19, %v3888_v23  ;;  %v3890_v31 = vpop.f32.mrb[185].mxu0 }
 0x9de   : > { %v4024_v21 = vadd.f32 %v9006_v14, %v3890_v31  ;;  %v3892_v27 = vpop.f32.mrb[186].mxu0  ;;  %4445 = vmatprep.mubr.bf16.mxu1 %v4138_v45 }
 0x9df   : > { %v4025_v37 = vadd.f32 %v9003_v19, %v3892_v27  ;;  %v3894_v6 = vpop.f32.mrb[187].mxu0  ;;  %4446 = vmatmul.mubr.bf16.gmra.mrb[180].mxu1 %v4137_v40  ;;  %v4087_v8 = vmax.f32 %v4023_v36, 0.0 }
 0x9e0   : > { %v4026_v35 = vadd.f32 %v9006_v14, %v3894_v6  ;;  %v4088_v33 = vmax.f32 %v4024_v21, 0.0 }
 0x9e1   : > { %v4089_v51 = vmax.f32 %v4025_v37, 0.0 }
 0x9e2   : > { %v4090_v49 = vmax.f32 %v4026_v35, 0.0 }
 0x9e3   : > { %v4139_v55 = vpack.c.bf16 %v4089_v51, %v4087_v8 }
 0x9e4   : > { %v4140_v2 = vpack.c.bf16 %v4090_v49, %v4088_v33  ;;  %v3898_v0 = vpop.f32.mrb[188].mxu0 }
 0x9e5   : > { %v4027_v63 = vadd.f32 %v9003_v19, %v3898_v0  ;;  %v3900_v41 = vpop.f32.mrb[189].mxu0 }
 0x9e6   : > { %v4028_v20 = vadd.f32 %v9006_v14, %v3900_v41  ;;  %v3902_v57 = vpop.f32.mrb[190].mxu0  ;;  %4455 = vmatprep.mubr.bf16.mxu1 %v4140_v2 }
 0x9e7   : > { %v4029_v18 = vadd.f32 %v9003_v19, %v3902_v57  ;;  %v3904_v34 = vpop.f32.mrb[191].mxu0  ;;  %4456 = vmatmul.mubr.bf16.gmra.mrb[184].mxu1 %v4139_v55  ;;  %v4091_v53 = vmax.f32 %v4027_v63, 0.0 }
 0x9e8   : > { %v4030_v38 = vadd.f32 %v9006_v14, %v3904_v34  ;;  %v4092_v39 = vmax.f32 %v4028_v20, 0.0 }
 0x9e9   : > { %v4093_v43 = vmax.f32 %v4029_v18, 0.0 }
 0x9ea   : > { %v4094_v26 = vmax.f32 %v4030_v38, 0.0 }
 0x9eb   : > { %v4141_v16 = vpack.c.bf16 %v4093_v43, %v4091_v53 }
 0x9ec   : > { %v4142_v15 = vpack.c.bf16 %v4094_v26, %v4092_v39  ;;  %v3908_v30 = vpop.f32.mrb[192].mxu0 }
 0x9ed   : > { %v4031_v29 = vadd.f32 %v9003_v19, %v3908_v30  ;;  %v3910_v50 = vpop.f32.mrb[193].mxu0 }
 0x9ee   : > { %v4032_v60 = vadd.f32 %v9006_v14, %v3910_v50  ;;  %v3912_v24 = vpop.f32.mrb[194].mxu0  ;;  %4465 = vmatprep.mubr.bf16.mxu1 %v4142_v15 }
 0x9ef   : > { %v4033_v22 = vadd.f32 %v9003_v19, %v3912_v24  ;;  %v3914_v25 = vpop.f32.mrb[195].mxu0  ;;  %4466 = vmatmul.mubr.bf16.gmra.mrb[188].mxu1 %v4141_v16  ;;  %v4095_v3 = vmax.f32 %v4031_v29, 0.0 }
 0x9f0   : > { %v4034_v46 = vadd.f32 %v9006_v14, %v3914_v25  ;;  %v4096_v7 = vmax.f32 %v4032_v60, 0.0 }
 0x9f1   : > { %v4097_v17 = vmax.f32 %v4033_v22, 0.0 }
 0x9f2   : > { %v4098_v61 = vmax.f32 %v4034_v46, 0.0 }
 0x9f3   : > { %v4143_v10 = vpack.c.bf16 %v4097_v17, %v4095_v3 }
 0x9f4   : > { %v4144_v28 = vpack.c.bf16 %v4098_v61, %v4096_v7  ;;  %v3918_v1 = vpop.f32.mrb[196].mxu0 }
 0x9f5   : > { %v4035_v13 = vadd.f32 %v9003_v19, %v3918_v1  ;;  %v3920_v12 = vpop.f32.mrb[197].mxu0 }
 0x9f6   : > { %v4036_v47 = vadd.f32 %v9006_v14, %v3920_v12  ;;  %v3922_v56 = vpop.f32.mrb[198].mxu0  ;;  %4475 = vmatprep.mubr.bf16.mxu1 %v4144_v28 }
 0x9f7   : > { %v4037_v9 = vadd.f32 %v9003_v19, %v3922_v56  ;;  %v3924_v5 = vpop.f32.mrb[199].mxu0  ;;  %4476 = vmatmul.mubr.bf16.gmra.mrb[192].mxu1 %v4143_v10  ;;  %v4099_v32 = vmax.f32 %v4035_v13, 0.0 }
 0x9f8   : > { %v4038_v11 = vadd.f32 %v9006_v14, %v3924_v5  ;;  %v4100_v4 = vmax.f32 %v4036_v47, 0.0 }
 0x9f9   : > { %v4101_v62 = vmax.f32 %v4037_v9, 0.0 }
 0x9fa   : > { %v4102_v52 = vmax.f32 %v4038_v11, 0.0 }
 0x9fb   : > { %v4145_v42 = vpack.c.bf16 %v4101_v62, %v4099_v32 }
 0x9fc   : > { %v4146_v59 = vpack.c.bf16 %v4102_v52, %v4100_v4  ;;  %v3928_v48 = vpop.f32.mrb[200].mxu0 }
 0x9fd   : > { %v4039_v44 = vadd.f32 %v9003_v19, %v3928_v48  ;;  %v3930_v40 = vpop.f32.mrb[201].mxu0 }
 0x9fe   : > { %v4040_v45 = vadd.f32 %v9006_v14, %v3930_v40  ;;  %v3932_v23 = vpop.f32.mrb[202].mxu0  ;;  %4485 = vmatprep.mubr.bf16.mxu1 %v4146_v59 }
 0x9ff   : > { %v4041_v36 = vadd.f32 %v9003_v19, %v3932_v23  ;;  %v3934_v31 = vpop.f32.mrb[203].mxu0  ;;  %4486 = vmatmul.mubr.bf16.gmra.mrb[196].mxu1 %v4145_v42  ;;  %v4103_v27 = vmax.f32 %v4039_v44, 0.0 }
 0xa00   : > { %v4042_v21 = vadd.f32 %v9006_v14, %v3934_v31  ;;  %v4104_v6 = vmax.f32 %v4040_v45, 0.0 }
 0xa01   : > { %v4105_v37 = vmax.f32 %v4041_v36, 0.0 }
 0xa02   : > { %v4106_v35 = vmax.f32 %v4042_v21, 0.0 }
 0xa03   : > { %v4147_v8 = vpack.c.bf16 %v4105_v37, %v4103_v27 }
 0xa04   : > { %v4148_v51 = vpack.c.bf16 %v4106_v35, %v4104_v6  ;;  %v3938_v33 = vpop.f32.mrb[204].mxu0 }
 0xa05   : > { %v4043_v49 = vadd.f32 %v9003_v19, %v3938_v33  ;;  %v3940_v55 = vpop.f32.mrb[205].mxu0 }
 0xa06   : > { %v4044_v2 = vadd.f32 %v9006_v14, %v3940_v55  ;;  %v3942_v0 = vpop.f32.mrb[206].mxu0  ;;  %4495 = vmatprep.mubr.bf16.mxu1 %v4148_v51 }
 0xa07   : > { %v4045_v63 = vadd.f32 %v9003_v19, %v3942_v0  ;;  %v3944_v41 = vpop.f32.mrb[207].mxu0  ;;  %4496 = vmatmul.mubr.bf16.gmra.mrb[200].mxu1 %v4147_v8  ;;  %v4107_v57 = vmax.f32 %v4043_v49, 0.0 }
 0xa08   : > { %v4046_v20 = vadd.f32 %v9006_v14, %v3944_v41  ;;  %v4108_v34 = vmax.f32 %v4044_v2, 0.0 }
 0xa09   : > { %v4109_v18 = vmax.f32 %v4045_v63, 0.0 }
 0xa0a   : > { %v4110_v38 = vmax.f32 %v4046_v20, 0.0 }
 0xa0b   : > { %v4149_v53 = vpack.c.bf16 %v4109_v18, %v4107_v57 }
 0xa0c   : > { %v4150_v43 = vpack.c.bf16 %v4110_v38, %v4108_v34  ;;  %v3948_v39 = vpop.f32.mrb[208].mxu0  ;;  %v4191_v34 = vld [vmem:[%s9393_s18] sm:$0x3]  ;;  %s9178_s18 = scalar_lea.hbm %s9397_s15, %s6233_s17 }
 0xa0d   : > { %v4047_v26 = vadd.f32 %v9003_v19, %v3948_v39  ;;  %v3950_v16 = vpop.f32.mrb[209].mxu0  ;;  %v9076_v38 = vrot.slane %v4191_v34, %v9391_v54 }
 0xa0e   : > { %v4048_v15 = vadd.f32 %v9006_v14, %v3950_v16  ;;  %v3952_v30 = vpop.f32.mrb[210].mxu0  ;;  %4505 = vmatprep.mubr.bf16.mxu1 %v4150_v43 }
 0xa0f   : > { %v4049_v29 = vadd.f32 %v9003_v19, %v3952_v30  ;;  %v3954_v50 = vpop.f32.mrb[211].mxu0  ;;  %4506 = vmatmul.mubr.bf16.gmra.mrb[204].mxu1 %v4149_v53  ;;  %v4111_v24 = vmax.f32 %v4047_v26, 0.0  ;;  %v6785_v30 = vld [vmem:[%s8170_s11 + $0x4] ss:$8 sps:$4 sm:$0xff]  }
 0xa10   : > { %v4050_v60 = vadd.f32 %v9006_v14, %v3954_v50  ;;  %v4112_v25 = vmax.f32 %v4048_v15, 0.0 }
 0xa11   : > { %v4113_v22 = vmax.f32 %v4049_v29, 0.0 }
 0xa12   : > { %v4114_v46 = vmax.f32 %v4050_v60, 0.0 }
 0xa13   : > { %v4151_v3 = vpack.c.bf16 %v4113_v22, %v4111_v24 }
 0xa14   : > { %v4152_v17 = vpack.c.bf16 %v4114_v46, %v4112_v25  ;;  %v3958_v7 = vpop.f32.mrb[212].mxu0 }
 0xa15   : > { %v4051_v61 = vadd.f32 %v9003_v19, %v3958_v7  ;;  %v3960_v10 = vpop.f32.mrb[213].mxu0 }
 0xa16   : > { %v4052_v28 = vadd.f32 %v9006_v14, %v3960_v10  ;;  %v3962_v1 = vpop.f32.mrb[214].mxu0  ;;  %4515 = vmatprep.mubr.bf16.mxu1 %v4152_v17 }
 0xa17   : > { %v4053_v13 = vadd.f32 %v9003_v19, %v3962_v1  ;;  %v3964_v12 = vpop.f32.mrb[215].mxu0  ;;  %4516 = vmatmul.mubr.bf16.gmra.mrb[208].mxu1 %v4151_v3  ;;  %v4115_v56 = vmax.f32 %v4051_v61, 0.0 }
 0xa18   : > { %v4054_v47 = vadd.f32 %v9006_v14, %v3964_v12  ;;  %v4116_v5 = vmax.f32 %v4052_v28, 0.0 }
 0xa19   : > { %v4117_v9 = vmax.f32 %v4053_v13, 0.0 }
 0xa1a   : > { %v4118_v11 = vmax.f32 %v4054_v47, 0.0 }
 0xa1b   : > { %v4153_v32 = vpack.c.bf16 %v4117_v9, %v4115_v56 }
 0xa1c   : > { %v4154_v62 = vpack.c.bf16 %v4118_v11, %v4116_v5  ;;  %v3968_v4 = vpop.f32.mrb[216].mxu0 }
 0xa1d   : > { %v4055_v52 = vadd.f32 %v9003_v19, %v3968_v4  ;;  %v3970_v42 = vpop.f32.mrb[217].mxu0 }
 0xa1e   : > { %v4056_v59 = vadd.f32 %v9006_v14, %v3970_v42  ;;  %v3972_v48 = vpop.f32.mrb[218].mxu0  ;;  %4525 = vmatprep.mubr.bf16.mxu1 %v4154_v62 }
 0xa1f   : > { %v4057_v44 = vadd.f32 %v9003_v19, %v3972_v48  ;;  %v3974_v40 = vpop.f32.mrb[219].mxu0  ;;  %4526 = vmatmul.mubr.bf16.gmra.mrb[212].mxu1 %v4153_v32  ;;  %v4119_v23 = vmax.f32 %v4055_v52, 0.0 }
 0xa20   : > { %v4058_v45 = vadd.f32 %v9006_v14, %v3974_v40  ;;  %v4120_v31 = vmax.f32 %v4056_v59, 0.0 }
 0xa21   : > { %v4121_v36 = vmax.f32 %v4057_v44, 0.0 }
 0xa22   : > { %v4122_v21 = vmax.f32 %v4058_v45, 0.0 }
 0xa23   : > { %v4155_v27 = vpack.c.bf16 %v4121_v36, %v4119_v23 }
 0xa24   : > { %v4156_v37 = vpack.c.bf16 %v4122_v21, %v4120_v31  ;;  %v3978_v6 = vpop.f32.mrb[220].mxu0 }
 0xa25   : > { %v4059_v35 = vadd.f32 %v9003_v19, %v3978_v6  ;;  %v3980_v8 = vpop.f32.mrb[221].mxu0 }
 0xa26   : > { %v4060_v51 = vadd.f32 %v9006_v14, %v3980_v8  ;;  %v3982_v33 = vpop.f32.mrb[222].mxu0  ;;  %4535 = vmatprep.mubr.bf16.mxu1 %v4156_v37 }
 0xa27   : > { %v4061_v49 = vadd.f32 %v9003_v19, %v3982_v33  ;;  %v3984_v55 = vpop.f32.mrb[223].mxu0  ;;  %4536 = vmatmul.mubr.bf16.gmra.mrb[216].mxu1 %v4155_v27  ;;  %v4123_v0 = vmax.f32 %v4059_v35, 0.0  ;;  %v9079_v19 = vrot.slane %v4191_v34, %v9392_v58 }
 0xa28   : > { %v4062_v2 = vadd.f32 %v9006_v14, %v3984_v55  ;;  %v4124_v41 = vmax.f32 %v4060_v51, 0.0 }
 0xa29   : > { %v4125_v63 = vmax.f32 %v4061_v49, 0.0 }
 0xa2a   : > { %v4126_v20 = vmax.f32 %v4062_v2, 0.0 }
 0xa2b   : > { %v4157_v57 = vpack.c.bf16 %v4125_v63, %v4123_v0 }
 0xa2c   : > { %v4158_v18 = vpack.c.bf16 %v4126_v20, %v4124_v41 }
 0xa2e   : > { %4545 = vmatprep.mubr.bf16.mxu1 %v4158_v18 }
 0xa2f   : > { %4546 = vmatmul.mubr.bf16.gmra.mrb[220].mxu1 %v4157_v57 }
 0xa30   : > { %4708 = vmatprep.mubr.bf16.mxu1 %v6785_v30 }
 0xa8a   : > { %v4397_v14 = vpop.f32.mrb[160].mxu1 }
 0xa8b   : > { %v4398_v53 = vadd.f32 %v4397_v14, %v9076_v38  ;;  %v4399_v43 = vpop.f32.mrb[161].mxu1 }
 0xa8c   : > { %v4400_v39 = vadd.f32 %v4399_v43, %v9079_v19  ;;  %v4401_v26 = vpop.f32.mrb[162].mxu1 }
 0xa8d   : > { %v4402_v16 = vadd.f32 %v4401_v26, %v9076_v38  ;;  %v4403_v15 = vpop.f32.mrb[163].mxu1  ;;  %v4556_v50 = vmax.f32 %v4398_v53, 0.0 }
 0xa8e   : > { %v4404_v29 = vadd.f32 %v4403_v15, %v9079_v19  ;;  %v4557_v24 = vmax.f32 %v4400_v39, 0.0 }
 0xa8f   : > { %v4558_v60 = vmax.f32 %v4402_v16, 0.0 }
 0xa90   : > { %v4559_v22 = vmax.f32 %v4404_v29, 0.0 }
 0xa91   : > { %v4624_v25 = vpack.c.bf16 %v4558_v60, %v4556_v50 }
 0xa92   : > { %v4625_v46 = vpack.c.bf16 %v4559_v22, %v4557_v24  ;;  %v4407_v3 = vpop.f32.mrb[164].mxu1 }
 0xa93   : > { %v4408_v17 = vadd.f32 %v4407_v3, %v9076_v38  ;;  %v4409_v7 = vpop.f32.mrb[165].mxu1 }
 0xa94   : > { %v4410_v61 = vadd.f32 %v4409_v7, %v9079_v19  ;;  %v4411_v10 = vpop.f32.mrb[166].mxu1  ;;  %4676 = vmatprep.subr.bf16.mxu1 %v4625_v46 }
 0xa95   : > { %v4412_v28 = vadd.f32 %v4411_v10, %v9076_v38  ;;  %v4413_v1 = vpop.f32.mrb[167].mxu1  ;;  %4677 = vmatpush1.bf16.msra.mxu1 %v4624_v25  ;;  %v4560_v12 = vmax.f32 %v4408_v17, 0.0 }
 0xa96   : > { %v4414_v13 = vadd.f32 %v4413_v1, %v9079_v19  ;;  %v4561_v56 = vmax.f32 %v4410_v61, 0.0 }
 0xa97   : > { %v4562_v47 = vmax.f32 %v4412_v28, 0.0 }
 0xa98   : > { %v4563_v9 = vmax.f32 %v4414_v13, 0.0 }
 0xa99   : > { %v4626_v5 = vpack.c.bf16 %v4562_v47, %v4560_v12 }
 0xa9a   : > { %v4627_v11 = vpack.c.bf16 %v4563_v9, %v4561_v56  ;;  %v4417_v32 = vpop.f32.mrb[168].mxu1 }
 0xa9b   : > { %v4418_v62 = vadd.f32 %v4417_v32, %v9076_v38  ;;  %v4419_v4 = vpop.f32.mrb[169].mxu1 }
 0xa9c   : > { %v4420_v52 = vadd.f32 %v4419_v4, %v9079_v19  ;;  %v4421_v42 = vpop.f32.mrb[170].mxu1  ;;  %4678 = vmatprep.subr.bf16.mxu1 %v4627_v11 }
 0xa9d   : > { %v4422_v59 = vadd.f32 %v4421_v42, %v9076_v38  ;;  %v4423_v48 = vpop.f32.mrb[171].mxu1  ;;  %4679 = vmatpush1.bf16.msra.mxu1 %v4626_v5  ;;  %v4564_v40 = vmax.f32 %v4418_v62, 0.0 }
 0xa9e   : > { %v4424_v44 = vadd.f32 %v4423_v48, %v9079_v19  ;;  %v4565_v23 = vmax.f32 %v4420_v52, 0.0 }
 0xa9f   : > { %v4566_v45 = vmax.f32 %v4422_v59, 0.0 }
 0xaa0   : > { %v4567_v36 = vmax.f32 %v4424_v44, 0.0 }
 0xaa1   : > { %v4628_v31 = vpack.c.bf16 %v4566_v45, %v4564_v40 }
 0xaa2   : > { %v4629_v21 = vpack.c.bf16 %v4567_v36, %v4565_v23  ;;  %v4427_v27 = vpop.f32.mrb[172].mxu1 }
 0xaa3   : > { %v4428_v37 = vadd.f32 %v4427_v27, %v9076_v38  ;;  %v4429_v6 = vpop.f32.mrb[173].mxu1 }
 0xaa4   : > { %v4430_v35 = vadd.f32 %v4429_v6, %v9079_v19  ;;  %v4431_v8 = vpop.f32.mrb[174].mxu1  ;;  %4680 = vmatprep.subr.bf16.mxu1 %v4629_v21 }
 0xaa5   : > { %v4432_v51 = vadd.f32 %v4431_v8, %v9076_v38  ;;  %v4433_v33 = vpop.f32.mrb[175].mxu1  ;;  %4681 = vmatpush1.bf16.msra.mxu1 %v4628_v31  ;;  %v4568_v55 = vmax.f32 %v4428_v37, 0.0 }
 0xaa6   : > { %v4434_v49 = vadd.f32 %v4433_v33, %v9079_v19  ;;  %v4569_v0 = vmax.f32 %v4430_v35, 0.0 }
 0xaa7   : > { %v4570_v2 = vmax.f32 %v4432_v51, 0.0 }
 0xaa8   : > { %v4571_v63 = vmax.f32 %v4434_v49, 0.0 }
 0xaa9   : > { %v4630_v41 = vpack.c.bf16 %v4570_v2, %v4568_v55 }
 0xaaa   : > { %v4631_v20 = vpack.c.bf16 %v4571_v63, %v4569_v0  ;;  %v4437_v57 = vpop.f32.mrb[176].mxu1 }
 0xaab   : > { %v4438_v18 = vadd.f32 %v4437_v57, %v9076_v38  ;;  %v4439_v34 = vpop.f32.mrb[177].mxu1 }
 0xaac   : > { %v4440_v14 = vadd.f32 %v4439_v34, %v9079_v19  ;;  %v4441_v53 = vpop.f32.mrb[178].mxu1  ;;  %4682 = vmatprep.subr.bf16.mxu1 %v4631_v20 }
 0xaad   : > { %v4442_v43 = vadd.f32 %v4441_v53, %v9076_v38  ;;  %v4443_v39 = vpop.f32.mrb[179].mxu1  ;;  %4683 = vmatpush1.bf16.msra.mxu1 %v4630_v41  ;;  %v4572_v16 = vmax.f32 %v4438_v18, 0.0 }
 0xaae   : > { %v4444_v26 = vadd.f32 %v4443_v39, %v9079_v19  ;;  %v4573_v30 = vmax.f32 %v4440_v14, 0.0 }
 0xaaf   : > { %v4574_v15 = vmax.f32 %v4442_v43, 0.0 }
 0xab0   : > { %v4575_v29 = vmax.f32 %v4444_v26, 0.0 }
 0xab1   : > { %v4632_v50 = vpack.c.bf16 %v4574_v15, %v4572_v16 }
 0xab2   : > { %v4633_v60 = vpack.c.bf16 %v4575_v29, %v4573_v30  ;;  %v4447_v24 = vpop.f32.mrb[180].mxu1 }
 0xab3   : > { %v4448_v22 = vadd.f32 %v4447_v24, %v9076_v38  ;;  %v4449_v25 = vpop.f32.mrb[181].mxu1 }
 0xab4   : > { %v4450_v46 = vadd.f32 %v4449_v25, %v9079_v19  ;;  %v4451_v3 = vpop.f32.mrb[182].mxu1  ;;  %4684 = vmatprep.subr.bf16.mxu1 %v4633_v60 }
 0xab5   : > { %v4452_v17 = vadd.f32 %v4451_v3, %v9076_v38  ;;  %v4453_v7 = vpop.f32.mrb[183].mxu1  ;;  %4685 = vmatpush1.bf16.msra.mxu1 %v4632_v50  ;;  %v4576_v10 = vmax.f32 %v4448_v22, 0.0 }
 0xab6   : > { %v4454_v61 = vadd.f32 %v4453_v7, %v9079_v19  ;;  %v4577_v1 = vmax.f32 %v4450_v46, 0.0 }
 0xab7   : > { %v4578_v28 = vmax.f32 %v4452_v17, 0.0 }
 0xab8   : > { %v4579_v13 = vmax.f32 %v4454_v61, 0.0 }
 0xab9   : > { %v4634_v12 = vpack.c.bf16 %v4578_v28, %v4576_v10 }
 0xaba   : > { %v4635_v47 = vpack.c.bf16 %v4579_v13, %v4577_v1  ;;  %v4457_v56 = vpop.f32.mrb[184].mxu1 }
 0xabb   : > { %v4458_v9 = vadd.f32 %v4457_v56, %v9076_v38  ;;  %v4459_v5 = vpop.f32.mrb[185].mxu1 }
 0xabc   : > { %v4460_v11 = vadd.f32 %v4459_v5, %v9079_v19  ;;  %v4461_v32 = vpop.f32.mrb[186].mxu1  ;;  %4686 = vmatprep.subr.bf16.mxu1 %v4635_v47 }
 0xabd   : > { %v4462_v62 = vadd.f32 %v4461_v32, %v9076_v38  ;;  %v4463_v4 = vpop.f32.mrb[187].mxu1  ;;  %4687 = vmatpush1.bf16.msra.mxu1 %v4634_v12  ;;  %v4580_v42 = vmax.f32 %v4458_v9, 0.0 }
 0xabe   : > { %v4464_v52 = vadd.f32 %v4463_v4, %v9079_v19  ;;  %v4581_v48 = vmax.f32 %v4460_v11, 0.0 }
 0xabf   : > { %v4582_v59 = vmax.f32 %v4462_v62, 0.0 }
 0xac0   : > { %v4583_v44 = vmax.f32 %v4464_v52, 0.0 }
 0xac1   : > { %v4636_v40 = vpack.c.bf16 %v4582_v59, %v4580_v42 }
 0xac2   : > { %v4637_v45 = vpack.c.bf16 %v4583_v44, %v4581_v48  ;;  %v4467_v23 = vpop.f32.mrb[188].mxu1 }
 0xac3   : > { %v4468_v36 = vadd.f32 %v4467_v23, %v9076_v38  ;;  %v4469_v31 = vpop.f32.mrb[189].mxu1 }
 0xac4   : > { %v4470_v21 = vadd.f32 %v4469_v31, %v9079_v19  ;;  %v4471_v27 = vpop.f32.mrb[190].mxu1  ;;  %4688 = vmatprep.subr.bf16.mxu1 %v4637_v45 }
 0xac5   : > { %v4472_v37 = vadd.f32 %v4471_v27, %v9076_v38  ;;  %v4473_v6 = vpop.f32.mrb[191].mxu1  ;;  %4689 = vmatpush1.bf16.msra.mxu1 %v4636_v40  ;;  %v4584_v8 = vmax.f32 %v4468_v36, 0.0 }
 0xac6   : > { %v4474_v35 = vadd.f32 %v4473_v6, %v9079_v19  ;;  %v4585_v33 = vmax.f32 %v4470_v21, 0.0 }
 0xac7   : > { %v4586_v51 = vmax.f32 %v4472_v37, 0.0 }
 0xac8   : > { %v4587_v49 = vmax.f32 %v4474_v35, 0.0 }
 0xac9   : > { %v4638_v55 = vpack.c.bf16 %v4586_v51, %v4584_v8 }
 0xaca   : > { %v4639_v2 = vpack.c.bf16 %v4587_v49, %v4585_v33  ;;  %v4477_v0 = vpop.f32.mrb[192].mxu1 }
 0xacb   : > { %v4478_v63 = vadd.f32 %v4477_v0, %v9076_v38  ;;  %v4479_v41 = vpop.f32.mrb[193].mxu1 }
 0xacc   : > { %v4480_v20 = vadd.f32 %v4479_v41, %v9079_v19  ;;  %v4481_v57 = vpop.f32.mrb[194].mxu1  ;;  %4690 = vmatprep.subr.bf16.mxu1 %v4639_v2 }
 0xacd   : > { %v4482_v18 = vadd.f32 %v4481_v57, %v9076_v38  ;;  %v4483_v34 = vpop.f32.mrb[195].mxu1  ;;  %4691 = vmatpush1.bf16.msra.mxu1 %v4638_v55  ;;  %v4588_v53 = vmax.f32 %v4478_v63, 0.0 }
 0xace   : > { %v4484_v14 = vadd.f32 %v4483_v34, %v9079_v19  ;;  %v4589_v39 = vmax.f32 %v4480_v20, 0.0 }
 0xacf   : > { %v4590_v43 = vmax.f32 %v4482_v18, 0.0 }
 0xad0   : > { %v4591_v26 = vmax.f32 %v4484_v14, 0.0 }
 0xad1   : > { %v4640_v16 = vpack.c.bf16 %v4590_v43, %v4588_v53 }
 0xad2   : > { %v4641_v15 = vpack.c.bf16 %v4591_v26, %v4589_v39  ;;  %v4487_v30 = vpop.f32.mrb[196].mxu1 }
 0xad3   : > { %v4488_v29 = vadd.f32 %v4487_v30, %v9076_v38  ;;  %v4489_v50 = vpop.f32.mrb[197].mxu1 }
 0xad4   : > { %v4490_v60 = vadd.f32 %v4489_v50, %v9079_v19  ;;  %v4491_v24 = vpop.f32.mrb[198].mxu1  ;;  %4692 = vmatprep.subr.bf16.mxu1 %v4641_v15 }
 0xad5   : > { %v4492_v22 = vadd.f32 %v4491_v24, %v9076_v38  ;;  %v4493_v25 = vpop.f32.mrb[199].mxu1  ;;  %4693 = vmatpush1.bf16.msra.mxu1 %v4640_v16  ;;  %v4592_v3 = vmax.f32 %v4488_v29, 0.0 }
 0xad6   : > { %v4494_v46 = vadd.f32 %v4493_v25, %v9079_v19  ;;  %v4593_v7 = vmax.f32 %v4490_v60, 0.0 }
 0xad7   : > { %v4594_v17 = vmax.f32 %v4492_v22, 0.0 }
 0xad8   : > { %v4595_v61 = vmax.f32 %v4494_v46, 0.0 }
 0xad9   : > { %v4642_v10 = vpack.c.bf16 %v4594_v17, %v4592_v3 }
 0xada   : > { %v4643_v28 = vpack.c.bf16 %v4595_v61, %v4593_v7  ;;  %v4497_v1 = vpop.f32.mrb[200].mxu1 }
 0xadb   : > { %v4498_v13 = vadd.f32 %v4497_v1, %v9076_v38  ;;  %v4499_v12 = vpop.f32.mrb[201].mxu1 }
 0xadc   : > { %v4500_v47 = vadd.f32 %v4499_v12, %v9079_v19  ;;  %v4501_v56 = vpop.f32.mrb[202].mxu1  ;;  %4694 = vmatprep.subr.bf16.mxu1 %v4643_v28 }
 0xadd   : > { %v4502_v9 = vadd.f32 %v4501_v56, %v9076_v38  ;;  %v4503_v5 = vpop.f32.mrb[203].mxu1  ;;  %4695 = vmatpush1.bf16.msra.mxu1 %v4642_v10  ;;  %v4596_v32 = vmax.f32 %v4498_v13, 0.0 }
 0xade   : > { %v4504_v11 = vadd.f32 %v4503_v5, %v9079_v19  ;;  %v4597_v4 = vmax.f32 %v4500_v47, 0.0 }
 0xadf   : > { %v4598_v62 = vmax.f32 %v4502_v9, 0.0 }
 0xae0   : > { %v4599_v52 = vmax.f32 %v4504_v11, 0.0 }
 0xae1   : > { %v4644_v42 = vpack.c.bf16 %v4598_v62, %v4596_v32 }
 0xae2   : > { %v4645_v59 = vpack.c.bf16 %v4599_v52, %v4597_v4  ;;  %v4507_v48 = vpop.f32.mrb[204].mxu1 }
 0xae3   : > { %v4508_v44 = vadd.f32 %v4507_v48, %v9076_v38  ;;  %v4509_v40 = vpop.f32.mrb[205].mxu1 }
 0xae4   : > { %v4510_v45 = vadd.f32 %v4509_v40, %v9079_v19  ;;  %v4511_v23 = vpop.f32.mrb[206].mxu1  ;;  %4696 = vmatprep.subr.bf16.mxu1 %v4645_v59 }
 0xae5   : > { %v4512_v36 = vadd.f32 %v4511_v23, %v9076_v38  ;;  %v4513_v31 = vpop.f32.mrb[207].mxu1  ;;  %4697 = vmatpush1.bf16.msra.mxu1 %v4644_v42  ;;  %v4600_v27 = vmax.f32 %v4508_v44, 0.0 }
 0xae6   : > { %v4514_v21 = vadd.f32 %v4513_v31, %v9079_v19  ;;  %v4601_v6 = vmax.f32 %v4510_v45, 0.0 }
 0xae7   : > { %v4602_v37 = vmax.f32 %v4512_v36, 0.0 }
 0xae8   : > { %v4603_v35 = vmax.f32 %v4514_v21, 0.0 }
 0xae9   : > { %v4646_v8 = vpack.c.bf16 %v4602_v37, %v4600_v27 }
 0xaea   : > { %v4647_v51 = vpack.c.bf16 %v4603_v35, %v4601_v6  ;;  %v4517_v33 = vpop.f32.mrb[208].mxu1  ;;  %v6791_v6 = vld [vmem:[#allocation21 + $0x4] ss:$8 sps:$4 sm:$0xff]   ;;  %v6783_v35 = vld [vmem:[%s8170_s11] ss:$8 sps:$4 sm:$0xff]  }
 0xaeb   : > { %v4518_v49 = vadd.f32 %v4517_v33, %v9076_v38  ;;  %v4519_v55 = vpop.f32.mrb[209].mxu1  ;;  %v6794_v33 = vld [vmem:[#allocation21 + $0x14] ss:$8 sps:$4 sm:$0xff]  }
 0xaec   : > { %v4520_v2 = vadd.f32 %v4519_v55, %v9079_v19  ;;  %v4521_v0 = vpop.f32.mrb[210].mxu1  ;;  %4698 = vmatprep.subr.bf16.mxu1 %v4647_v51  ;;  %v6789_v51 = vld [vmem:[#allocation21] ss:$8 sps:$4 sm:$0xff]  }
 0xaed   : > { %v4522_v63 = vadd.f32 %v4521_v0, %v9076_v38  ;;  %v4523_v41 = vpop.f32.mrb[211].mxu1  ;;  %4699 = vmatpush1.bf16.msra.mxu1 %v4646_v8  ;;  %v4604_v57 = vmax.f32 %v4518_v49, 0.0  ;;  %v6786_v8 = vld [vmem:[%s8170_s11 + $0x14] ss:$8 sps:$4 sm:$0xff]   ;;  %v6788_v49 = vld [vmem:[%s8170_s11 + $0x10] ss:$8 sps:$4 sm:$0xff]  }
 0xaee   : > { %v4524_v20 = vadd.f32 %v4523_v41, %v9079_v19  ;;  %v4605_v34 = vmax.f32 %v4520_v2, 0.0  ;;  %v6795_v55 = vld [vmem:[#allocation21 + $0x20] ss:$8 sps:$4 sm:$0xff]   ;;  %v6800_v2 = vld [vmem:[#allocation21 + $0x34] ss:$8 sps:$4 sm:$0xff]   ;;  %s7473_s11 = scalar_lea.vmem %s9173_s21, 256 }
 0xaef   : > { %v4606_v18 = vmax.f32 %v4522_v63, 0.0  ;;  %v6798_v0 = vld [vmem:[#allocation21 + $0x30] ss:$8 sps:$4 sm:$0xff]   ;;  %v6803_v63 = vld [vmem:[#allocation21 + $0x44] ss:$8 sps:$4 sm:$0xff]   ;;  %p7474_p11 = scmp.ne.s32.totalorder %s9173_s21, %s7473_s11 }
 0xaf0   : > { %v4607_v14 = vmax.f32 %v4524_v20, 0.0  ;;  %v6801_v41 = vld [vmem:[#allocation21 + $0x40] ss:$8 sps:$4 sm:$0xff]   ;;  %v6806_v20 = vld [vmem:[#allocation21 + $0x54] ss:$8 sps:$4 sm:$0xff]  }
 0xaf1   : > { %v4648_v53 = vpack.c.bf16 %v4606_v18, %v4604_v57  ;;  %v6804_v57 = vld [vmem:[#allocation21 + $0x50] ss:$8 sps:$4 sm:$0xff]   ;;  %v6809_v18 = vld [vmem:[#allocation21 + $0x64] ss:$8 sps:$4 sm:$0xff]   ;;  %p7475_p12 = pnand %p7474_p11, %p9398_p3 }
 0xaf2   : > { %v4649_v43 = vpack.c.bf16 %v4607_v14, %v4605_v34  ;;  %v4527_v39 = vpop.f32.mrb[212].mxu1  ;;  %v6807_v34 = vld [vmem:[#allocation21 + $0x60] ss:$8 sps:$4 sm:$0xff]   ;;  %v6812_v14 = vld [vmem:[#allocation21 + $0x74] ss:$8 sps:$4 sm:$0xff]  }
 0xaf3   : > { %v4528_v26 = vadd.f32 %v4527_v39, %v9076_v38  ;;  %v4529_v16 = vpop.f32.mrb[213].mxu1  ;;  %v6813_v39 = vld [vmem:[#allocation21 + $0x80] ss:$8 sps:$4 sm:$0xff]   ;;  %p7476_p1 = pneg %p7475_p12 }
 0xaf4   : > { %v4530_v15 = vadd.f32 %v4529_v16, %v9079_v19  ;;  %v4531_v30 = vpop.f32.mrb[214].mxu1  ;;  %4700 = vmatprep.subr.bf16.mxu1 %v4649_v43  ;;  %v6815_v43 = vld [vmem:[#allocation21 + $0x84] ss:$8 sps:$4 sm:$0xff]   ;;  %v6816_v16 = vld [vmem:[#allocation21 + $0x90] ss:$8 sps:$4 sm:$0xff]  }
 0xaf5   : > { %v4532_v29 = vadd.f32 %v4531_v30, %v9076_v38  ;;  %v4533_v50 = vpop.f32.mrb[215].mxu1  ;;  %4701 = vmatpush1.bf16.msra.mxu1 %v4648_v53  ;;  %v4608_v24 = vmax.f32 %v4528_v26, 0.0  ;;  %v6810_v53 = vld [vmem:[#allocation21 + $0x70] ss:$8 sps:$4 sm:$0xff]   ;;  %v6818_v26 = vld [vmem:[#allocation21 + $0x94] ss:$8 sps:$4 sm:$0xff]  }
 0xaf6   : > { %v4534_v60 = vadd.f32 %v4533_v50, %v9079_v19  ;;  %v4609_v25 = vmax.f32 %v4530_v15, 0.0  ;;  %v6821_v15 = vld [vmem:[#allocation21 + $0xa4] ss:$8 sps:$4 sm:$0xff]   ;;  %v6819_v30 = vld [vmem:[#allocation21 + $0xa0] ss:$8 sps:$4 sm:$0xff]  }
 0xaf7   : > { %v4610_v22 = vmax.f32 %v4532_v29, 0.0  ;;  %v6824_v29 = vld [vmem:[#allocation21 + $0xb4] ss:$8 sps:$4 sm:$0xff]   ;;  %v6822_v50 = vld [vmem:[#allocation21 + $0xb0] ss:$8 sps:$4 sm:$0xff]  }
 0xaf8   : > { %v4611_v46 = vmax.f32 %v4534_v60, 0.0  ;;  %v6827_v60 = vld [vmem:[#allocation21 + $0xc4] ss:$8 sps:$4 sm:$0xff]  }
 0xaf9   : > { %v4650_v3 = vpack.c.bf16 %v4610_v22, %v4608_v24  ;;  %v6825_v24 = vld [vmem:[#allocation21 + $0xc0] ss:$8 sps:$4 sm:$0xff]   ;;  %v6830_v22 = vld [vmem:[#allocation21 + $0xd4] ss:$8 sps:$4 sm:$0xff]  }
 0xafa   : > { %v4651_v17 = vpack.c.bf16 %v4611_v46, %v4609_v25  ;;  %v4537_v7 = vpop.f32.mrb[216].mxu1  ;;  %v6828_v25 = vld [vmem:[#allocation21 + $0xd0] ss:$8 sps:$4 sm:$0xff]   ;;  %v6831_v46 = vld [vmem:[#allocation21 + $0xe0] ss:$8 sps:$4 sm:$0xff]  }
 0xafb   : > { %v4538_v61 = vadd.f32 %v4537_v7, %v9076_v38  ;;  %v4539_v10 = vpop.f32.mrb[217].mxu1  ;;  %v6834_v7 = vld [vmem:[#allocation21 + $0xf0] ss:$8 sps:$4 sm:$0xff]  }
 0xafc   : > { %v4540_v28 = vadd.f32 %v4539_v10, %v9079_v19  ;;  %v4541_v1 = vpop.f32.mrb[218].mxu1  ;;  %4702 = vmatprep.subr.bf16.mxu1 %v4651_v17  ;;  %v6836_v17 = vld [vmem:[#allocation21 + $0xf4] ss:$8 sps:$4 sm:$0xff]   ;;  %v6885_v10 = vld [vmem:[#allocation23] ss:$8 sps:$4 sm:$0xff]  }
 0xafd   : > { %v4542_v13 = vadd.f32 %v4541_v1, %v9076_v38  ;;  %v4543_v12 = vpop.f32.mrb[219].mxu1  ;;  %4703 = vmatpush1.bf16.msra.mxu1 %v4650_v3  ;;  %v4612_v56 = vmax.f32 %v4538_v61, 0.0  ;;  %v6833_v3 = vld [vmem:[#allocation21 + $0xe4] ss:$8 sps:$4 sm:$0xff]   ;;  %v6890_v1 = vld [vmem:[#allocation23 + $0x14] ss:$8 sps:$4 sm:$0xff]  }
 0xafe   : > { %v4544_v47 = vadd.f32 %v4543_v12, %v9079_v19  ;;  %v4613_v5 = vmax.f32 %v4540_v28, 0.0  ;;  %v6839_v61 = vld [vmem:[#allocation20 + $0x4] ss:$8 sps:$4 sm:$0xff]  }
 0xaff   : > { %v4614_v9 = vmax.f32 %v4542_v13, 0.0  ;;  %v6887_v28 = vld [vmem:[#allocation23 + $0x4] ss:$8 sps:$4 sm:$0xff]   ;;  %v6888_v13 = vld [vmem:[#allocation23 + $0x10] ss:$8 sps:$4 sm:$0xff]  }
 0xb00   : > { %v4615_v11 = vmax.f32 %v4544_v47, 0.0  ;;  %5429 = vmatprep.subr.bf16.mxu0 %v6887_v28  ;;  %v6893_v12 = vld [vmem:[#allocation23 + $0x24] ss:$8 sps:$4 sm:$0xff]   ;;  %v6891_v47 = vld [vmem:[#allocation23 + $0x20] ss:$8 sps:$4 sm:$0xff]  }
 0xb01   : > { %v4652_v32 = vpack.c.bf16 %v4614_v9, %v4612_v56  ;;  %5430 = vmatpush1.bf16.msra.mxu0 %v6885_v10  ;;  %v6896_v56 = vld [vmem:[#allocation23 + $0x34] ss:$8 sps:$4 sm:$0xff]   ;;  %v6894_v9 = vld [vmem:[#allocation23 + $0x30] ss:$8 sps:$4 sm:$0xff]   ;;  %v6875_v28 = vld [vmem:[#allocation20 + $0xc4] ss:$8 sps:$4 sm:$0xff]  }
 0xb02   : > { %v4653_v62 = vpack.c.bf16 %v4615_v11, %v4613_v5  ;;  %v4547_v4 = vpop.f32.mrb[220].mxu1  ;;  %5431 = vmatprep.subr.bf16.mxu0 %v6890_v1  ;;  %v6899_v5 = vld [vmem:[#allocation23 + $0x44] ss:$8 sps:$4 sm:$0xff]   ;;  %v6897_v11 = vld [vmem:[#allocation23 + $0x40] ss:$8 sps:$4 sm:$0xff]  }
 0xb03   : > { %v4548_v52 = vadd.f32 %v4547_v4, %v9076_v38  ;;  %v4549_v42 = vpop.f32.mrb[221].mxu1  ;;  %v6905_v4 = vld [vmem:[#allocation23 + $0x64] ss:$8 sps:$4 sm:$0xff]   ;;  %v6870_v10 = vld [vmem:[#allocation20 + $0xb0] ss:$8 sps:$4 sm:$0xff]  }
 0xb04   : > { %v4550_v59 = vadd.f32 %v4549_v42, %v9079_v19  ;;  %v4551_v48 = vpop.f32.mrb[222].mxu1  ;;  %4704 = vmatprep.subr.bf16.mxu1 %v4653_v62  ;;  %v6900_v62 = vld [vmem:[#allocation23 + $0x50] ss:$8 sps:$4 sm:$0xff]   ;;  %v6908_v42 = vld [vmem:[#allocation23 + $0x74] ss:$8 sps:$4 sm:$0xff]  }
 0xb05   : > { %v4552_v44 = vadd.f32 %v4551_v48, %v9076_v38  ;;  %v4553_v40 = vpop.f32.mrb[223].mxu1  ;;  %4705 = vmatpush1.bf16.msra.mxu1 %v4652_v32  ;;  %v4616_v23 = vmax.f32 %v4548_v52, 0.0  ;;  %v6792_v38 = vld [vmem:[#allocation21 + $0x10] ss:$8 sps:$4 sm:$0xff]   ;;  %5432 = vmatpush1.bf16.msra.mxu0 %v6888_v13  ;;  %v6902_v32 = vld [vmem:[#allocation23 + $0x54] ss:$8 sps:$4 sm:$0xff]  }
 0xb06   : > { %v4554_v45 = vadd.f32 %v4553_v40, %v9079_v19  ;;  %v4617_v31 = vmax.f32 %v4550_v59, 0.0  ;;  %v6797_v19 = vld [vmem:[#allocation21 + $0x24] ss:$8 sps:$4 sm:$0xff]   ;;  %5433 = vmatprep.subr.bf16.mxu0 %v6893_v12  ;;  %v6903_v52 = vld [vmem:[#allocation23 + $0x60] ss:$8 sps:$4 sm:$0xff]  }
 0xb07   : > { %v4618_v36 = vmax.f32 %v4552_v44, 0.0  ;;  %v6906_v59 = vld [vmem:[#allocation23 + $0x70] ss:$8 sps:$4 sm:$0xff]   ;;  %v6911_v48 = vld [vmem:[#allocation23 + $0x84] ss:$8 sps:$4 sm:$0xff]  }
 0xb08   : > { %v4619_v21 = vmax.f32 %v4554_v45, 0.0  ;;  %v6909_v44 = vld [vmem:[#allocation23 + $0x80] ss:$8 sps:$4 sm:$0xff]   ;;  %v6914_v40 = vld [vmem:[#allocation23 + $0x94] ss:$8 sps:$4 sm:$0xff]  }
 0xb09   : > { %v4654_v27 = vpack.c.bf16 %v4618_v36, %v4616_v23  ;;  %5434 = vmatpush1.bf16.msra.mxu0 %v6891_v47  ;;  %v6912_v45 = vld [vmem:[#allocation23 + $0x90] ss:$8 sps:$4 sm:$0xff]   ;;  %v6917_v23 = vld [vmem:[#allocation23 + $0xa4] ss:$8 sps:$4 sm:$0xff]   ;;  %v6915_v36 = vld [vmem:[#allocation23 + $0xa0] ss:$8 sps:$4 sm:$0xff]  }
 0xb0a   : > { %v4655_v37 = vpack.c.bf16 %v4619_v21, %v4617_v31  ;;  %5435 = vmatprep.subr.bf16.mxu0 %v6896_v56  ;;  %v6920_v31 = vld [vmem:[#allocation23 + $0xb4] ss:$8 sps:$4 sm:$0xff]   ;;  %v6918_v21 = vld [vmem:[#allocation23 + $0xb0] ss:$8 sps:$4 sm:$0xff]   ;;  %v6873_v1 = vld [vmem:[#allocation20 + $0xc0] ss:$8 sps:$4 sm:$0xff]  }
 0xb0b   : > { %v6878_v13 = vld [vmem:[#allocation20 + $0xd4] ss:$8 sps:$4 sm:$0xff]   ;;  %v6876_v12 = vld [vmem:[#allocation20 + $0xd0] ss:$8 sps:$4 sm:$0xff]   ;;  %v6881_v47 = vld [vmem:[#allocation20 + $0xe4] ss:$8 sps:$4 sm:$0xff]  }
 0xb0c   : > { %4706 = vmatprep.subr.bf16.mxu1 %v4655_v37  ;;  %v6921_v37 = vld [vmem:[#allocation23 + $0xc0] ss:$8 sps:$4 sm:$0xff]  }
 0xb0d   : > { %4707 = vmatpush1.bf16.msra.mxu1 %v4654_v27  ;;  %5436 = vmatpush1.bf16.msra.mxu0 %v6894_v9  ;;  %v6923_v27 = vld [vmem:[#allocation23 + $0xc4] ss:$8 sps:$4 sm:$0xff]   ;;  %v6879_v56 = vld [vmem:[#allocation20 + $0xe0] ss:$8 sps:$4 sm:$0xff]   ;;  %v6884_v9 = vld [vmem:[#allocation20 + $0xf4] ss:$8 sps:$4 sm:$0xff]  }
 0xb0e   : > { %4957 = vmatprep.subr.bf16.mxu1 %v6791_v6  ;;  %5437 = vmatprep.subr.bf16.mxu0 %v6899_v5  ;;  %v6926_v6 = vld [vmem:[#allocation23 + $0xd4] ss:$8 sps:$4 sm:$0xff]   ;;  %v6882_v5 = vld [vmem:[#allocation20 + $0xf0] ss:$8 sps:$4 sm:$0xff]  }
 0xb10   : > { %4709 = vmatmul.mubr.bf16.vlgmr.msra.gmra.mrb[224].mxu1 %v6783_v35 }
 0xb11   : > { %4718 = vmatprep.mubr.bf16.mxu1 %v6786_v8  ;;  %4958 = vmatpush1.bf16.msra.mxu1 %v6789_v51 }
 0xb12   : > { %4959 = vmatprep.subr.bf16.mxu1 %v6794_v33  ;;  %5438 = vmatpush1.bf16.msra.mxu0 %v6897_v11  ;;  %v6924_v33 = vld [vmem:[#allocation23 + $0xd0] ss:$8 sps:$4 sm:$0xff]   ;;  %v6929_v11 = vld [vmem:[#allocation23 + $0xe4] ss:$8 sps:$4 sm:$0xff]  }
 0xb13   : > { %5439 = vmatprep.subr.bf16.mxu0 %v6902_v32  ;;  %v6927_v32 = vld [vmem:[#allocation23 + $0xe0] ss:$8 sps:$4 sm:$0xff]  }
 0xb15   : > { %4960 = vmatpush1.bf16.msra.mxu1 %v6792_v38 }
 0xb16   : > { %4961 = vmatprep.subr.bf16.mxu1 %v6797_v19  ;;  %5440 = vmatpush1.bf16.msra.mxu0 %v6900_v62  ;;  %v6932_v62 = vld [vmem:[#allocation23 + $0xf4] ss:$8 sps:$4 sm:$0xff]  }
 0xb17   : > { %5441 = vmatprep.subr.bf16.mxu0 %v6905_v4  ;;  %v6930_v4 = vld [vmem:[#allocation23 + $0xf0] ss:$8 sps:$4 sm:$0xff]  }
 0xb18   : > { %4719 = vmatmul.mubr.bf16.gmra.mrb[228].mxu1 %v6788_v49 }
 0xb19   : > { %4962 = vmatpush1.bf16.msra.mxu1 %v6795_v55 }
 0xb1a   : > { %4963 = vmatprep.subr.bf16.mxu1 %v6800_v2  ;;  %5442 = vmatpush1.bf16.msra.mxu0 %v6903_v52  ;;  %v6933_v52 = vld [vmem:[#allocation24 + $0x40] sm:$0xff]  }
 0xb1b   : > { %5443 = vmatprep.subr.bf16.mxu0 %v6908_v42  ;;  %v5203_v42 = vld [vmem:[%s9394_s10] sm:$0x3]  ;;  %s7477_s10 = sshll.u32 %s7592_s23, 4  ;;  %s7478_s10 = int_to_ptr.vmem [resolvable:$false] %s7477_s10 }
 0xb1c   : > { %s7479_s19 = scalar_lea.vmem %s7478_s10, 512  ;;  %p7480_p13 = scmp.lt.s32.totalorder %s9173_s21, %s7478_s10 }
 0xb1d   : > { %4964 = vmatpush1.bf16.msra.mxu1 %v6798_v0  ;;  %p7481_p0 = scmp.lt.s32.totalorder %s7479_s19, %s7473_s11 }
 0xb1e   : > { %4965 = vmatprep.subr.bf16.mxu1 %v6803_v63  ;;  %5444 = vmatpush1.bf16.msra.mxu0 %v6906_v59  ;;  %v5208_v59 = vrot.slane %v5203_v42, %v9391_v54 }
 0xb1f   : > { %5445 = vmatprep.subr.bf16.mxu0 %v6911_v48  ;;  %v5212_v48 = vrot.slane %v5203_v42, %v9392_v58  ;;  %p7482_p6 = por %p7481_p0, %p7480_p13 }
 0xb21   : > { %4966 = vmatpush1.bf16.msra.mxu1 %v6801_v41  ;;  %p7483_p2 = pnand %p7482_p6, %p7476_p1 }
 0xb22   : > { %4967 = vmatprep.subr.bf16.mxu1 %v6806_v20  ;;  %5446 = vmatpush1.bf16.msra.mxu0 %v6909_v44 }
 0xb23   : > { %5447 = vmatprep.subr.bf16.mxu0 %v6914_v40 }
 0xb25   : > { %4968 = vmatpush1.bf16.msra.mxu1 %v6804_v57  ;;  %v6837_v57 = vld [vmem:[#allocation20] ss:$8 sps:$4 sm:$0xff]  }
 0xb26   : > { %4969 = vmatprep.subr.bf16.mxu1 %v6809_v18  ;;  %5448 = vmatpush1.bf16.msra.mxu0 %v6912_v45  ;;  %v6842_v18 = vld [vmem:[#allocation20 + $0x14] ss:$8 sps:$4 sm:$0xff]  }
 0xb27   : > { %5449 = vmatprep.subr.bf16.mxu0 %v6917_v23 }
 0xb29   : > { %4970 = vmatpush1.bf16.msra.mxu1 %v6807_v34  ;;  %v6840_v34 = vld [vmem:[#allocation20 + $0x10] ss:$8 sps:$4 sm:$0xff]  }
 0xb2a   : > { %4971 = vmatprep.subr.bf16.mxu1 %v6812_v14  ;;  %5450 = vmatpush1.bf16.msra.mxu0 %v6915_v36  ;;  %v6845_v14 = vld [vmem:[#allocation20 + $0x24] ss:$8 sps:$4 sm:$0xff]  }
 0xb2b   : > { %5451 = vmatprep.subr.bf16.mxu0 %v6920_v31 }
 0xb2d   : > { %4972 = vmatpush1.bf16.msra.mxu1 %v6810_v53  ;;  %v6843_v53 = vld [vmem:[#allocation20 + $0x20] ss:$8 sps:$4 sm:$0xff]  }
 0xb2e   : > { %4973 = vmatprep.subr.bf16.mxu1 %v6815_v43  ;;  %5452 = vmatpush1.bf16.msra.mxu0 %v6918_v21  ;;  %v6848_v43 = vld [vmem:[#allocation20 + $0x34] ss:$8 sps:$4 sm:$0xff]  }
 0xb2f   : > { %5453 = vmatprep.subr.bf16.mxu0 %v6923_v27 }
 0xb31   : > { %4974 = vmatpush1.bf16.msra.mxu1 %v6813_v39  ;;  %v6846_v39 = vld [vmem:[#allocation20 + $0x30] ss:$8 sps:$4 sm:$0xff]  }
 0xb32   : > { %4975 = vmatprep.subr.bf16.mxu1 %v6818_v26  ;;  %5454 = vmatpush1.bf16.msra.mxu0 %v6921_v37  ;;  %v6851_v26 = vld [vmem:[#allocation20 + $0x44] ss:$8 sps:$4 sm:$0xff]  }
 0xb33   : > { %5455 = vmatprep.subr.bf16.mxu0 %v6926_v6 }
 0xb35   : > { %4976 = vmatpush1.bf16.msra.mxu1 %v6816_v16  ;;  %v6849_v16 = vld [vmem:[#allocation20 + $0x40] ss:$8 sps:$4 sm:$0xff]  }
 0xb36   : > { %4977 = vmatprep.subr.bf16.mxu1 %v6821_v15  ;;  %5456 = vmatpush1.bf16.msra.mxu0 %v6924_v33  ;;  %v6854_v15 = vld [vmem:[#allocation20 + $0x54] ss:$8 sps:$4 sm:$0xff]  }
 0xb37   : > { %5457 = vmatprep.subr.bf16.mxu0 %v6929_v11 }
 0xb39   : > { %4978 = vmatpush1.bf16.msra.mxu1 %v6819_v30  ;;  %v6852_v30 = vld [vmem:[#allocation20 + $0x50] ss:$8 sps:$4 sm:$0xff]  }
 0xb3a   : > { %4979 = vmatprep.subr.bf16.mxu1 %v6824_v29  ;;  %v6857_v29 = vld [vmem:[#allocation20 + $0x64] ss:$8 sps:$4 sm:$0xff]   ;;  %5458 = vmatpush1.bf16.msra.mxu0 %v6927_v32 }
 0xb3b   : > { %5459 = vmatprep.subr.bf16.mxu0 %v6932_v62 }
 0xb3d   : > { %4980 = vmatpush1.bf16.msra.mxu1 %v6822_v50  ;;  %v6855_v50 = vld [vmem:[#allocation20 + $0x60] ss:$8 sps:$4 sm:$0xff]  }
 0xb3e   : > { %4981 = vmatprep.subr.bf16.mxu1 %v6827_v60  ;;  %v6860_v60 = vld [vmem:[#allocation20 + $0x74] ss:$8 sps:$4 sm:$0xff]   ;;  %5460 = vmatpush1.bf16.msra.mxu0 %v6930_v4 }
 0xb3f   : > { %6234 = vmatprep.subr.bf16.mxu0 %v6933_v52 }
 0xb41   : > { %4982 = vmatpush1.bf16.msra.mxu1 %v6825_v24  ;;  %v6858_v24 = vld [vmem:[#allocation20 + $0x70] ss:$8 sps:$4 sm:$0xff]  }
 0xb42   : > { %4983 = vmatprep.subr.bf16.mxu1 %v6830_v22  ;;  %v6863_v22 = vld [vmem:[#allocation20 + $0x84] ss:$8 sps:$4 sm:$0xff]  }
 0xb45   : > { %4984 = vmatpush1.bf16.msra.mxu1 %v6828_v25  ;;  %v6861_v25 = vld [vmem:[#allocation20 + $0x80] ss:$8 sps:$4 sm:$0xff]  }
 0xb46   : > { %4985 = vmatprep.subr.bf16.mxu1 %v6833_v3  ;;  %v6864_v3 = vld [vmem:[#allocation20 + $0x90] ss:$8 sps:$4 sm:$0xff]  }
 0xb49   : > { %4986 = vmatpush1.bf16.msra.mxu1 %v6831_v46  ;;  %v6866_v46 = vld [vmem:[#allocation20 + $0x94] ss:$8 sps:$4 sm:$0xff]  }
 0xb4a   : > { %4987 = vmatprep.subr.bf16.mxu1 %v6836_v17  ;;  %v6869_v17 = vld [vmem:[#allocation20 + $0xa4] ss:$8 sps:$4 sm:$0xff]  }
 0xb4d   : > { %4988 = vmatpush1.bf16.msra.mxu1 %v6834_v7  ;;  %v6867_v7 = vld [vmem:[#allocation20 + $0xa0] ss:$8 sps:$4 sm:$0xff]  }
 0xb4e   : > { %5160 = vmatprep.subr.bf16.mxu1 %v6839_v61  ;;  %v6872_v61 = vld [vmem:[#allocation20 + $0xb4] ss:$8 sps:$4 sm:$0xff]  }
 0xbe3   : > { %v9149_v35 = vpop.f32.mrb[224].mxu1 }
 0xbe4   : > { %v4712_v8 = vpop.f32.mrb[225].mxu1 }
 0xbe5   : > { %v9151_v51 = vpop.f32.mrb[226].mxu1 }
 0xbe6   : > { %v4729_v38 = vpack.c.bf16 %v9151_v51, %v9149_v35  ;;  %v4716_v19 = vpop.f32.mrb[227].mxu1 }
 0xbe7   : > { %v4730_v49 = vpack.c.bf16 %v4716_v19, %v4712_v8  ;;  %v6935_v19 = vld [vmem:[#allocation24 + $0x48] sm:$0xff]  }
 0xbeb   : > { %v4720_v55 = vpop.f32.mrb[228].mxu1 }
 0xbec   : > { %v4722_v2 = vpop.f32.mrb[229].mxu1 }
 0xbed   : > { %v4724_v0 = vpop.f32.mrb[230].mxu1 }
 0xbee   : > { %v4731_v63 = vpack.c.bf16 %v4724_v0, %v4720_v55  ;;  %v4726_v41 = vpop.f32.mrb[231].mxu1  ;;  %v6937_v55 = vld [vmem:[#allocation24 + $0x50] sm:$0xff]   ;;  %v6939_v0 = vld [vmem:[#allocation24 + $0x58] sm:$0xff]  }
 0xbef   : > { %v4732_v20 = vpack.c.bf16 %v4726_v41, %v4722_v2  ;;  %v6938_v2 = vld [vmem:[#allocation24 + $0x10] sm:$0xff]   ;;  %v6941_v41 = vld [vmem:[#allocation24 + $0x60] sm:$0xff]  }
 0xbf1   : > { %4989 = vmatprep.mubr.bf16.mxu1 %v4732_v20  ;;  %v6942_v20 = vld [vmem:[#allocation24 + $0x20] sm:$0xff]  }
 0xbf2   : > { %4990 = vmatmul.mubr.bf16.vlgmr.msra.gmra.mrb[232].mxu1 %v4731_v63  ;;  %v6940_v63 = vld [vmem:[#allocation24 + $0x18] sm:$0xff]  }
 0xbf3   : > { %5161 = vmatpush1.bf16.msra.mxu1 %v6837_v57  ;;  %5192 = vmatprep.mubr.bf16.mxu1 %v4730_v49  ;;  %v6936_v49 = vld [vmem:[#allocation24 + $0x8] sm:$0xff]  }
 0xbf4   : > { %5162 = vmatprep.subr.bf16.mxu1 %v6842_v18  ;;  %v6943_v57 = vld [vmem:[#allocation24 + $0x68] sm:$0xff]  }
 0xbf5   : > { %v6944_v18 = vld [vmem:[#allocation24 + $0x28] sm:$0xff]  }
 0xbf7   : > { %5163 = vmatpush1.bf16.msra.mxu1 %v6840_v34  ;;  %v6945_v34 = vld [vmem:[#allocation24 + $0x70] sm:$0xff]  }
 0xbf8   : > { %5164 = vmatprep.subr.bf16.mxu1 %v6845_v14  ;;  %v6946_v14 = vld [vmem:[#allocation24 + $0x30] sm:$0xff]  }
 0xbfb   : > { %5165 = vmatpush1.bf16.msra.mxu1 %v6843_v53  ;;  %v6947_v53 = vld [vmem:[#allocation24 + $0x78] sm:$0xff]  }
 0xbfc   : > { %5166 = vmatprep.subr.bf16.mxu1 %v6848_v43  ;;  %v6948_v43 = vld [vmem:[#allocation24 + $0x38] sm:$0xff]  }
 0xbff   : > { %5167 = vmatpush1.bf16.msra.mxu1 %v6846_v39  ;;  %v5257_v39 = vld [vmem:[%s9395_s8] sm:$0x3] }
 0xc00   : > { %5168 = vmatprep.subr.bf16.mxu1 %v6851_v26  ;;  %v5262_v26 = vrot.slane %v5257_v39, %v9391_v54 }
 0xc03   : > { %5169 = vmatpush1.bf16.msra.mxu1 %v6849_v16  ;;  %v5266_v16 = vrot.slane %v5257_v39, %v9392_v58  ;;  %v6209_v58 = vld [vmem:[%s9396_s20] ss:$0 sm:$0xff] }
 0xc04   : > { %5170 = vmatprep.subr.bf16.mxu1 %v6854_v15 }
 0xc07   : > { %5171 = vmatpush1.bf16.msra.mxu1 %v6852_v30 }
 0xc08   : > { %5172 = vmatprep.subr.bf16.mxu1 %v6857_v29 }
 0xc0b   : > { %5173 = vmatpush1.bf16.msra.mxu1 %v6855_v50 }
 0xc0c   : > { %5174 = vmatprep.subr.bf16.mxu1 %v6860_v60 }
 0xc0f   : > { %5175 = vmatpush1.bf16.msra.mxu1 %v6858_v24 }
 0xc10   : > { %5176 = vmatprep.subr.bf16.mxu1 %v6863_v22 }
 0xc13   : > { %5177 = vmatpush1.bf16.msra.mxu1 %v6861_v25 }
 0xc14   : > { %5178 = vmatprep.subr.bf16.mxu1 %v6866_v46 }
 0xc17   : > { %5179 = vmatpush1.bf16.msra.mxu1 %v6864_v3 }
 0xc18   : > { %5180 = vmatprep.subr.bf16.mxu1 %v6869_v17 }
 0xc1b   : > { %5181 = vmatpush1.bf16.msra.mxu1 %v6867_v7 }
 0xc1c   : > { %5182 = vmatprep.subr.bf16.mxu1 %v6872_v61 }
 0xc1f   : > { %5183 = vmatpush1.bf16.msra.mxu1 %v6870_v10 }
 0xc20   : > { %5184 = vmatprep.subr.bf16.mxu1 %v6875_v28 }
 0xc23   : > { %5185 = vmatpush1.bf16.msra.mxu1 %v6873_v1 }
 0xc24   : > { %5186 = vmatprep.subr.bf16.mxu1 %v6878_v13 }
 0xc27   : > { %5187 = vmatpush1.bf16.msra.mxu1 %v6876_v12 }
 0xc28   : > { %5188 = vmatprep.subr.bf16.mxu1 %v6881_v47 }
 0xc2b   : > { %5189 = vmatpush1.bf16.msra.mxu1 %v6879_v56 }
 0xc2c   : > { %5190 = vmatprep.subr.bf16.mxu1 %v6884_v9 }
 0xc2f   : > { %5191 = vmatpush1.bf16.msra.mxu1 %v6882_v5 }
 0xc32   : > { %5193 = vmatmul.mubr.bf16.vlgmr.msra.gmra.mrb[232].mxu1 %v4729_v38  ;;  %v6934_v38 = vld [vmem:[#allocation24] sm:$0xff]  }
 0xd05   : > { %v5194_v44 = vpop.f32.mrb[232].mxu1 }
 0xd06   : > { %v5215_v40 = vadd.f32 %v5208_v59, %v5194_v44  ;;  %v5196_v45 = vpop.f32.mrb[233].mxu1 }
 0xd07   : > { %v5216_v23 = vadd.f32 %v5212_v48, %v5196_v45  ;;  %v5198_v36 = vpop.f32.mrb[234].mxu1 }
 0xd08   : > { %v5217_v31 = vadd.f32 %v5208_v59, %v5198_v36  ;;  %v5200_v21 = vpop.f32.mrb[235].mxu1  ;;  %v5219_v37 = vmax.f32 %v5215_v40, 0.0 }
 0xd09   : > { %v5218_v27 = vadd.f32 %v5212_v48, %v5200_v21  ;;  %v5220_v35 = vmax.f32 %v5216_v23, 0.0 }
 0xd0a   : > { %v5221_v6 = vmax.f32 %v5217_v31, 0.0 }
 0xd0b   : > { %v5222_v8 = vmax.f32 %v5218_v27, 0.0 }
 0xd0c   : > { %v5223_v51 = vpack.c.bf16 %v5221_v6, %v5219_v37 }
 0xd0d   : > { %v5224_v33 = vpack.c.bf16 %v5222_v8, %v5220_v35 }
 0xd0f   : > { %5461 = vmatprep.mubr.bf16.mxu0 %v5224_v33 }
 0xd10   : > { %5462 = vmatmul.mubr.bf16.vlgmr.msra.gmra.mrb[224].mxu0 %v5223_v51 }
 0xd11   : > { %6235 = vmatpush3.bf16.msra.mxu0 %v6934_v38 }
 0xd12   : > { %6236 = vmatprep.subr.bf16.mxu0 %v6935_v19 }
 0xd15   : > { %6237 = vmatpush3.bf16.msra.mxu0 %v6936_v49 }
 0xd16   : > { %6238 = vmatprep.subr.bf16.mxu0 %v6937_v55 }
 0xd19   : > { %6239 = vmatpush3.bf16.msra.mxu0 %v6938_v2 }
 0xd1a   : > { %6240 = vmatprep.subr.bf16.mxu0 %v6939_v0 }
 0xd1d   : > { %6241 = vmatpush3.bf16.msra.mxu0 %v6940_v63 }
 0xd1e   : > { %6242 = vmatprep.subr.bf16.mxu0 %v6941_v41 }
 0xd21   : > { %6243 = vmatpush3.bf16.msra.mxu0 %v6942_v20 }
 0xd22   : > { %6244 = vmatprep.subr.bf16.mxu0 %v6943_v57 }
 0xd25   : > { %6245 = vmatpush3.bf16.msra.mxu0 %v6944_v18 }
 0xd26   : > { %6246 = vmatprep.subr.bf16.mxu0 %v6945_v34 }
 0xd29   : > { %6247 = vmatpush3.bf16.msra.mxu0 %v6946_v14 }
 0xd2a   : > { %6248 = vmatprep.subr.bf16.mxu0 %v6947_v53 }
 0xd2d   : > { %6249 = vmatpush3.bf16.msra.mxu0 %v6948_v43 }
 0xde3   : > { %v5463_v15 = vpop.f32.mrb[224].mxu0 }
 0xde4   : > { %v5464_v30 = vadd.f32 %v5463_v15, %v5262_v26  ;;  %v5465_v29 = vpop.f32.mrb[225].mxu0 }
 0xde5   : > { %v5466_v50 = vadd.f32 %v5465_v29, %v5266_v16  ;;  %v5467_v60 = vpop.f32.mrb[226].mxu0 }
 0xde6   : > { %v5468_v24 = vadd.f32 %v5467_v60, %v5262_v26  ;;  %v5469_v22 = vpop.f32.mrb[227].mxu0  ;;  %v5472_v46 = vmax.f32 %v5464_v30, 0.0 }
 0xde7   : > { %v5470_v25 = vadd.f32 %v5469_v22, %v5266_v16  ;;  %v5473_v17 = vmax.f32 %v5466_v50, 0.0 }
 0xde8   : > { %v5474_v3 = vmax.f32 %v5468_v24, 0.0 }
 0xde9   : > { %v5475_v7 = vmax.f32 %v5470_v25, 0.0 }
 0xdea   : > { %v5476_v61 = vpack.c.bf16 %v5474_v3, %v5472_v46 }
 0xdeb   : > { %v5477_v10 = vpack.c.bf16 %v5475_v7, %v5473_v17 }
 0xded   : > { %5645 = vmatprep.mubr.bf16.mxu0 %v5477_v10 }
 0xdee   : > { %5646 = vmatmul.mubr.bf16.vlgmr.msra.gmra.mrb[228].mxu0 %v5476_v61 }
 0xec1   : > { %v6250_v54 = vpop.f32.mrb[228].mxu0 }
 0xec2   : > { %v6251_v28 = vpop.f32.mrb[229].mxu0 }
 0xec3   : > { %v6252_v1 = vadd.f32 %v6251_v28, %v6250_v54  ;;  %v6253_v13 = vpop.f32.mrb[230].mxu0 }
 0xec4   : > { %v6254_v12 = vpop.f32.mrb[231].mxu0 }
 0xec5   : > { %v5648_v47 = vadd.f32 %v6252_v1, %v6209_v58  ;;  %v6255_v56 = vadd.f32 %v6254_v12, %v6253_v13 }
 0xec7   : > { %5654 = vst [vmem:[%s915_s0] sm:$0xff] %v5648_v47  ;;  %v5651_v9 = vadd.f32 %v6255_v56, %v6209_v58 }
 0xec9   : > { %5655 = vst [vmem:[%s915_s0 + $0x8] sm:$0xff] %v5651_v9 }
 0xeca   : > { %7486 = shalt.err (!%p7483_p2)
}
 0xecb   : > { %s7487_s26 = scalar_lea.hbm %s9178_s18, 256  ;;  %s7491_s16 = scalar_lea.hbm %s9397_s15, 512 }
 0xecc   : > { %p7488_p4 = scmp.ne.s32.totalorder %s9178_s18, %s7487_s26  ;;  %p7492_p7 = scmp.lt.u32.totalorder %s9178_s18, %s9397_s15 }
 0xecd   : > { %p7493_p9 = scmp.lt.u32.totalorder %s7491_s16, %s7487_s26  ;;  %p7495_p11 = scmp.lt.u32.totalorder %s7487_s26, %s9178_s18 }
 0xece   : > { %p7489_p10 = pnand %p7488_p4, %p9398_p3 }
 0xecf   : > { %p7494_p8 = por %p7493_p9, %p7492_p7 }
 0xed0   : > { %p7490_p5 = pneg %p7489_p10 }
 0xed1   : > { %p7496_p12 = por %p7495_p11, %p7494_p8 }
 0xed3   : > { %p7497_p1 = pnand %p7496_p12, %p7490_p5 }
 0xed5   : > { %7500 = shalt.err (!%p7497_p1)
}
 0xed6   : > { %s7593_s0 = smov 128   ;;  %s7594_s17 = smov 8  }
 0xed7   : > { %6376 = dma.vmem_to_hbm [thread:$0]  (%p9398_p3), %s9173_s21, 256, %s9178_s18, %s5657_s9, %s7593_s0, %s7593_s0, %s7594_s17  }
 0xed8 PF: > { %s5685_s12 = sand.u32 1, %s7559_s3   ;;  %p9399_p13 = scmp.ne.s32.totalorder %s9329_s4, 0 }
 0xed9   : > { %p9400_p0 = scmp.ge.s32.totalorder %s7571_s30, 2  ;;  %s5686_s1 = scalar_lea.sflag [#allocation5], %s5685_s12 }
 0xedb   : > { %p6423_p6 = pnand %p9400_p0, %p9399_p13 }
 0xedd   : > { %7554 = dma.done.wait (!%p6423_p6), %s5686_s1, 256  }
 0xede   : > { %7556 = vsyncadd (!%p6423_p6), %s5686_s1, 4294967040  ;;  %p44_p2 = scmp.ge.s32.totalorder %s8030_s14, 4   ;;  %s9401_s3 = smov %s7563_s28 }
 0xedf   : > { %s9402_s28 = smov %s7567_s29  ;;  %s9403_s29 = smov %s8041_s6 }
 0xee0   : > { %s9404_s30 = smov %s8030_s14  ;;  %46 = sbr.rel (!%p44_p2) target bundleno = 37 (0x25), region = 214 }
 0xee7   :  { %5691 = vsyncpa [#allocation4], 1 }
 0xee8   :  { %5693 = vsyncpa [#allocation4 + $0x1], 1 }
 0xee9   :  { %5694 = vsyncpa [#allocation7], 1 }
 0xeea   :  { %5696 = vsyncpa [#allocation7 + $0x1], 1 }
 0xeeb   :  { %5697 = vsyncpa [#allocation10], 1 }
 0xeec   :  { %5698 = vsyncpa [#allocation13], 1 }
 0xeed   :  { %5699 = vsyncpa [#allocation16], 1 }
 0xeee   :  { %5700 = vsyncpa [#allocation19], 1 }
 0xeef   :  { %5701 = vsyncpa [#allocation22], 1 }
 0xef0   :  { %5702 = vsyncpa [#allocation25], 1 }
 0xef1   :  { %5703 = vsyncpa [#allocation5], 1 }
 0xef2   :  { %5705 = vsyncpa [#allocation5 + $0x1], 1 }

</bundles_post_ra>
